<compile_context>
chip_gen: v7x
topology: tpu7x:2x2x1
jax: 0.10.0
libtpu: 0.0.40
codegen_flags: <defaults>
</compile_context>

<pallas_src>
import functools

import jax
import jax.numpy as jnp
from jax.experimental import pallas as pl
from jax.experimental.pallas import tpu as pltpu


_NUM_VAE = 5
_LAT = 50          # latent dim of every VAE encoder (fc31 out)
_LAT_PAD = 128     # padded latent slot width (lane-aligned)


def _round_up(n, m):
    return ((n + m - 1) // m) * m


# ---------------------------------------------------------------------------
# Fused Pallas kernel: 5 x (fc1->relu->fc2->relu->fc31) + merged head
# ---------------------------------------------------------------------------

def _deepdep_fused_kernel(*refs):
    """refs = [x0..x4,
               (w1,b1,w2,b2,w3,b3) * 5,
               wm1, bm1, wm2, bm2, wo, bo,
               o_ref]"""
    xs = refs[:_NUM_VAE]
    vae_refs = refs[_NUM_VAE:_NUM_VAE + 6 * _NUM_VAE]
    wm1_ref, bm1_ref, wm2_ref, bm2_ref, wo_ref, bo_ref = \
        refs[_NUM_VAE + 6 * _NUM_VAE:-1]
    o_ref = refs[-1]

    merged_pre = None
    for i in range(_NUM_VAE):
        w1, b1, w2, b2, w3, b3 = vae_refs[6 * i:6 * i + 6]
        # relu(x @ W1 + b1)
        h = jnp.dot(xs[i][...], w1[...],
                    preferred_element_type=jnp.float32) + b1[...]
        h = jnp.maximum(h, 0.0).astype(jnp.bfloat16)
        # relu(. @ W2 + b2)
        h = jnp.dot(h, w2[...],
                    preferred_element_type=jnp.float32) + b2[...]
        h = jnp.maximum(h, 0.0).astype(jnp.bfloat16)
        # mu = . @ W31 + b31
        mu = (jnp.dot(h, w3[...],
                      preferred_element_type=jnp.float32) + b3[...]
              ).astype(jnp.bfloat16)
        # cat(mu_0..mu_4) @ W_merged1  ==  sum_i mu_i @ W_merged1[block_i]
        w_blk = wm1_ref[pl.ds(i * _LAT_PAD, _LAT_PAD), :]   # static slice: free
        contrib = jnp.dot(mu, w_blk, preferred_element_type=jnp.float32)
        merged_pre = contrib if merged_pre is None else merged_pre + contrib

    h = jnp.maximum(merged_pre + bm1_ref[...], 0.0).astype(jnp.bfloat16)
    h = jnp.dot(h, wm2_ref[...],
                preferred_element_type=jnp.float32) + bm2_ref[...]
    h = jnp.maximum(h, 0.0).astype(jnp.bfloat16)
    o_ref[...] = jnp.dot(h, wo_ref[...],
                         preferred_element_type=jnp.float32) + bo_ref[...]


# ---------------------------------------------------------------------------
# Parameter construction (deterministic, synthetic, pre-padded + bf16 weights)
# ---------------------------------------------------------------------------

def _init_linear_padded(key, in_dim, out_dim, in_pad=None, out_pad=None):
    """y = x @ W + b with W:(in_pad, out_pad) bf16, b:(1, out_pad) f32; pad = zeros."""
    in_pad = _round_up(in_dim, 128) if in_pad is None else in_pad
    out_pad = _round_up(out_dim, 128) if out_pad is None else out_pad
    kw, kb = jax.random.split(key)
    w = jax.random.normal(kw, (in_dim, out_dim), jnp.float32) / jnp.sqrt(
        jnp.float32(in_dim))
    b = 0.01 * jax.random.normal(kb, (1, out_dim), jnp.float32)
    wp = jnp.zeros((in_pad, out_pad), jnp.float32).at[:in_dim, :out_dim].set(w)
    bp = jnp.zeros((1, out_pad), jnp.float32).at[:, :out_dim].set(b)
    return wp.astype(jnp.bfloat16), bp


def _init_vae_encoder(key, input_dim, first_layer_dim, second_layer_dim,
                      latent_dim=_LAT):
    k1, k2, k3 = jax.random.split(key, 3)
    return {
        "fc1": _init_linear_padded(k1, input_dim, first_layer_dim),
        "fc2": _init_linear_padded(k2, first_layer_dim, second_layer_dim),
        "fc31": _init_linear_padded(k3, second_layer_dim, latent_dim,
                                    out_pad=_LAT_PAD),
    }


def _init_merged1(key, dense_layer_dim):
    """fc_merged1 (250 -> dense) stored as 5 lane-aligned 128-row blocks."""
    dense_pad = _round_up(dense_layer_dim, 128)
    kw, kb = jax.random.split(key)
    w = jax.random.normal(kw, (_NUM_VAE * _LAT, dense_layer_dim),
                          jnp.float32) / jnp.sqrt(jnp.float32(_NUM_VAE * _LAT))
    b = 0.01 * jax.random.normal(kb, (1, dense_layer_dim), jnp.float32)
    wp = jnp.zeros((_NUM_VAE * _LAT_PAD, dense_pad), jnp.float32)
    for i in range(_NUM_VAE):
        wp = wp.at[i * _LAT_PAD:i * _LAT_PAD + _LAT, :dense_layer_dim].set(
            w[i * _LAT:(i + 1) * _LAT])
    bp = jnp.zeros((1, dense_pad), jnp.float32).at[:, :dense_layer_dim].set(b)
    return wp.astype(jnp.bfloat16), bp


def init_deepdep_params(key, dims_mut, dims_exp, dims_cna, dims_meth,
                        fprint_dim, dense_layer_dim):
    keys = jax.random.split(key, 8)
    return {
        # VAE hidden sizes are hard-coded in the PyTorch module.
        "vae_mut": _init_vae_encoder(keys[0], dims_mut, 1000, 100),
        "vae_exp": _init_vae_encoder(keys[1], dims_exp, 500, 200),
        "vae_cna": _init_vae_encoder(keys[2], dims_cna, 500, 200),
        "vae_meth": _init_vae_encoder(keys[3], dims_meth, 500, 200),
        "vae_fprint": _init_vae_encoder(keys[4], fprint_dim, 1000, 100),
        "fc_merged1": _init_merged1(keys[5], dense_layer_dim),
        "fc_merged2": _init_linear_padded(keys[6], dense_layer_dim,
                                          dense_layer_dim),
        "fc_out": _init_linear_padded(keys[7], dense_layer_dim, 1, out_pad=128),
    }


# ---------------------------------------------------------------------------
# DeepDEP forward (single fused pallas_call)
# ---------------------------------------------------------------------------

_VAE_NAMES = ("vae_mut", "vae_exp", "vae_cna", "vae_meth", "vae_fprint")


def deepdep_forward(params, mut, exp, cna, meth, fprint):
    raw_inputs = (mut, exp, cna, meth, fprint)
    batch = mut.shape[0]

    # Rows per grid step: sublane-aligned, capped at 256 so large batches
    # amortize the one-time weight DMA across many MXU rows / grid steps.
    bm = min(256, _round_up(batch, 8))
    batch_pad = _round_up(batch, bm)
    grid = (batch_pad // bm,)

    # --- pad + cast inputs to bf16, build their BlockSpecs -------------------
    x_args, x_specs = [], []
    for name, x in zip(_VAE_NAMES, raw_inputs):
        in_pad = params[name]["fc1"][0].shape[0]
        xp = jnp.zeros((batch_pad, in_pad), jnp.bfloat16)
        xp = xp.at[:batch, :x.shape[1]].set(x.astype(jnp.bfloat16))
        x_args.append(xp)
        x_specs.append(pl.BlockSpec((bm, in_pad), lambda i: (i, 0)))

    # --- weights/biases: full-array blocks, constant index_map (VMEM-resident)
    w_args = []
    for name in _VAE_NAMES:
        p = params[name]
        for layer in ("fc1", "fc2", "fc31"):
            w_args.extend(p[layer])
    for layer in ("fc_merged1", "fc_merged2", "fc_out"):
        w_args.extend(params[layer])
    w_specs = [pl.BlockSpec(a.shape, lambda i: (0, 0)) for a in w_args]

    out_pad = params["fc_out"][0].shape[1]          # 128
    out_spec = pl.BlockSpec((bm, out_pad), lambda i: (i, 0))

    # --- cost estimate (helps XLA schedule around the custom call) -----------
    flops = 2 * batch_pad * sum(
        int(w_args[j].shape[0]) * int(w_args[j].shape[1])
        for j in range(0, len(w_args), 2))
    bytes_accessed = (
        sum(int(a.size) * a.dtype.itemsize for a in x_args)
        + sum(int(a.size) * a.dtype.itemsize for a in w_args)
        + batch_pad * out_pad * 4)
    cost = pl.CostEstimate(flops=flops, transcendentals=0,
                           bytes_accessed=bytes_accessed)

    # --- VMEM budget: raise the scoped limit only if the resident weights +
    #     double-buffered streams would not fit the 32 MiB default.
    resident_bytes = sum(int(a.size) * a.dtype.itemsize for a in w_args)
    stream_bytes = 2 * sum(bm * int(a.shape[1]) * a.dtype.itemsize
                           for a in x_args) + 2 * bm * out_pad * 4
    est_vmem = resident_bytes + stream_bytes + (4 << 20)   # + scratch headroom
    vmem_limit = None if est_vmem <= (32 << 20) else min(est_vmem, 96 << 20)

    out = pl.pallas_call(
        _deepdep_fused_kernel,
        out_shape=jax.ShapeDtypeStruct((batch_pad, out_pad), jnp.float32),
        grid=grid,
        in_specs=x_specs + w_specs,
        out_specs=out_spec,
        compiler_params=pltpu.CompilerParams(
            dimension_semantics=("parallel",),
            vmem_limit_bytes=vmem_limit),
        cost_estimate=cost,
    )(*x_args, *w_args)

    return out[:batch, :1]


# ---------------------------------------------------------------------------
# Pure-JAX reference (mirrors the kernel's bf16-operand / f32-accumulate math)
# ---------------------------------------------------------------------------

def _reference_forward(params, mut, exp, cna, meth, fprint):
    batch = mut.shape[0]
    mus = []
    for name, x in zip(_VAE_NAMES, (mut, exp, cna, meth, fprint)):
        p = params[name]
        in_pad = p["fc1"][0].shape[0]
        xp = jnp.zeros((batch, in_pad), jnp.bfloat16)
        xp = xp.at[:, :x.shape[1]].set(x.astype(jnp.bfloat16))
        h = jnp.dot(xp, p["fc1"][0], preferred_element_type=jnp.float32) + p["fc1"][1]
        h = jnp.maximum(h, 0.0).astype(jnp.bfloat16)
        h = jnp.dot(h, p["fc2"][0], preferred_element_type=jnp.float32) + p["fc2"][1]
        h = jnp.maximum(h, 0.0).astype(jnp.bfloat16)
        mu = jnp.dot(h, p["fc31"][0], preferred_element_type=jnp.float32) + p["fc31"][1]
        mus.append(mu.astype(jnp.bfloat16))
    merged = jnp.concatenate(mus, axis=1)                       # (batch, 640)
    h = jnp.dot(merged, params["fc_merged1"][0],
                preferred_element_type=jnp.float32) + params["fc_merged1"][1]
    h = jnp.maximum(h, 0.0).astype(jnp.bfloat16)
    h = jnp.dot(h, params["fc_merged2"][0],
                preferred_element_type=jnp.float32) + params["fc_merged2"][1]
    h = jnp.maximum(h, 0.0).astype(jnp.bfloat16)
    out = jnp.dot(h, params["fc_out"][0],
                  preferred_element_type=jnp.float32) + params["fc_out"][1]
    return out[:, :1]


# ---------------------------------------------------------------------------
# Demo / smoke test
# ---------------------------------------------------------------------------

if __name__ == "__main__":
    key = jax.random.PRNGKey(0)

    batch = 4
    dims_mut, dims_exp, dims_cna, dims_meth = 96, 80, 80, 80
    fprint_dim = 96
    dense_layer_dim = 32

    kp, km, ke, kc, kme, kf = jax.random.split(key, 6)
    params = init_deepdep_params(kp, dims_mut, dims_exp, dims_cna, dims_meth,
                                 fprint_dim, dense_layer_dim)

    mut = jax.random.normal(km, (batch, dims_mut), jnp.float32)
    exp = jax.random.normal(ke, (batch, dims_exp), jnp.float32)
    cna = jax.random.normal(kc, (batch, dims_cna), jnp.float32)
    meth = jax.random.normal(kme, (batch, dims_meth), jnp.float32)
    fprint = jax.random.normal(kf, (batch, fprint_dim), jnp.float32)

    out = jax.jit(deepdep_forward)(params, mut, exp, cna, meth, fprint)
    out = jax.block_until_ready(out)

    assert out.shape == (batch, 1), out.shape
    assert out.dtype == jnp.float32
    assert bool(jnp.all(jnp.isfinite(out)))

    ref = _reference_forward(params, mut, exp, cna, meth, fprint)
    max_err = float(jnp.max(jnp.abs(out - ref)))
    assert max_err < 5e-2, f"kernel vs reference mismatch: {max_err}"

    print("KERNEL_OK")
</pallas_src>

<mosaic_0001>
module attributes {stable_mosaic.version = 11 : i64} {
  func.func @_deepdep_fused_kernel(%arg0: i32, %arg1: memref<8x128xbf16, #tpu.memory_space<vmem>>, %arg2: memref<8x128xbf16, #tpu.memory_space<vmem>>, %arg3: memref<8x128xbf16, #tpu.memory_space<vmem>>, %arg4: memref<8x128xbf16, #tpu.memory_space<vmem>>, %arg5: memref<8x128xbf16, #tpu.memory_space<vmem>>, %arg6: memref<128x1024xbf16, #tpu.memory_space<vmem>>, %arg7: memref<1x1024xf32, #tpu.memory_space<vmem>>, %arg8: memref<1024x128xbf16, #tpu.memory_space<vmem>>, %arg9: memref<1x128xf32, #tpu.memory_space<vmem>>, %arg10: memref<128x128xbf16, #tpu.memory_space<vmem>>, %arg11: memref<1x128xf32, #tpu.memory_space<vmem>>, %arg12: memref<128x512xbf16, #tpu.memory_space<vmem>>, %arg13: memref<1x512xf32, #tpu.memory_space<vmem>>, %arg14: memref<512x256xbf16, #tpu.memory_space<vmem>>, %arg15: memref<1x256xf32, #tpu.memory_space<vmem>>, %arg16: memref<256x128xbf16, #tpu.memory_space<vmem>>, %arg17: memref<1x128xf32, #tpu.memory_space<vmem>>, %arg18: memref<128x512xbf16, #tpu.memory_space<vmem>>, %arg19: memref<1x512xf32, #tpu.memory_space<vmem>>, %arg20: memref<512x256xbf16, #tpu.memory_space<vmem>>, %arg21: memref<1x256xf32, #tpu.memory_space<vmem>>, %arg22: memref<256x128xbf16, #tpu.memory_space<vmem>>, %arg23: memref<1x128xf32, #tpu.memory_space<vmem>>, %arg24: memref<128x512xbf16, #tpu.memory_space<vmem>>, %arg25: memref<1x512xf32, #tpu.memory_space<vmem>>, %arg26: memref<512x256xbf16, #tpu.memory_space<vmem>>, %arg27: memref<1x256xf32, #tpu.memory_space<vmem>>, %arg28: memref<256x128xbf16, #tpu.memory_space<vmem>>, %arg29: memref<1x128xf32, #tpu.memory_space<vmem>>, %arg30: memref<128x1024xbf16, #tpu.memory_space<vmem>>, %arg31: memref<1x1024xf32, #tpu.memory_space<vmem>>, %arg32: memref<1024x128xbf16, #tpu.memory_space<vmem>>, %arg33: memref<1x128xf32, #tpu.memory_space<vmem>>, %arg34: memref<128x128xbf16, #tpu.memory_space<vmem>>, %arg35: memref<1x128xf32, #tpu.memory_space<vmem>>, %arg36: memref<640x128xbf16, #tpu.memory_space<vmem>>, %arg37: memref<1x128xf32, #tpu.memory_space<vmem>>, %arg38: memref<128x128xbf16, #tpu.memory_space<vmem>>, %arg39: memref<1x128xf32, #tpu.memory_space<vmem>>, %arg40: memref<128x128xbf16, #tpu.memory_space<vmem>>, %arg41: memref<1x128xf32, #tpu.memory_space<vmem>>, %arg42: memref<8x128xf32, #tpu.memory_space<vmem>>) attributes {dimension_semantics = [#tpu.dimension_semantics<parallel>], iteration_bounds = array<i64: 1>, scalar_prefetch = 0 : i64, scratch_operands = 0 : i64, tpu.core_type = #tpu.core_type<tc>, window_params = [{transform_indices = @transform_0, window_bounds = array<i64: 8, 128>}, {transform_indices = @transform_1, window_bounds = array<i64: 8, 128>}, {transform_indices = @transform_2, window_bounds = array<i64: 8, 128>}, {transform_indices = @transform_3, window_bounds = array<i64: 8, 128>}, {transform_indices = @transform_4, window_bounds = array<i64: 8, 128>}, {pipeline_mode = #tpu.pipeline_mode<synchronous>, transform_indices = @transform_5, window_bounds = array<i64: 128, 1024>}, {pipeline_mode = #tpu.pipeline_mode<synchronous>, transform_indices = @transform_6, window_bounds = array<i64: 1, 1024>}, {pipeline_mode = #tpu.pipeline_mode<synchronous>, transform_indices = @transform_7, window_bounds = array<i64: 1024, 128>}, {pipeline_mode = #tpu.pipeline_mode<synchronous>, transform_indices = @transform_8, window_bounds = array<i64: 1, 128>}, {pipeline_mode = #tpu.pipeline_mode<synchronous>, transform_indices = @transform_9, window_bounds = array<i64: 128, 128>}, {pipeline_mode = #tpu.pipeline_mode<synchronous>, transform_indices = @transform_10, window_bounds = array<i64: 1, 128>}, {pipeline_mode = #tpu.pipeline_mode<synchronous>, transform_indices = @transform_11, window_bounds = array<i64: 128, 512>}, {pipeline_mode = #tpu.pipeline_mode<synchronous>, transform_indices = @transform_12, window_bounds = array<i64: 1, 512>}, {pipeline_mode = #tpu.pipeline_mode<synchronous>, transform_indices = @transform_13, window_bounds = array<i64: 512, 256>}, {pipeline_mode = #tpu.pipeline_mode<synchronous>, transform_indices = @transform_14, window_bounds = array<i64: 1, 256>}, {pipeline_mode = #tpu.pipeline_mode<synchronous>, transform_indices = @transform_15, window_bounds = array<i64: 256, 128>}, {pipeline_mode = #tpu.pipeline_mode<synchronous>, transform_indices = @transform_16, window_bounds = array<i64: 1, 128>}, {pipeline_mode = #tpu.pipeline_mode<synchronous>, transform_indices = @transform_17, window_bounds = array<i64: 128, 512>}, {pipeline_mode = #tpu.pipeline_mode<synchronous>, transform_indices = @transform_18, window_bounds = array<i64: 1, 512>}, {pipeline_mode = #tpu.pipeline_mode<synchronous>, transform_indices = @transform_19, window_bounds = array<i64: 512, 256>}, {pipeline_mode = #tpu.pipeline_mode<synchronous>, transform_indices = @transform_20, window_bounds = array<i64: 1, 256>}, {pipeline_mode = #tpu.pipeline_mode<synchronous>, transform_indices = @transform_21, window_bounds = array<i64: 256, 128>}, {pipeline_mode = #tpu.pipeline_mode<synchronous>, transform_indices = @transform_22, window_bounds = array<i64: 1, 128>}, {pipeline_mode = #tpu.pipeline_mode<synchronous>, transform_indices = @transform_23, window_bounds = array<i64: 128, 512>}, {pipeline_mode = #tpu.pipeline_mode<synchronous>, transform_indices = @transform_24, window_bounds = array<i64: 1, 512>}, {pipeline_mode = #tpu.pipeline_mode<synchronous>, transform_indices = @transform_25, window_bounds = array<i64: 512, 256>}, {pipeline_mode = #tpu.pipeline_mode<synchronous>, transform_indices = @transform_26, window_bounds = array<i64: 1, 256>}, {pipeline_mode = #tpu.pipeline_mode<synchronous>, transform_indices = @transform_27, window_bounds = array<i64: 256, 128>}, {pipeline_mode = #tpu.pipeline_mode<synchronous>, transform_indices = @transform_28, window_bounds = array<i64: 1, 128>}, {pipeline_mode = #tpu.pipeline_mode<synchronous>, transform_indices = @transform_29, window_bounds = array<i64: 128, 1024>}, {pipeline_mode = #tpu.pipeline_mode<synchronous>, transform_indices = @transform_30, window_bounds = array<i64: 1, 1024>}, {pipeline_mode = #tpu.pipeline_mode<synchronous>, transform_indices = @transform_31, window_bounds = array<i64: 1024, 128>}, {pipeline_mode = #tpu.pipeline_mode<synchronous>, transform_indices = @transform_32, window_bounds = array<i64: 1, 128>}, {pipeline_mode = #tpu.pipeline_mode<synchronous>, transform_indices = @transform_33, window_bounds = array<i64: 128, 128>}, {pipeline_mode = #tpu.pipeline_mode<synchronous>, transform_indices = @transform_34, window_bounds = array<i64: 1, 128>}, {pipeline_mode = #tpu.pipeline_mode<synchronous>, transform_indices = @transform_35, window_bounds = array<i64: 640, 128>}, {pipeline_mode = #tpu.pipeline_mode<synchronous>, transform_indices = @transform_36, window_bounds = array<i64: 1, 128>}, {pipeline_mode = #tpu.pipeline_mode<synchronous>, transform_indices = @transform_37, window_bounds = array<i64: 128, 128>}, {pipeline_mode = #tpu.pipeline_mode<synchronous>, transform_indices = @transform_38, window_bounds = array<i64: 1, 128>}, {pipeline_mode = #tpu.pipeline_mode<synchronous>, transform_indices = @transform_39, window_bounds = array<i64: 128, 128>}, {pipeline_mode = #tpu.pipeline_mode<synchronous>, transform_indices = @transform_40, window_bounds = array<i64: 1, 128>}, {transform_indices = @transform_41, window_bounds = array<i64: 8, 128>}]} {
    %c0 = arith.constant 0 : index
    %c0_0 = arith.constant 0 : index
    %0 = vector.load %arg1[%c0, %c0_0] : memref<8x128xbf16, #tpu.memory_space<vmem>>, vector<8x128xbf16>
    %c0_1 = arith.constant 0 : index
    %c0_2 = arith.constant 0 : index
    %1 = vector.load %arg6[%c0_1, %c0_2] : memref<128x1024xbf16, #tpu.memory_space<vmem>>, vector<128x1024xbf16>
    %cst = arith.constant dense<0.000000e+00> : vector<8x1024xf32>
    %2 = tpu.matmul %0, %1, %cst {dimension_numbers = #tpu.dot_dimension_numbers<[1], [0], [0], [1], [0, 0, 1, 1], [], []>} : vector<8x128xbf16>, vector<128x1024xbf16>, vector<8x1024xf32> -> vector<8x1024xf32>
    %c0_3 = arith.constant 0 : index
    %c0_4 = arith.constant 0 : index
    %3 = vector.load %arg7[%c0_3, %c0_4] : memref<1x1024xf32, #tpu.memory_space<vmem>>, vector<1x1024xf32>
    %4 = vector.broadcast %3 : vector<1x1024xf32> to vector<8x1024xf32>
    %5 = arith.addf %2, %4 : vector<8x1024xf32>
    %cst_5 = arith.constant 0.000000e+00 : f32
    %6 = vector.broadcast %cst_5 : f32 to vector<8x1024xf32>
    %7 = arith.maximumf %5, %6 : vector<8x1024xf32>
    %8 = arith.truncf %7 : vector<8x1024xf32> to vector<8x1024xbf16>
    %c0_6 = arith.constant 0 : index
    %c0_7 = arith.constant 0 : index
    %9 = vector.load %arg8[%c0_6, %c0_7] : memref<1024x128xbf16, #tpu.memory_space<vmem>>, vector<1024x128xbf16>
    %cst_8 = arith.constant dense<0.000000e+00> : vector<8x128xf32>
    %10 = tpu.matmul %8, %9, %cst_8 {dimension_numbers = #tpu.dot_dimension_numbers<[1], [0], [0], [1], [0, 0, 1, 1], [], []>} : vector<8x1024xbf16>, vector<1024x128xbf16>, vector<8x128xf32> -> vector<8x128xf32>
    %c0_9 = arith.constant 0 : index
    %c0_10 = arith.constant 0 : index
    %11 = vector.load %arg9[%c0_9, %c0_10] : memref<1x128xf32, #tpu.memory_space<vmem>>, vector<1x128xf32>
    %12 = vector.broadcast %11 : vector<1x128xf32> to vector<8x128xf32>
    %13 = arith.addf %10, %12 : vector<8x128xf32>
    %cst_11 = arith.constant 0.000000e+00 : f32
    %14 = vector.broadcast %cst_11 : f32 to vector<8x128xf32>
    %15 = arith.maximumf %13, %14 : vector<8x128xf32>
    %16 = arith.truncf %15 : vector<8x128xf32> to vector<8x128xbf16>
    %c0_12 = arith.constant 0 : index
    %c0_13 = arith.constant 0 : index
    %17 = vector.load %arg10[%c0_12, %c0_13] : memref<128x128xbf16, #tpu.memory_space<vmem>>, vector<128x128xbf16>
    %cst_14 = arith.constant dense<0.000000e+00> : vector<8x128xf32>
    %18 = tpu.matmul %16, %17, %cst_14 {dimension_numbers = #tpu.dot_dimension_numbers<[1], [0], [0], [1], [0, 0, 1, 1], [], []>} : vector<8x128xbf16>, vector<128x128xbf16>, vector<8x128xf32> -> vector<8x128xf32>
    %c0_15 = arith.constant 0 : index
    %c0_16 = arith.constant 0 : index
    %19 = vector.load %arg11[%c0_15, %c0_16] : memref<1x128xf32, #tpu.memory_space<vmem>>, vector<1x128xf32>
    %20 = vector.broadcast %19 : vector<1x128xf32> to vector<8x128xf32>
    %21 = arith.addf %18, %20 : vector<8x128xf32>
    %22 = arith.truncf %21 : vector<8x128xf32> to vector<8x128xbf16>
    %c0_17 = arith.constant 0 : index
    %c0_18 = arith.constant 0 : index
    %23 = vector.load %arg36[%c0_17, %c0_18] : memref<640x128xbf16, #tpu.memory_space<vmem>>, vector<128x128xbf16>
    %cst_19 = arith.constant dense<0.000000e+00> : vector<8x128xf32>
    %24 = tpu.matmul %22, %23, %cst_19 {dimension_numbers = #tpu.dot_dimension_numbers<[1], [0], [0], [1], [0, 0, 1, 1], [], []>} : vector<8x128xbf16>, vector<128x128xbf16>, vector<8x128xf32> -> vector<8x128xf32>
    %c0_20 = arith.constant 0 : index
    %c0_21 = arith.constant 0 : index
    %25 = vector.load %arg2[%c0_20, %c0_21] : memref<8x128xbf16, #tpu.memory_space<vmem>>, vector<8x128xbf16>
    %c0_22 = arith.constant 0 : index
    %c0_23 = arith.constant 0 : index
    %26 = vector.load %arg12[%c0_22, %c0_23] : memref<128x512xbf16, #tpu.memory_space<vmem>>, vector<128x512xbf16>
    %cst_24 = arith.constant dense<0.000000e+00> : vector<8x512xf32>
    %27 = tpu.matmul %25, %26, %cst_24 {dimension_numbers = #tpu.dot_dimension_numbers<[1], [0], [0], [1], [0, 0, 1, 1], [], []>} : vector<8x128xbf16>, vector<128x512xbf16>, vector<8x512xf32> -> vector<8x512xf32>
    %c0_25 = arith.constant 0 : index
    %c0_26 = arith.constant 0 : index
    %28 = vector.load %arg13[%c0_25, %c0_26] : memref<1x512xf32, #tpu.memory_space<vmem>>, vector<1x512xf32>
    %29 = vector.broadcast %28 : vector<1x512xf32> to vector<8x512xf32>
    %30 = arith.addf %27, %29 : vector<8x512xf32>
    %cst_27 = arith.constant 0.000000e+00 : f32
    %31 = vector.broadcast %cst_27 : f32 to vector<8x512xf32>
    %32 = arith.maximumf %30, %31 : vector<8x512xf32>
    %33 = arith.truncf %32 : vector<8x512xf32> to vector<8x512xbf16>
    %c0_28 = arith.constant 0 : index
    %c0_29 = arith.constant 0 : index
    %34 = vector.load %arg14[%c0_28, %c0_29] : memref<512x256xbf16, #tpu.memory_space<vmem>>, vector<512x256xbf16>
    %cst_30 = arith.constant dense<0.000000e+00> : vector<8x256xf32>
    %35 = tpu.matmul %33, %34, %cst_30 {dimension_numbers = #tpu.dot_dimension_numbers<[1], [0], [0], [1], [0, 0, 1, 1], [], []>} : vector<8x512xbf16>, vector<512x256xbf16>, vector<8x256xf32> -> vector<8x256xf32>
    %c0_31 = arith.constant 0 : index
    %c0_32 = arith.constant 0 : index
    %36 = vector.load %arg15[%c0_31, %c0_32] : memref<1x256xf32, #tpu.memory_space<vmem>>, vector<1x256xf32>
    %37 = vector.broadcast %36 : vector<1x256xf32> to vector<8x256xf32>
    %38 = arith.addf %35, %37 : vector<8x256xf32>
    %cst_33 = arith.constant 0.000000e+00 : f32
    %39 = vector.broadcast %cst_33 : f32 to vector<8x256xf32>
    %40 = arith.maximumf %38, %39 : vector<8x256xf32>
    %41 = arith.truncf %40 : vector<8x256xf32> to vector<8x256xbf16>
    %c0_34 = arith.constant 0 : index
    %c0_35 = arith.constant 0 : index
    %42 = vector.load %arg16[%c0_34, %c0_35] : memref<256x128xbf16, #tpu.memory_space<vmem>>, vector<256x128xbf16>
    %cst_36 = arith.constant dense<0.000000e+00> : vector<8x128xf32>
    %43 = tpu.matmul %41, %42, %cst_36 {dimension_numbers = #tpu.dot_dimension_numbers<[1], [0], [0], [1], [0, 0, 1, 1], [], []>} : vector<8x256xbf16>, vector<256x128xbf16>, vector<8x128xf32> -> vector<8x128xf32>
    %c0_37 = arith.constant 0 : index
    %c0_38 = arith.constant 0 : index
    %44 = vector.load %arg17[%c0_37, %c0_38] : memref<1x128xf32, #tpu.memory_space<vmem>>, vector<1x128xf32>
    %45 = vector.broadcast %44 : vector<1x128xf32> to vector<8x128xf32>
    %46 = arith.addf %43, %45 : vector<8x128xf32>
    %47 = arith.truncf %46 : vector<8x128xf32> to vector<8x128xbf16>
    %c128 = arith.constant 128 : index
    %c0_39 = arith.constant 0 : index
    %48 = vector.load %arg36[%c128, %c0_39] : memref<640x128xbf16, #tpu.memory_space<vmem>>, vector<128x128xbf16>
    %cst_40 = arith.constant dense<0.000000e+00> : vector<8x128xf32>
    %49 = tpu.matmul %47, %48, %cst_40 {dimension_numbers = #tpu.dot_dimension_numbers<[1], [0], [0], [1], [0, 0, 1, 1], [], []>} : vector<8x128xbf16>, vector<128x128xbf16>, vector<8x128xf32> -> vector<8x128xf32>
    %50 = arith.addf %24, %49 : vector<8x128xf32>
    %c0_41 = arith.constant 0 : index
    %c0_42 = arith.constant 0 : index
    %51 = vector.load %arg3[%c0_41, %c0_42] : memref<8x128xbf16, #tpu.memory_space<vmem>>, vector<8x128xbf16>
    %c0_43 = arith.constant 0 : index
    %c0_44 = arith.constant 0 : index
    %52 = vector.load %arg18[%c0_43, %c0_44] : memref<128x512xbf16, #tpu.memory_space<vmem>>, vector<128x512xbf16>
    %cst_45 = arith.constant dense<0.000000e+00> : vector<8x512xf32>
    %53 = tpu.matmul %51, %52, %cst_45 {dimension_numbers = #tpu.dot_dimension_numbers<[1], [0], [0], [1], [0, 0, 1, 1], [], []>} : vector<8x128xbf16>, vector<128x512xbf16>, vector<8x512xf32> -> vector<8x512xf32>
    %c0_46 = arith.constant 0 : index
    %c0_47 = arith.constant 0 : index
    %54 = vector.load %arg19[%c0_46, %c0_47] : memref<1x512xf32, #tpu.memory_space<vmem>>, vector<1x512xf32>
    %55 = vector.broadcast %54 : vector<1x512xf32> to vector<8x512xf32>
    %56 = arith.addf %53, %55 : vector<8x512xf32>
    %cst_48 = arith.constant 0.000000e+00 : f32
    %57 = vector.broadcast %cst_48 : f32 to vector<8x512xf32>
    %58 = arith.maximumf %56, %57 : vector<8x512xf32>
    %59 = arith.truncf %58 : vector<8x512xf32> to vector<8x512xbf16>
    %c0_49 = arith.constant 0 : index
    %c0_50 = arith.constant 0 : index
    %60 = vector.load %arg20[%c0_49, %c0_50] : memref<512x256xbf16, #tpu.memory_space<vmem>>, vector<512x256xbf16>
    %cst_51 = arith.constant dense<0.000000e+00> : vector<8x256xf32>
    %61 = tpu.matmul %59, %60, %cst_51 {dimension_numbers = #tpu.dot_dimension_numbers<[1], [0], [0], [1], [0, 0, 1, 1], [], []>} : vector<8x512xbf16>, vector<512x256xbf16>, vector<8x256xf32> -> vector<8x256xf32>
    %c0_52 = arith.constant 0 : index
    %c0_53 = arith.constant 0 : index
    %62 = vector.load %arg21[%c0_52, %c0_53] : memref<1x256xf32, #tpu.memory_space<vmem>>, vector<1x256xf32>
    %63 = vector.broadcast %62 : vector<1x256xf32> to vector<8x256xf32>
    %64 = arith.addf %61, %63 : vector<8x256xf32>
    %cst_54 = arith.constant 0.000000e+00 : f32
    %65 = vector.broadcast %cst_54 : f32 to vector<8x256xf32>
    %66 = arith.maximumf %64, %65 : vector<8x256xf32>
    %67 = arith.truncf %66 : vector<8x256xf32> to vector<8x256xbf16>
    %c0_55 = arith.constant 0 : index
    %c0_56 = arith.constant 0 : index
    %68 = vector.load %arg22[%c0_55, %c0_56] : memref<256x128xbf16, #tpu.memory_space<vmem>>, vector<256x128xbf16>
    %cst_57 = arith.constant dense<0.000000e+00> : vector<8x128xf32>
    %69 = tpu.matmul %67, %68, %cst_57 {dimension_numbers = #tpu.dot_dimension_numbers<[1], [0], [0], [1], [0, 0, 1, 1], [], []>} : vector<8x256xbf16>, vector<256x128xbf16>, vector<8x128xf32> -> vector<8x128xf32>
    %c0_58 = arith.constant 0 : index
    %c0_59 = arith.constant 0 : index
    %70 = vector.load %arg23[%c0_58, %c0_59] : memref<1x128xf32, #tpu.memory_space<vmem>>, vector<1x128xf32>
    %71 = vector.broadcast %70 : vector<1x128xf32> to vector<8x128xf32>
    %72 = arith.addf %69, %71 : vector<8x128xf32>
    %73 = arith.truncf %72 : vector<8x128xf32> to vector<8x128xbf16>
    %c256 = arith.constant 256 : index
    %c0_60 = arith.constant 0 : index
    %74 = vector.load %arg36[%c256, %c0_60] : memref<640x128xbf16, #tpu.memory_space<vmem>>, vector<128x128xbf16>
    %cst_61 = arith.constant dense<0.000000e+00> : vector<8x128xf32>
    %75 = tpu.matmul %73, %74, %cst_61 {dimension_numbers = #tpu.dot_dimension_numbers<[1], [0], [0], [1], [0, 0, 1, 1], [], []>} : vector<8x128xbf16>, vector<128x128xbf16>, vector<8x128xf32> -> vector<8x128xf32>
    %76 = arith.addf %50, %75 : vector<8x128xf32>
    %c0_62 = arith.constant 0 : index
    %c0_63 = arith.constant 0 : index
    %77 = vector.load %arg4[%c0_62, %c0_63] : memref<8x128xbf16, #tpu.memory_space<vmem>>, vector<8x128xbf16>
    %c0_64 = arith.constant 0 : index
    %c0_65 = arith.constant 0 : index
    %78 = vector.load %arg24[%c0_64, %c0_65] : memref<128x512xbf16, #tpu.memory_space<vmem>>, vector<128x512xbf16>
    %cst_66 = arith.constant dense<0.000000e+00> : vector<8x512xf32>
    %79 = tpu.matmul %77, %78, %cst_66 {dimension_numbers = #tpu.dot_dimension_numbers<[1], [0], [0], [1], [0, 0, 1, 1], [], []>} : vector<8x128xbf16>, vector<128x512xbf16>, vector<8x512xf32> -> vector<8x512xf32>
    %c0_67 = arith.constant 0 : index
    %c0_68 = arith.constant 0 : index
    %80 = vector.load %arg25[%c0_67, %c0_68] : memref<1x512xf32, #tpu.memory_space<vmem>>, vector<1x512xf32>
    %81 = vector.broadcast %80 : vector<1x512xf32> to vector<8x512xf32>
    %82 = arith.addf %79, %81 : vector<8x512xf32>
    %cst_69 = arith.constant 0.000000e+00 : f32
    %83 = vector.broadcast %cst_69 : f32 to vector<8x512xf32>
    %84 = arith.maximumf %82, %83 : vector<8x512xf32>
    %85 = arith.truncf %84 : vector<8x512xf32> to vector<8x512xbf16>
    %c0_70 = arith.constant 0 : index
    %c0_71 = arith.constant 0 : index
    %86 = vector.load %arg26[%c0_70, %c0_71] : memref<512x256xbf16, #tpu.memory_space<vmem>>, vector<512x256xbf16>
    %cst_72 = arith.constant dense<0.000000e+00> : vector<8x256xf32>
    %87 = tpu.matmul %85, %86, %cst_72 {dimension_numbers = #tpu.dot_dimension_numbers<[1], [0], [0], [1], [0, 0, 1, 1], [], []>} : vector<8x512xbf16>, vector<512x256xbf16>, vector<8x256xf32> -> vector<8x256xf32>
    %c0_73 = arith.constant 0 : index
    %c0_74 = arith.constant 0 : index
    %88 = vector.load %arg27[%c0_73, %c0_74] : memref<1x256xf32, #tpu.memory_space<vmem>>, vector<1x256xf32>
    %89 = vector.broadcast %88 : vector<1x256xf32> to vector<8x256xf32>
    %90 = arith.addf %87, %89 : vector<8x256xf32>
    %cst_75 = arith.constant 0.000000e+00 : f32
    %91 = vector.broadcast %cst_75 : f32 to vector<8x256xf32>
    %92 = arith.maximumf %90, %91 : vector<8x256xf32>
    %93 = arith.truncf %92 : vector<8x256xf32> to vector<8x256xbf16>
    %c0_76 = arith.constant 0 : index
    %c0_77 = arith.constant 0 : index
    %94 = vector.load %arg28[%c0_76, %c0_77] : memref<256x128xbf16, #tpu.memory_space<vmem>>, vector<256x128xbf16>
    %cst_78 = arith.constant dense<0.000000e+00> : vector<8x128xf32>
    %95 = tpu.matmul %93, %94, %cst_78 {dimension_numbers = #tpu.dot_dimension_numbers<[1], [0], [0], [1], [0, 0, 1, 1], [], []>} : vector<8x256xbf16>, vector<256x128xbf16>, vector<8x128xf32> -> vector<8x128xf32>
    %c0_79 = arith.constant 0 : index
    %c0_80 = arith.constant 0 : index
    %96 = vector.load %arg29[%c0_79, %c0_80] : memref<1x128xf32, #tpu.memory_space<vmem>>, vector<1x128xf32>
    %97 = vector.broadcast %96 : vector<1x128xf32> to vector<8x128xf32>
    %98 = arith.addf %95, %97 : vector<8x128xf32>
    %99 = arith.truncf %98 : vector<8x128xf32> to vector<8x128xbf16>
    %c384 = arith.constant 384 : index
    %c0_81 = arith.constant 0 : index
    %100 = vector.load %arg36[%c384, %c0_81] : memref<640x128xbf16, #tpu.memory_space<vmem>>, vector<128x128xbf16>
    %cst_82 = arith.constant dense<0.000000e+00> : vector<8x128xf32>
    %101 = tpu.matmul %99, %100, %cst_82 {dimension_numbers = #tpu.dot_dimension_numbers<[1], [0], [0], [1], [0, 0, 1, 1], [], []>} : vector<8x128xbf16>, vector<128x128xbf16>, vector<8x128xf32> -> vector<8x128xf32>
    %102 = arith.addf %76, %101 : vector<8x128xf32>
    %c0_83 = arith.constant 0 : index
    %c0_84 = arith.constant 0 : index
    %103 = vector.load %arg5[%c0_83, %c0_84] : memref<8x128xbf16, #tpu.memory_space<vmem>>, vector<8x128xbf16>
    %c0_85 = arith.constant 0 : index
    %c0_86 = arith.constant 0 : index
    %104 = vector.load %arg30[%c0_85, %c0_86] : memref<128x1024xbf16, #tpu.memory_space<vmem>>, vector<128x1024xbf16>
    %cst_87 = arith.constant dense<0.000000e+00> : vector<8x1024xf32>
    %105 = tpu.matmul %103, %104, %cst_87 {dimension_numbers = #tpu.dot_dimension_numbers<[1], [0], [0], [1], [0, 0, 1, 1], [], []>} : vector<8x128xbf16>, vector<128x1024xbf16>, vector<8x1024xf32> -> vector<8x1024xf32>
    %c0_88 = arith.constant 0 : index
    %c0_89 = arith.constant 0 : index
    %106 = vector.load %arg31[%c0_88, %c0_89] : memref<1x1024xf32, #tpu.memory_space<vmem>>, vector<1x1024xf32>
    %107 = vector.broadcast %106 : vector<1x1024xf32> to vector<8x1024xf32>
    %108 = arith.addf %105, %107 : vector<8x1024xf32>
    %cst_90 = arith.constant 0.000000e+00 : f32
    %109 = vector.broadcast %cst_90 : f32 to vector<8x1024xf32>
    %110 = arith.maximumf %108, %109 : vector<8x1024xf32>
    %111 = arith.truncf %110 : vector<8x1024xf32> to vector<8x1024xbf16>
    %c0_91 = arith.constant 0 : index
    %c0_92 = arith.constant 0 : index
    %112 = vector.load %arg32[%c0_91, %c0_92] : memref<1024x128xbf16, #tpu.memory_space<vmem>>, vector<1024x128xbf16>
    %cst_93 = arith.constant dense<0.000000e+00> : vector<8x128xf32>
    %113 = tpu.matmul %111, %112, %cst_93 {dimension_numbers = #tpu.dot_dimension_numbers<[1], [0], [0], [1], [0, 0, 1, 1], [], []>} : vector<8x1024xbf16>, vector<1024x128xbf16>, vector<8x128xf32> -> vector<8x128xf32>
    %c0_94 = arith.constant 0 : index
    %c0_95 = arith.constant 0 : index
    %114 = vector.load %arg33[%c0_94, %c0_95] : memref<1x128xf32, #tpu.memory_space<vmem>>, vector<1x128xf32>
    %115 = vector.broadcast %114 : vector<1x128xf32> to vector<8x128xf32>
    %116 = arith.addf %113, %115 : vector<8x128xf32>
    %cst_96 = arith.constant 0.000000e+00 : f32
    %117 = vector.broadcast %cst_96 : f32 to vector<8x128xf32>
    %118 = arith.maximumf %116, %117 : vector<8x128xf32>
    %119 = arith.truncf %118 : vector<8x128xf32> to vector<8x128xbf16>
    %c0_97 = arith.constant 0 : index
    %c0_98 = arith.constant 0 : index
    %120 = vector.load %arg34[%c0_97, %c0_98] : memref<128x128xbf16, #tpu.memory_space<vmem>>, vector<128x128xbf16>
    %cst_99 = arith.constant dense<0.000000e+00> : vector<8x128xf32>
    %121 = tpu.matmul %119, %120, %cst_99 {dimension_numbers = #tpu.dot_dimension_numbers<[1], [0], [0], [1], [0, 0, 1, 1], [], []>} : vector<8x128xbf16>, vector<128x128xbf16>, vector<8x128xf32> -> vector<8x128xf32>
    %c0_100 = arith.constant 0 : index
    %c0_101 = arith.constant 0 : index
    %122 = vector.load %arg35[%c0_100, %c0_101] : memref<1x128xf32, #tpu.memory_space<vmem>>, vector<1x128xf32>
    %123 = vector.broadcast %122 : vector<1x128xf32> to vector<8x128xf32>
    %124 = arith.addf %121, %123 : vector<8x128xf32>
    %125 = arith.truncf %124 : vector<8x128xf32> to vector<8x128xbf16>
    %c512 = arith.constant 512 : index
    %c0_102 = arith.constant 0 : index
    %126 = vector.load %arg36[%c512, %c0_102] : memref<640x128xbf16, #tpu.memory_space<vmem>>, vector<128x128xbf16>
    %cst_103 = arith.constant dense<0.000000e+00> : vector<8x128xf32>
    %127 = tpu.matmul %125, %126, %cst_103 {dimension_numbers = #tpu.dot_dimension_numbers<[1], [0], [0], [1], [0, 0, 1, 1], [], []>} : vector<8x128xbf16>, vector<128x128xbf16>, vector<8x128xf32> -> vector<8x128xf32>
    %128 = arith.addf %102, %127 : vector<8x128xf32>
    %c0_104 = arith.constant 0 : index
    %c0_105 = arith.constant 0 : index
    %129 = vector.load %arg37[%c0_104, %c0_105] : memref<1x128xf32, #tpu.memory_space<vmem>>, vector<1x128xf32>
    %130 = vector.broadcast %129 : vector<1x128xf32> to vector<8x128xf32>
    %131 = arith.addf %128, %130 : vector<8x128xf32>
    %cst_106 = arith.constant 0.000000e+00 : f32
    %132 = vector.broadcast %cst_106 : f32 to vector<8x128xf32>
    %133 = arith.maximumf %131, %132 : vector<8x128xf32>
    %134 = arith.truncf %133 : vector<8x128xf32> to vector<8x128xbf16>
    %c0_107 = arith.constant 0 : index
    %c0_108 = arith.constant 0 : index
    %135 = vector.load %arg38[%c0_107, %c0_108] : memref<128x128xbf16, #tpu.memory_space<vmem>>, vector<128x128xbf16>
    %cst_109 = arith.constant dense<0.000000e+00> : vector<8x128xf32>
    %136 = tpu.matmul %134, %135, %cst_109 {dimension_numbers = #tpu.dot_dimension_numbers<[1], [0], [0], [1], [0, 0, 1, 1], [], []>} : vector<8x128xbf16>, vector<128x128xbf16>, vector<8x128xf32> -> vector<8x128xf32>
    %c0_110 = arith.constant 0 : index
    %c0_111 = arith.constant 0 : index
    %137 = vector.load %arg39[%c0_110, %c0_111] : memref<1x128xf32, #tpu.memory_space<vmem>>, vector<1x128xf32>
    %138 = vector.broadcast %137 : vector<1x128xf32> to vector<8x128xf32>
    %139 = arith.addf %136, %138 : vector<8x128xf32>
    %cst_112 = arith.constant 0.000000e+00 : f32
    %140 = vector.broadcast %cst_112 : f32 to vector<8x128xf32>
    %141 = arith.maximumf %139, %140 : vector<8x128xf32>
    %142 = arith.truncf %141 : vector<8x128xf32> to vector<8x128xbf16>
    %c0_113 = arith.constant 0 : index
    %c0_114 = arith.constant 0 : index
    %143 = vector.load %arg40[%c0_113, %c0_114] : memref<128x128xbf16, #tpu.memory_space<vmem>>, vector<128x128xbf16>
    %cst_115 = arith.constant dense<0.000000e+00> : vector<8x128xf32>
    %144 = tpu.matmul %142, %143, %cst_115 {dimension_numbers = #tpu.dot_dimension_numbers<[1], [0], [0], [1], [0, 0, 1, 1], [], []>} : vector<8x128xbf16>, vector<128x128xbf16>, vector<8x128xf32> -> vector<8x128xf32>
    %c0_116 = arith.constant 0 : index
    %c0_117 = arith.constant 0 : index
    %145 = vector.load %arg41[%c0_116, %c0_117] : memref<1x128xf32, #tpu.memory_space<vmem>>, vector<1x128xf32>
    %146 = vector.broadcast %145 : vector<1x128xf32> to vector<8x128xf32>
    %147 = arith.addf %144, %146 : vector<8x128xf32>
    %c0_118 = arith.constant 0 : index
    %c0_119 = arith.constant 0 : index
    %148 = vector.load %arg42[%c0_118, %c0_119] : memref<8x128xf32, #tpu.memory_space<vmem>>, vector<8x128xf32>
    tpu.vector_store %arg42[%c0_118, %c0_119], %147 {strides = array<i32>} : memref<8x128xf32, #tpu.memory_space<vmem>>, vector<8x128xf32>,
    return
  }
  func.func @transform_0(%arg0: i32) -> (i32, i32) {
    %c0_i32 = arith.constant 0 : i32
    %c0_i32_0 = arith.constant 0 : i32
    return %arg0, %c0_i32 : i32, i32
  }
  func.func @transform_1(%arg0: i32) -> (i32, i32) {
    %c0_i32 = arith.constant 0 : i32
    %c0_i32_0 = arith.constant 0 : i32
    return %arg0, %c0_i32 : i32, i32
  }
  func.func @transform_2(%arg0: i32) -> (i32, i32) {
    %c0_i32 = arith.constant 0 : i32
    %c0_i32_0 = arith.constant 0 : i32
    return %arg0, %c0_i32 : i32, i32
  }
  func.func @transform_3(%arg0: i32) -> (i32, i32) {
    %c0_i32 = arith.constant 0 : i32
    %c0_i32_0 = arith.constant 0 : i32
    return %arg0, %c0_i32 : i32, i32
  }
  func.func @transform_4(%arg0: i32) -> (i32, i32) {
    %c0_i32 = arith.constant 0 : i32
    %c0_i32_0 = arith.constant 0 : i32
    return %arg0, %c0_i32 : i32, i32
  }
  func.func @transform_5(%arg0: i32) -> (i32, i32) {
    %c0_i32 = arith.constant 0 : i32
    %c0_i32_0 = arith.constant 0 : i32
    %c0_i32_1 = arith.constant 0 : i32
    return %c0_i32, %c0_i32_0 : i32, i32
  }
  func.func @transform_6(%arg0: i32) -> (i32, i32) {
    %c0_i32 = arith.constant 0 : i32
    %c0_i32_0 = arith.constant 0 : i32
    %c0_i32_1 = arith.constant 0 : i32
    return %c0_i32, %c0_i32_0 : i32, i32
  }
  func.func @transform_7(%arg0: i32) -> (i32, i32) {
    %c0_i32 = arith.constant 0 : i32
    %c0_i32_0 = arith.constant 0 : i32
    %c0_i32_1 = arith.constant 0 : i32
    return %c0_i32, %c0_i32_0 : i32, i32
  }
  func.func @transform_8(%arg0: i32) -> (i32, i32) {
    %c0_i32 = arith.constant 0 : i32
    %c0_i32_0 = arith.constant 0 : i32
    %c0_i32_1 = arith.constant 0 : i32
    return %c0_i32, %c0_i32_0 : i32, i32
  }
  func.func @transform_9(%arg0: i32) -> (i32, i32) {
    %c0_i32 = arith.constant 0 : i32
    %c0_i32_0 = arith.constant 0 : i32
    %c0_i32_1 = arith.constant 0 : i32
    return %c0_i32, %c0_i32_0 : i32, i32
  }
  func.func @transform_10(%arg0: i32) -> (i32, i32) {
    %c0_i32 = arith.constant 0 : i32
    %c0_i32_0 = arith.constant 0 : i32
    %c0_i32_1 = arith.constant 0 : i32
    return %c0_i32, %c0_i32_0 : i32, i32
  }
  func.func @transform_11(%arg0: i32) -> (i32, i32) {
    %c0_i32 = arith.constant 0 : i32
    %c0_i32_0 = arith.constant 0 : i32
    %c0_i32_1 = arith.constant 0 : i32
    return %c0_i32, %c0_i32_0 : i32, i32
  }
  func.func @transform_12(%arg0: i32) -> (i32, i32) {
    %c0_i32 = arith.constant 0 : i32
    %c0_i32_0 = arith.constant 0 : i32
    %c0_i32_1 = arith.constant 0 : i32
    return %c0_i32, %c0_i32_0 : i32, i32
  }
  func.func @transform_13(%arg0: i32) -> (i32, i32) {
    %c0_i32 = arith.constant 0 : i32
    %c0_i32_0 = arith.constant 0 : i32
    %c0_i32_1 = arith.constant 0 : i32
    return %c0_i32, %c0_i32_0 : i32, i32
  }
  func.func @transform_14(%arg0: i32) -> (i32, i32) {
    %c0_i32 = arith.constant 0 : i32
    %c0_i32_0 = arith.constant 0 : i32
    %c0_i32_1 = arith.constant 0 : i32
    return %c0_i32, %c0_i32_0 : i32, i32
  }
  func.func @transform_15(%arg0: i32) -> (i32, i32) {
    %c0_i32 = arith.constant 0 : i32
    %c0_i32_0 = arith.constant 0 : i32
    %c0_i32_1 = arith.constant 0 : i32
    return %c0_i32, %c0_i32_0 : i32, i32
  }
  func.func @transform_16(%arg0: i32) -> (i32, i32) {
    %c0_i32 = arith.constant 0 : i32
    %c0_i32_0 = arith.constant 0 : i32
    %c0_i32_1 = arith.constant 0 : i32
    return %c0_i32, %c0_i32_0 : i32, i32
  }
  func.func @transform_17(%arg0: i32) -> (i32, i32) {
    %c0_i32 = arith.constant 0 : i32
    %c0_i32_0 = arith.constant 0 : i32
    %c0_i32_1 = arith.constant 0 : i32
    return %c0_i32, %c0_i32_0 : i32, i32
  }
  func.func @transform_18(%arg0: i32) -> (i32, i32) {
    %c0_i32 = arith.constant 0 : i32
    %c0_i32_0 = arith.constant 0 : i32
    %c0_i32_1 = arith.constant 0 : i32
    return %c0_i32, %c0_i32_0 : i32, i32
  }
  func.func @transform_19(%arg0: i32) -> (i32, i32) {
    %c0_i32 = arith.constant 0 : i32
    %c0_i32_0 = arith.constant 0 : i32
    %c0_i32_1 = arith.constant 0 : i32
    return %c0_i32, %c0_i32_0 : i32, i32
  }
  func.func @transform_20(%arg0: i32) -> (i32, i32) {
    %c0_i32 = arith.constant 0 : i32
    %c0_i32_0 = arith.constant 0 : i32
    %c0_i32_1 = arith.constant 0 : i32
    return %c0_i32, %c0_i32_0 : i32, i32
  }
  func.func @transform_21(%arg0: i32) -> (i32, i32) {
    %c0_i32 = arith.constant 0 : i32
    %c0_i32_0 = arith.constant 0 : i32
    %c0_i32_1 = arith.constant 0 : i32
    return %c0_i32, %c0_i32_0 : i32, i32
  }
  func.func @transform_22(%arg0: i32) -> (i32, i32) {
    %c0_i32 = arith.constant 0 : i32
    %c0_i32_0 = arith.constant 0 : i32
    %c0_i32_1 = arith.constant 0 : i32
    return %c0_i32, %c0_i32_0 : i32, i32
  }
  func.func @transform_23(%arg0: i32) -> (i32, i32) {
    %c0_i32 = arith.constant 0 : i32
    %c0_i32_0 = arith.constant 0 : i32
    %c0_i32_1 = arith.constant 0 : i32
    return %c0_i32, %c0_i32_0 : i32, i32
  }
  func.func @transform_24(%arg0: i32) -> (i32, i32) {
    %c0_i32 = arith.constant 0 : i32
    %c0_i32_0 = arith.constant 0 : i32
    %c0_i32_1 = arith.constant 0 : i32
    return %c0_i32, %c0_i32_0 : i32, i32
  }
  func.func @transform_25(%arg0: i32) -> (i32, i32) {
    %c0_i32 = arith.constant 0 : i32
    %c0_i32_0 = arith.constant 0 : i32
    %c0_i32_1 = arith.constant 0 : i32
    return %c0_i32, %c0_i32_0 : i32, i32
  }
  func.func @transform_26(%arg0: i32) -> (i32, i32) {
    %c0_i32 = arith.constant 0 : i32
    %c0_i32_0 = arith.constant 0 : i32
    %c0_i32_1 = arith.constant 0 : i32
    return %c0_i32, %c0_i32_0 : i32, i32
  }
  func.func @transform_27(%arg0: i32) -> (i32, i32) {
    %c0_i32 = arith.constant 0 : i32
    %c0_i32_0 = arith.constant 0 : i32
    %c0_i32_1 = arith.constant 0 : i32
    return %c0_i32, %c0_i32_0 : i32, i32
  }
  func.func @transform_28(%arg0: i32) -> (i32, i32) {
    %c0_i32 = arith.constant 0 : i32
    %c0_i32_0 = arith.constant 0 : i32
    %c0_i32_1 = arith.constant 0 : i32
    return %c0_i32, %c0_i32_0 : i32, i32
  }
  func.func @transform_29(%arg0: i32) -> (i32, i32) {
    %c0_i32 = arith.constant 0 : i32
    %c0_i32_0 = arith.constant 0 : i32
    %c0_i32_1 = arith.constant 0 : i32
    return %c0_i32, %c0_i32_0 : i32, i32
  }
  func.func @transform_30(%arg0: i32) -> (i32, i32) {
    %c0_i32 = arith.constant 0 : i32
    %c0_i32_0 = arith.constant 0 : i32
    %c0_i32_1 = arith.constant 0 : i32
    return %c0_i32, %c0_i32_0 : i32, i32
  }
  func.func @transform_31(%arg0: i32) -> (i32, i32) {
    %c0_i32 = arith.constant 0 : i32
    %c0_i32_0 = arith.constant 0 : i32
    %c0_i32_1 = arith.constant 0 : i32
    return %c0_i32, %c0_i32_0 : i32, i32
  }
  func.func @transform_32(%arg0: i32) -> (i32, i32) {
    %c0_i32 = arith.constant 0 : i32
    %c0_i32_0 = arith.constant 0 : i32
    %c0_i32_1 = arith.constant 0 : i32
    return %c0_i32, %c0_i32_0 : i32, i32
  }
  func.func @transform_33(%arg0: i32) -> (i32, i32) {
    %c0_i32 = arith.constant 0 : i32
    %c0_i32_0 = arith.constant 0 : i32
    %c0_i32_1 = arith.constant 0 : i32
    return %c0_i32, %c0_i32_0 : i32, i32
  }
  func.func @transform_34(%arg0: i32) -> (i32, i32) {
    %c0_i32 = arith.constant 0 : i32
    %c0_i32_0 = arith.constant 0 : i32
    %c0_i32_1 = arith.constant 0 : i32
    return %c0_i32, %c0_i32_0 : i32, i32
  }
  func.func @transform_35(%arg0: i32) -> (i32, i32) {
    %c0_i32 = arith.constant 0 : i32
    %c0_i32_0 = arith.constant 0 : i32
    %c0_i32_1 = arith.constant 0 : i32
    return %c0_i32, %c0_i32_0 : i32, i32
  }
  func.func @transform_36(%arg0: i32) -> (i32, i32) {
    %c0_i32 = arith.constant 0 : i32
    %c0_i32_0 = arith.constant 0 : i32
    %c0_i32_1 = arith.constant 0 : i32
    return %c0_i32, %c0_i32_0 : i32, i32
  }
  func.func @transform_37(%arg0: i32) -> (i32, i32) {
    %c0_i32 = arith.constant 0 : i32
    %c0_i32_0 = arith.constant 0 : i32
    %c0_i32_1 = arith.constant 0 : i32
    return %c0_i32, %c0_i32_0 : i32, i32
  }
  func.func @transform_38(%arg0: i32) -> (i32, i32) {
    %c0_i32 = arith.constant 0 : i32
    %c0_i32_0 = arith.constant 0 : i32
    %c0_i32_1 = arith.constant 0 : i32
    return %c0_i32, %c0_i32_0 : i32, i32
  }
  func.func @transform_39(%arg0: i32) -> (i32, i32) {
    %c0_i32 = arith.constant 0 : i32
    %c0_i32_0 = arith.constant 0 : i32
    %c0_i32_1 = arith.constant 0 : i32
    return %c0_i32, %c0_i32_0 : i32, i32
  }
  func.func @transform_40(%arg0: i32) -> (i32, i32) {
    %c0_i32 = arith.constant 0 : i32
    %c0_i32_0 = arith.constant 0 : i32
    %c0_i32_1 = arith.constant 0 : i32
    return %c0_i32, %c0_i32_0 : i32, i32
  }
  func.func @transform_41(%arg0: i32) -> (i32, i32) {
    %c0_i32 = arith.constant 0 : i32
    %c0_i32_0 = arith.constant 0 : i32
    return %arg0, %c0_i32 : i32, i32
  }
}

</mosaic_0001>

<bundles_post_ra>
// kernel: deepdep_forward.1
= control target key start
LH: loop header
LB: loop body
LE: loop exit
PB: predicated region body
PF: predicated region fallthrough
CT: control target
= control target key end

     0   :  { %s9850_s6 = smov 1   ;;  %s9851_s10 = smov 2   ;;  %s10634_s0 = inlined_call_operand.smem [shape: u32[42], index: -1, kind: input, shape index: {}] }
   0x1   :  { %s9944_s5 = sld [smem:[%s10634_s0]]   ;;  %s9852_s14 = smov 3  }
   0x2   :  { %s9949_s9 = sld [smem:[%s10634_s0 + %s9850_s6]]   ;;  %s9853_s18 = smov 4  }
   0x3   :  { %s9954_s13 = sld [smem:[%s10634_s0 + %s9851_s10]]   ;;  %s9854_s22 = smov 5  }
   0x4   :  { %s9959_s17 = sld [smem:[%s10634_s0 + %s9852_s14]]   ;;  %s9855_s26 = smov 6  }
   0x5   :  { %s9964_s21 = sld [smem:[%s10634_s0 + %s9853_s18]]   ;;  %s9856_s30 = smov 7  }
   0x6   :  { %s9969_s25 = sld [smem:[%s10634_s0 + %s9854_s22]]   ;;  %s9857_s4 = smov 8  }
   0x7   :  { %10654 = sst [smem:[#allocation72_spill]] %s9944_s5  ;;  %s9858_s10 = smov 9  }
   0x8   :  { %10655 = sst [smem:[#allocation73_spill]] %s9949_s9  ;;  %s9859_s15 = smov 10  }
   0x9   :  { %10656 = sst [smem:[#allocation74_spill]] %s9954_s13  ;;  %s9860_s20 = smov 11  }
   0xa   :  { %10657 = sst [smem:[#allocation75_spill]] %s9959_s17  ;;  %s9862_s1 = smov 13  }
   0xb   :  { %10658 = sst [smem:[#allocation76_spill]] %s9964_s21  ;;  %s9863_s7 = smov 14  }
   0xc   :  { %10659 = sst [smem:[#allocation77_spill]] %s9969_s25  ;;  %s9865_s22 = smov 16  }
   0xd   :  { %s9974_s29 = sld [smem:[%s10634_s0 + %s9855_s26]]   ;;  %s9861_s26 = smov 12  }
   0xe   :  { %s9979_s3 = sld [smem:[%s10634_s0 + %s9856_s30]]   ;;  %s9866_s28 = smov 17  }
   0xf   :  { %s9984_s8 = sld [smem:[%s10634_s0 + %s9857_s4]]  }
  0x10   :  { %s9989_s14 = sld [smem:[%s10634_s0 + %s9858_s10]]  }
  0x11   :  { %s9994_s19 = sld [smem:[%s10634_s0 + %s9859_s15]]   ;;  %s9864_s15 = smov 15  }
  0x12   :  { %s9999_s24 = sld [smem:[%s10634_s0 + %s9860_s20]]  }
  0x13   :  { %s10004_s30 = sld [smem:[%s10634_s0 + %s9861_s26]]  }
  0x14   :  { %10660 = sst [smem:[#allocation78_spill]] %s9979_s3 }
  0x15   :  { %s10009_s6 = sld [smem:[%s10634_s0 + %s9862_s1]]  }
  0x16   :  { %10661 = sst [smem:[#allocation79_spill]] %s9989_s14 }
  0x17   :  { %10662 = sst [smem:[#allocation80_spill]] %s9994_s19 }
  0x18   :  { %s10014_s12 = sld [smem:[%s10634_s0 + %s9863_s7]]   ;;  %s9867_s7 = smov 18  }
  0x19   :  { %10663 = sst [smem:[#allocation81_spill]] %s10004_s30 }
  0x1a   :  { %s10019_s20 = sld [smem:[%s10634_s0 + %s9864_s15]]   ;;  %s9868_s15 = smov 19  }
  0x1b   :  { %s10024_s27 = sld [smem:[%s10634_s0 + %s9865_s22]]   ;;  %s9869_s22 = smov 20  }
  0x1c   :  { %s10029_s4 = sld [smem:[%s10634_s0 + %s9866_s28]]   ;;  %s9870_s28 = smov 21  }
  0x1d   :  { %s10034_s21 = sld [smem:[%s10634_s0 + %s9867_s7]]   ;;  %s9871_s7 = smov 22  }
  0x1e   :  { %10664 = sst [smem:[#allocation82_spill]] %s10014_s12 }
  0x1f   :  { %s10039_s17 = sld [smem:[%s10634_s0 + %s9868_s15]]   ;;  %s9872_s15 = smov 23  }
  0x20   :  { %s10044_s13 = sld [smem:[%s10634_s0 + %s9869_s22]]   ;;  %s9873_s22 = smov 24  }
  0x21   :  { %10665 = sst [smem:[#allocation83_spill]] %s10024_s27 }
  0x22   :  { %s10049_s9 = sld [smem:[%s10634_s0 + %s9870_s28]]   ;;  %s9874_s28 = smov 25  }
  0x23   :  { %10666 = sst [smem:[#allocation84_spill]] %s10034_s21 }
  0x24   :  { %s10054_s14 = sld [smem:[%s10634_s0 + %s9871_s7]]   ;;  %s9875_s7 = smov 26  }
  0x25   :  { %s10059_s5 = sld [smem:[%s10634_s0 + %s9872_s15]]   ;;  %s9876_s15 = smov 27  }
  0x26   :  { %10667 = sst [smem:[#allocation85_spill]] %s10044_s13 }
  0x27   :  { %s10064_s13 = sld [smem:[%s10634_s0 + %s9873_s22]]   ;;  %s9877_s22 = smov 28  }
  0x28   :  { %s10069_s21 = sld [smem:[%s10634_s0 + %s9874_s28]]   ;;  %s9878_s28 = smov 29  }
  0x29   :  { %s10079_s27 = sld [smem:[%s10634_s0 + %s9876_s15]]   ;;  %s9880_s15 = smov 31  }
  0x2a   :  { %10668 = sst [smem:[#allocation86_spill]] %s10054_s14 }
  0x2b   :  { %s10074_s14 = sld [smem:[%s10634_s0 + %s9875_s7]]   ;;  %s9879_s7 = smov 30  }
  0x2c   :  { %s10089_s12 = sld [smem:[%s10634_s0 + %s9878_s28]]   ;;  %s9882_s28 = smov 33  }
  0x2d   :  { %10669 = sst [smem:[#allocation87_spill]] %s10064_s13 }
  0x2e   :  { %s10084_s13 = sld [smem:[%s10634_s0 + %s9877_s22]]   ;;  %s9881_s22 = smov 32  }
  0x2f   :  { %10671 = sst [smem:[#allocation89_spill]] %s10079_s27 }
  0x30   :  { %s10099_s27 = sld [smem:[%s10634_s0 + %s9880_s15]]   ;;  %s9884_s15 = smov 35  }
  0x31   :  { %10670 = sst [smem:[#allocation88_spill]] %s10074_s14 }
  0x32   :  { %10672 = sst [smem:[#allocation90_spill]] %s10089_s12 }
  0x33   :  { %s10094_s14 = sld [smem:[%s10634_s0 + %s9879_s7]]   ;;  %s9883_s7 = smov 34  }
  0x34   :  { %s10104_s30 = sld [smem:[%s10634_s0 + %s9881_s22]]   ;;  %s9885_s22 = smov 36  }
  0x35   :  { %s10109_s12 = sld [smem:[%s10634_s0 + %s9882_s28]]   ;;  %s9886_s28 = smov 37  }
  0x36   :  { %10673 = sst [smem:[#allocation91_spill]] %s10099_s27 }
  0x37   :  { %s10114_s19 = sld [smem:[%s10634_s0 + %s9883_s7]]   ;;  %s9887_s7 = smov 38  }
  0x38   :  { %s10119_s27 = sld [smem:[%s10634_s0 + %s9884_s15]]   ;;  %s9888_s15 = smov 39  }
  0x39   :  { %s10124_s3 = sld [smem:[%s10634_s0 + %s9885_s22]]   ;;  %s9889_s22 = smov 40  }
  0x3a   :  { %s10134_s25 = sld [smem:[%s10634_s0 + %s9887_s7]]  }
  0x3b   :  { %10674 = sst [smem:[#allocation92_spill]] %s10109_s12 }
  0x3c   :  { %s10129_s12 = sld [smem:[%s10634_s0 + %s9886_s28]]   ;;  %s9890_s28 = smov 41  }
  0x3e   :  { %10675 = sst [smem:[#allocation93_spill]] %s10119_s27 }
  0x3f   :  { %10676 = sst [smem:[#allocation94_spill]] %s10124_s3 }
  0x40   :  { %s10139_s27 = sld [smem:[%s10634_s0 + %s9888_s15]]  }
  0x41   :  { %s10144_s3 = sld [smem:[%s10634_s0 + %s9889_s22]]  }
  0x42   :  { %10677 = sst [smem:[#allocation95_spill]] %s10129_s12 }
  0x43   :  { %s10149_s12 = sld [smem:[%s10634_s0 + %s9890_s28]]  }
  0x44   :  { %88 = vsyncpa [#allocation3], 0 }
  0x45   :  { %89 = vsyncpa [#allocation5], 0 }
  0x46   :  { %90 = vsyncpa [#allocation8], 0 }
  0x47   :  { %91 = vsyncpa [#allocation11], 0 }
  0x48   :  { %92 = vsyncpa [#allocation14], 0 }
  0x49   :  { %93 = vsyncpa [#allocation17], 0 }
  0x4a   :  { %94 = vsyncpa [#allocation20], 0 }
  0x4b   :  { %95 = vsyncpa [#allocation23], 0 }
  0x4c   :  { %96 = vsyncpa [#allocation26], 0 }
  0x4d   :  { %97 = vsyncpa [#allocation29], 0 }
  0x4e   :  { %98 = vsyncpa [#allocation32], 0 }
  0x4f   :  { %99 = vsyncpa [#allocation35], 0 }
  0x50   :  { %100 = vsyncpa [#allocation38], 0 }
  0x51   :  { %101 = vsyncpa [#allocation41], 0 }
  0x52   :  { %102 = vsyncpa [#allocation44], 0 }
  0x53   :  { %103 = vsyncpa [#allocation47], 0 }
  0x54   :  { %104 = vsyncpa [#allocation50], 0 }
  0x55   :  { %105 = vsyncpa [#allocation53], 0  ;;  %s9891_s0 = smov [#allocation4]   ;;  %s9892_s10 = smov [#allocation7]  }
  0x56   :  { %s134_s7 = sshll.u32 %s9891_s0, 4  ;;  %s156_s11 = sshll.u32 %s9892_s10, 4  ;;  %s135_s7 = int_to_ptr.vmem [resolvable:$true] %s134_s7  ;;  %s157_s11 = int_to_ptr.vmem [resolvable:$true] %s156_s11 }
  0x57   :  { %s9066_s15 = scalar_lea.hbm %s9974_s29, 128 }
  0x58   :  { %p9067_p0 = scmp.ne.s32.totalorder %s9974_s29, %s9066_s15  ;;  %p9070_p1 = scmp.lt.u32.totalorder %s9066_s15, %s9974_s29 }
  0x5a   :  { %p9072_p2 = pnand %p9070_p1, %p9067_p0 }
  0x5c   :  { %9075 = shalt.err (!%p9072_p2)
}
  0x5d   :  { %s9076_s16 = scalar_lea.vmem %s135_s7, 128  ;;  %p9081_p4 = scmp.lt.s32.totalorder %s135_s7, %s135_s7 }
  0x5e   :  { %p9077_p3 = scmp.ne.s32.totalorder %s135_s7, %s9076_s16  ;;  %p9082_p5 = scmp.lt.s32.totalorder %s9076_s16, %s9076_s16 }
  0x60   :  { %p9083_p6 = por %p9082_p5, %p9081_p4 }
  0x62   :  { %p9084_p7 = pnand %p9083_p6, %p9077_p3 }
  0x64   :  { %9087 = shalt.err (!%p9084_p7)
}
  0x65   :  { %137 = dma.hbm_to_vmem [thread:$0]  %s9974_s29, 128, %s135_s7, [#allocation5]  }
  0x66   :  { %s9088_s18 = scalar_lea.hbm %s9984_s8, 16 }
  0x67   :  { %p9089_p8 = scmp.ne.s32.totalorder %s9984_s8, %s9088_s18  ;;  %p9092_p9 = scmp.lt.u32.totalorder %s9088_s18, %s9984_s8 }
  0x69   :  { %p9094_p10 = pnand %p9092_p9, %p9089_p8 }
  0x6b   :  { %9097 = shalt.err (!%p9094_p10)
}
  0x6c   :  { %s9098_s22 = scalar_lea.vmem %s157_s11, 16  ;;  %s9102_s23 = scalar_lea.vmem %s157_s11, 32 }
  0x6d   :  { %p9099_p11 = scmp.ne.s32.totalorder %s157_s11, %s9098_s22  ;;  %p9103_p12 = scmp.lt.s32.totalorder %s157_s11, %s157_s11 }
  0x6e   :  { %p9104_p13 = scmp.lt.s32.totalorder %s9102_s23, %s9098_s22 }
  0x70   :  { %p9105_p0 = por %p9104_p13, %p9103_p12 }
  0x72   :  { %p9106_p1 = pnand %p9105_p0, %p9099_p11 }
  0x74   :  { %9109 = shalt.err (!%p9106_p1)
}
  0x75   :  { %159 = dma.hbm_to_vmem [thread:$0]  %s9984_s8, 16, %s157_s11, [#allocation8]  }
  0x76   :  { %s9893_s26 = smov [#allocation10]   ;;  %s9110_s28 = scalar_lea.hbm %s9999_s24, 4096 }
  0x77   :  { %s177_s29 = sshll.u32 %s9893_s26, 4  ;;  %p9111_p2 = scmp.ne.s32.totalorder %s9999_s24, %s9110_s28  ;;  %s178_s29 = int_to_ptr.vmem [resolvable:$true] %s177_s29 }
  0x78   :  { %p9114_p3 = scmp.lt.u32.totalorder %s9110_s28, %s9999_s24 }
  0x7a   :  { %p9116_p4 = pnand %p9114_p3, %p9111_p2 }
  0x7c   :  { %9119 = shalt.err (!%p9116_p4)
}
  0x7d   :  { %s9120_s1 = scalar_lea.vmem %s178_s29, 4096  ;;  %p9125_p6 = scmp.lt.s32.totalorder %s178_s29, %s178_s29 }
  0x7e   :  { %p9121_p5 = scmp.ne.s32.totalorder %s178_s29, %s9120_s1  ;;  %p9126_p7 = scmp.lt.s32.totalorder %s9120_s1, %s9120_s1 }
  0x80   :  { %p9127_p8 = por %p9126_p7, %p9125_p6 }
  0x82   :  { %p9128_p9 = pnand %p9127_p8, %p9121_p5 }
  0x84   :  { %9131 = shalt.err (!%p9128_p9)
}
  0x85   :  { %s9894_s2 = smov 256   ;;  %s9895_s8 = smov 16  }
  0x86   :  { %183 = dma.hbm_to_vmem [thread:$0]  %s9999_s24, 4096, %s178_s29, [#allocation11], %s9894_s2, %s9894_s2, %s9895_s8  }
  0x87   :  { %s9896_s0 = smov [#allocation13]   ;;  %s9132_s10 = scalar_lea.hbm %s10009_s6, 8192 }
  0x88   :  { %s199_s7 = sshll.u32 %s9896_s0, 4  ;;  %p9133_p10 = scmp.ne.s32.totalorder %s10009_s6, %s9132_s10  ;;  %s200_s7 = int_to_ptr.vmem [resolvable:$true] %s199_s7 }
  0x89   :  { %p9136_p11 = scmp.lt.u32.totalorder %s9132_s10, %s10009_s6 }
  0x8b   :  { %p9138_p12 = pnand %p9136_p11, %p9133_p10 }
  0x8d   :  { %9141 = shalt.err (!%p9138_p12)
}
  0x8e   :  { %s9142_s11 = scalar_lea.vmem %s200_s7, 8192  ;;  %p9147_p0 = scmp.lt.s32.totalorder %s200_s7, %s200_s7 }
  0x8f   :  { %p9143_p13 = scmp.ne.s32.totalorder %s200_s7, %s9142_s11  ;;  %p9148_p1 = scmp.lt.s32.totalorder %s9142_s11, %s9142_s11 }
  0x91   :  { %p9149_p2 = por %p9148_p1, %p9147_p0 }
  0x93   :  { %p9150_p3 = pnand %p9149_p2, %p9143_p13 }
  0x95   :  { %9153 = shalt.err (!%p9150_p3)
}
  0x96   :  { %s9897_s15 = smov 128   ;;  %s9898_s24 = smov 8  }
  0x97   :  { %205 = dma.hbm_to_vmem [thread:$0]  %s10009_s6, 8192, %s200_s7, [#allocation14], %s9897_s15, %s9897_s15, %s9898_s24  }
  0x98   :  { %s9899_s16 = smov [#allocation16]   ;;  %s9900_s22 = smov [#allocation19]  }
  0x99   :  { %s221_s18 = sshll.u32 %s9899_s16, 4  ;;  %s243_s23 = sshll.u32 %s9900_s22, 4  ;;  %s222_s18 = int_to_ptr.vmem [resolvable:$true] %s221_s18  ;;  %s10173_s23 = int_to_ptr.vmem [resolvable:$true] %s243_s23 }
  0x9a   :  { %s9154_s26 = scalar_lea.hbm %s10019_s20, 2048 }
  0x9b   :  { %p9155_p4 = scmp.ne.s32.totalorder %s10019_s20, %s9154_s26  ;;  %p9158_p5 = scmp.lt.u32.totalorder %s9154_s26, %s10019_s20 }
  0x9d   :  { %p9160_p6 = pnand %p9158_p5, %p9155_p4 }
  0x9f   :  { %9163 = shalt.err (!%p9160_p6)
}
  0xa0   :  { %s9164_s29 = scalar_lea.vmem %s222_s18, 2048  ;;  %p9169_p8 = scmp.lt.s32.totalorder %s222_s18, %s222_s18 }
  0xa1   :  { %p9165_p7 = scmp.ne.s32.totalorder %s222_s18, %s9164_s29  ;;  %p9170_p9 = scmp.lt.s32.totalorder %s9164_s29, %s9164_s29 }
  0xa3   :  { %p9171_p10 = por %p9170_p9, %p9169_p8 }
  0xa5   :  { %p9172_p11 = pnand %p9171_p10, %p9165_p7 }
  0xa7   :  { %9175 = shalt.err (!%p9172_p11)
}
  0xa8   :  { %s9901_s6 = smov 64   ;;  %s9902_s28 = smov 4  }
  0xa9   :  { %227 = dma.hbm_to_vmem [thread:$0]  %s10019_s20, 2048, %s222_s18, [#allocation17], %s9901_s6, %s9901_s6, %s9902_s28  }
  0xaa   :  { %s9176_s1 = scalar_lea.hbm %s10029_s4, 4096 }
  0xab   :  { %p9177_p12 = scmp.ne.s32.totalorder %s10029_s4, %s9176_s1  ;;  %p9180_p13 = scmp.lt.u32.totalorder %s9176_s1, %s10029_s4 }
  0xad   :  { %p9182_p0 = pnand %p9180_p13, %p9177_p12 }
  0xaf   :  { %9185 = shalt.err (!%p9182_p0)
}
  0xb0   :  { %s9186_s0 = scalar_lea.vmem %s10173_s23, 4096  ;;  %p9191_p2 = scmp.lt.s32.totalorder %s10173_s23, %s10173_s23 }
  0xb1   :  { %p9187_p1 = scmp.ne.s32.totalorder %s10173_s23, %s9186_s0  ;;  %p9192_p3 = scmp.lt.s32.totalorder %s9186_s0, %s9186_s0 }
  0xb3   :  { %p9193_p4 = por %p9192_p3, %p9191_p2 }
  0xb5   :  { %p9194_p5 = pnand %p9193_p4, %p9187_p1 }
  0xb7   :  { %9197 = shalt.err (!%p9194_p5)
}
  0xb8   :  { %249 = dma.hbm_to_vmem [thread:$0]  %s10029_s4, 4096, %s10173_s23, [#allocation20], %s9894_s2, %s9894_s2, %s9895_s8  }
  0xb9   :  { %s9903_s20 = smov [#allocation22]   ;;  %s9904_s10 = smov [#allocation25]  }
  0xba   :  { %s265_s7 = sshll.u32 %s9903_s20, 4  ;;  %s287_s11 = sshll.u32 %s9904_s10, 4  ;;  %s266_s7 = int_to_ptr.vmem [resolvable:$true] %s265_s7  ;;  %s10194_s11 = int_to_ptr.vmem [resolvable:$true] %s287_s11 }
  0xbb   :  { %s9198_s16 = scalar_lea.hbm %s10039_s17, 8192 }
  0xbc   :  { %p9199_p6 = scmp.ne.s32.totalorder %s10039_s17, %s9198_s16  ;;  %p9202_p7 = scmp.lt.u32.totalorder %s9198_s16, %s10039_s17 }
  0xbe   :  { %p9204_p8 = pnand %p9202_p7, %p9199_p6 }
  0xc0   :  { %9207 = shalt.err (!%p9204_p8)
}
  0xc1   :  { %s9208_s18 = scalar_lea.vmem %s266_s7, 8192  ;;  %p9213_p10 = scmp.lt.s32.totalorder %s266_s7, %s266_s7 }
  0xc2   :  { %p9209_p9 = scmp.ne.s32.totalorder %s266_s7, %s9208_s18  ;;  %p9214_p11 = scmp.lt.s32.totalorder %s9208_s18, %s9208_s18 }
  0xc4   :  { %p9215_p12 = por %p9214_p11, %p9213_p10 }
  0xc6   :  { %p9216_p13 = pnand %p9215_p12, %p9209_p9 }
  0xc8   :  { %9219 = shalt.err (!%p9216_p13)
}
  0xc9   :  { %271 = dma.hbm_to_vmem [thread:$0]  %s10039_s17, 8192, %s266_s7, [#allocation23], %s9897_s15, %s9897_s15, %s9898_s24  }
  0xca   :  { %s9220_s4 = scalar_lea.hbm %s10049_s9, 2048 }
  0xcb   :  { %p9221_p0 = scmp.ne.s32.totalorder %s10049_s9, %s9220_s4  ;;  %p9224_p1 = scmp.lt.u32.totalorder %s9220_s4, %s10049_s9 }
  0xcd   :  { %p9226_p2 = pnand %p9224_p1, %p9221_p0 }
  0xcf   :  { %9229 = shalt.err (!%p9226_p2)
}
  0xd0   :  { %s9230_s22 = scalar_lea.vmem %s10194_s11, 2048  ;;  %p9235_p4 = scmp.lt.s32.totalorder %s10194_s11, %s10194_s11 }
  0xd1   :  { %p9231_p3 = scmp.ne.s32.totalorder %s10194_s11, %s9230_s22  ;;  %p9236_p5 = scmp.lt.s32.totalorder %s9230_s22, %s9230_s22 }
  0xd3   :  { %p9237_p6 = por %p9236_p5, %p9235_p4 }
  0xd5   :  { %p9238_p7 = pnand %p9237_p6, %p9231_p3 }
  0xd7   :  { %9241 = shalt.err (!%p9238_p7)
}
  0xd8   :  { %293 = dma.hbm_to_vmem [thread:$0]  %s10049_s9, 2048, %s10194_s11, [#allocation26], %s9901_s6, %s9901_s6, %s9902_s28  }
  0xd9   :  { %s9905_s17 = smov [#allocation28]   ;;  %s9906_s26 = smov [#allocation31]  }
  0xda   :  { %s309_s23 = sshll.u32 %s9905_s17, 4  ;;  %s331_s29 = sshll.u32 %s9906_s26, 4  ;;  %s310_s23 = int_to_ptr.vmem [resolvable:$true] %s309_s23  ;;  %s10215_s29 = int_to_ptr.vmem [resolvable:$true] %s331_s29 }
  0xdb   :  { %s9242_s1 = scalar_lea.hbm %s10059_s5, 4096 }
  0xdc   :  { %p9243_p8 = scmp.ne.s32.totalorder %s10059_s5, %s9242_s1  ;;  %p9246_p9 = scmp.lt.u32.totalorder %s9242_s1, %s10059_s5 }
  0xde   :  { %p9248_p10 = pnand %p9246_p9, %p9243_p8 }
  0xe0   :  { %9251 = shalt.err (!%p9248_p10)
}
  0xe1   :  { %s9252_s0 = scalar_lea.vmem %s310_s23, 4096  ;;  %p9257_p12 = scmp.lt.s32.totalorder %s310_s23, %s310_s23 }
  0xe2   :  { %p9253_p11 = scmp.ne.s32.totalorder %s310_s23, %s9252_s0  ;;  %p9258_p13 = scmp.lt.s32.totalorder %s9252_s0, %s9252_s0 }
  0xe4   :  { %p9259_p0 = por %p9258_p13, %p9257_p12 }
  0xe6   :  { %p9260_p1 = pnand %p9259_p0, %p9253_p11 }
  0xe8   :  { %9263 = shalt.err (!%p9260_p1)
}
  0xe9   :  { %315 = dma.hbm_to_vmem [thread:$0]  %s10059_s5, 4096, %s310_s23, [#allocation29], %s9894_s2, %s9894_s2, %s9895_s8  }
  0xea   :  { %s9264_s9 = scalar_lea.hbm %s10069_s21, 8192 }
  0xeb   :  { %p9265_p2 = scmp.ne.s32.totalorder %s10069_s21, %s9264_s9  ;;  %p9268_p3 = scmp.lt.u32.totalorder %s9264_s9, %s10069_s21 }
  0xed   :  { %p9270_p4 = pnand %p9268_p3, %p9265_p2 }
  0xef   :  { %9273 = shalt.err (!%p9270_p4)
}
  0xf0   :  { %s9274_s20 = scalar_lea.vmem %s10215_s29, 8192  ;;  %p9279_p6 = scmp.lt.s32.totalorder %s10215_s29, %s10215_s29 }
  0xf1   :  { %p9275_p5 = scmp.ne.s32.totalorder %s10215_s29, %s9274_s20  ;;  %p9280_p7 = scmp.lt.s32.totalorder %s9274_s20, %s9274_s20 }
  0xf3   :  { %p9281_p8 = por %p9280_p7, %p9279_p6 }
  0xf5   :  { %p9282_p9 = pnand %p9281_p8, %p9275_p5 }
  0xf7   :  { %9285 = shalt.err (!%p9282_p9)
}
  0xf8   :  { %337 = dma.hbm_to_vmem [thread:$0]  %s10069_s21, 8192, %s10215_s29, [#allocation32], %s9897_s15, %s9897_s15, %s9898_s24  }
  0xf9   :  { %s9907_s5 = smov [#allocation34]   ;;  %s9908_s8 = smov [#allocation37]  }
  0xfa   :  { %s356_s2 = sshll.u32 %s9907_s5, 4  ;;  %s378_s7 = sshll.u32 %s9908_s8, 4  ;;  %s357_s2 = int_to_ptr.vmem [resolvable:$true] %s356_s2  ;;  %s379_s7 = int_to_ptr.vmem [resolvable:$true] %s378_s7 }
  0xfb   :  { %s9286_s10 = scalar_lea.hbm %s10084_s13, 16 }
  0xfc   :  { %p9287_p10 = scmp.ne.s32.totalorder %s10084_s13, %s9286_s10  ;;  %p9290_p11 = scmp.lt.u32.totalorder %s9286_s10, %s10084_s13 }
  0xfe   :  { %p9292_p12 = pnand %p9290_p11, %p9287_p10 }
 0x100   :  { %9295 = shalt.err (!%p9292_p12)
}
 0x101   :  { %s9296_s11 = scalar_lea.vmem %s357_s2, 16  ;;  %s9300_s16 = scalar_lea.vmem %s357_s2, 32 }
 0x102   :  { %p9297_p13 = scmp.ne.s32.totalorder %s357_s2, %s9296_s11  ;;  %p9301_p0 = scmp.lt.s32.totalorder %s357_s2, %s357_s2 }
 0x103   :  { %p9302_p1 = scmp.lt.s32.totalorder %s9300_s16, %s9296_s11 }
 0x105   :  { %p9303_p2 = por %p9302_p1, %p9301_p0 }
 0x107   :  { %p9304_p3 = pnand %p9303_p2, %p9297_p13 }
 0x109   :  { %9307 = shalt.err (!%p9304_p3)
}
 0x10a   :  { %359 = dma.hbm_to_vmem [thread:$0]  %s10084_s13, 16, %s357_s2, [#allocation35]  }
 0x10b   :  { %s9308_s21 = scalar_lea.hbm %s10094_s14, 128 }
 0x10c   :  { %p9309_p4 = scmp.ne.s32.totalorder %s10094_s14, %s9308_s21  ;;  %p9312_p5 = scmp.lt.u32.totalorder %s9308_s21, %s10094_s14 }
 0x10e   :  { %p9314_p6 = pnand %p9312_p5, %p9309_p4 }
 0x110   :  { %9317 = shalt.err (!%p9314_p6)
}
 0x111   :  { %s9318_s15 = scalar_lea.vmem %s379_s7, 128  ;;  %p9323_p8 = scmp.lt.s32.totalorder %s379_s7, %s379_s7 }
 0x112   :  { %p9319_p7 = scmp.ne.s32.totalorder %s379_s7, %s9318_s15  ;;  %p9324_p9 = scmp.lt.s32.totalorder %s9318_s15, %s9318_s15 }
 0x114   :  { %p9325_p10 = por %p9324_p9, %p9323_p8 }
 0x116   :  { %p9326_p11 = pnand %p9325_p10, %p9319_p7 }
 0x118   :  { %9329 = shalt.err (!%p9326_p11)
}
 0x119   :  { %381 = dma.hbm_to_vmem [thread:$0]  %s10094_s14, 128, %s379_s7, [#allocation38]  }
 0x11a   :  { %s9909_s24 = smov [#allocation40]   ;;  %s9910_s13 = smov [#allocation43]  }
 0x11b   :  { %s400_s18 = sshll.u32 %s9909_s24, 4  ;;  %s422_s4 = sshll.u32 %s9910_s13, 4  ;;  %s401_s18 = int_to_ptr.vmem [resolvable:$true] %s400_s18  ;;  %s423_s4 = int_to_ptr.vmem [resolvable:$true] %s422_s4 }
 0x11c   :  { %s9330_s22 = scalar_lea.hbm %s10104_s30, 16 }
 0x11d   :  { %p9331_p12 = scmp.ne.s32.totalorder %s10104_s30, %s9330_s22  ;;  %p9334_p13 = scmp.lt.u32.totalorder %s9330_s22, %s10104_s30 }
 0x11f   :  { %p9336_p0 = pnand %p9334_p13, %p9331_p12 }
 0x121   :  { %9339 = shalt.err (!%p9336_p0)
}
 0x122   :  { %s9340_s17 = scalar_lea.vmem %s401_s18, 16  ;;  %s9344_s23 = scalar_lea.vmem %s401_s18, 32 }
 0x123   :  { %p9341_p1 = scmp.ne.s32.totalorder %s401_s18, %s9340_s17  ;;  %p9345_p2 = scmp.lt.s32.totalorder %s401_s18, %s401_s18 }
 0x124   :  { %p9346_p3 = scmp.lt.s32.totalorder %s9344_s23, %s9340_s17 }
 0x126   :  { %p9347_p4 = por %p9346_p3, %p9345_p2 }
 0x128   :  { %p9348_p5 = pnand %p9347_p4, %p9341_p1 }
 0x12a   :  { %9351 = shalt.err (!%p9348_p5)
}
 0x12b   :  { %403 = dma.hbm_to_vmem [thread:$0]  %s10104_s30, 16, %s401_s18, [#allocation41]  }
 0x12c   :  { %s9352_s14 = scalar_lea.hbm %s10114_s19, 16 }
 0x12d   :  { %p9353_p6 = scmp.ne.s32.totalorder %s10114_s19, %s9352_s14  ;;  %p9356_p7 = scmp.lt.u32.totalorder %s9352_s14, %s10114_s19 }
 0x12f   :  { %p9358_p8 = pnand %p9356_p7, %p9353_p6 }
 0x131   :  { %9361 = shalt.err (!%p9358_p8)
}
 0x132   :  { %s9362_s26 = scalar_lea.vmem %s423_s4, 16  ;;  %s9366_s29 = scalar_lea.vmem %s423_s4, 32 }
 0x133   :  { %p9363_p9 = scmp.ne.s32.totalorder %s423_s4, %s9362_s26  ;;  %p9367_p10 = scmp.lt.s32.totalorder %s423_s4, %s423_s4 }
 0x134   :  { %p9368_p11 = scmp.lt.s32.totalorder %s9366_s29, %s9362_s26 }
 0x136   :  { %p9369_p12 = por %p9368_p11, %p9367_p10 }
 0x138   :  { %p9370_p13 = pnand %p9369_p12, %p9363_p9 }
 0x13a   :  { %9373 = shalt.err (!%p9370_p13)
}
 0x13b   :  { %s10678_s1 = sld [smem:[#allocation94_spill]]  ;;  %s9911_s0 = smov [#allocation46]  }
 0x13c   :  { %425 = dma.hbm_to_vmem [thread:$0]  %s10114_s19, 16, %s423_s4, [#allocation44]  }
 0x13d   :  { %s444_s30 = sshll.u32 %s9911_s0, 4  ;;  %s9912_s9 = smov [#allocation49]   ;;  %s445_s30 = int_to_ptr.vmem [resolvable:$true] %s444_s30 }
 0x13e   :  { %s466_s20 = sshll.u32 %s9912_s9, 4  ;;  %s467_s20 = int_to_ptr.vmem [resolvable:$true] %s466_s20 }
 0x141   :  { %s9374_s5 = scalar_lea.hbm %s10678_s1, 16 }
 0x142   :  { %p9375_p0 = scmp.ne.s32.totalorder %s10678_s1, %s9374_s5  ;;  %p9378_p1 = scmp.lt.u32.totalorder %s9374_s5, %s10678_s1 }
 0x144   :  { %p9380_p2 = pnand %p9378_p1, %p9375_p0 }
 0x146   :  { %9383 = shalt.err (!%p9380_p2)
}
 0x147   :  { %s9384_s2 = scalar_lea.vmem %s445_s30, 16  ;;  %s9388_s8 = scalar_lea.vmem %s445_s30, 32 }
 0x148   :  { %p9385_p3 = scmp.ne.s32.totalorder %s445_s30, %s9384_s2  ;;  %p9389_p4 = scmp.lt.s32.totalorder %s445_s30, %s445_s30 }
 0x149   :  { %p9390_p5 = scmp.lt.s32.totalorder %s9388_s8, %s9384_s2 }
 0x14b   :  { %p9391_p6 = por %p9390_p5, %p9389_p4 }
 0x14d   :  { %p9392_p7 = pnand %p9391_p6, %p9385_p3 }
 0x14f   :  { %9395 = shalt.err (!%p9392_p7)
}
 0x150   :  { %447 = dma.hbm_to_vmem [thread:$0]  %s10678_s1, 16, %s445_s30, [#allocation47]  }
 0x151   :  { %s9396_s19 = scalar_lea.hbm %s10134_s25, 16 }
 0x152   :  { %p9397_p8 = scmp.ne.s32.totalorder %s10134_s25, %s9396_s19  ;;  %p9400_p9 = scmp.lt.u32.totalorder %s9396_s19, %s10134_s25 }
 0x154   :  { %p9402_p10 = pnand %p9400_p9, %p9397_p8 }
 0x156   :  { %9405 = shalt.err (!%p9402_p10)
}
 0x157   :  { %s9406_s7 = scalar_lea.vmem %s467_s20, 16  ;;  %s9410_s10 = scalar_lea.vmem %s467_s20, 32 }
 0x158   :  { %p9407_p11 = scmp.ne.s32.totalorder %s467_s20, %s9406_s7  ;;  %p9411_p12 = scmp.lt.s32.totalorder %s467_s20, %s467_s20 }
 0x159   :  { %p9412_p13 = scmp.lt.s32.totalorder %s9410_s10, %s9406_s7 }
 0x15b   :  { %p9413_p0 = por %p9412_p13, %p9411_p12 }
 0x15d   :  { %p9414_p1 = pnand %p9413_p0, %p9407_p11 }
 0x15f   :  { %9417 = shalt.err (!%p9414_p1)
}
 0x160   :  { %s10679_s11 = sld [smem:[#allocation77_spill]]  ;;  %s9913_s16 = smov [#allocation2]  }
 0x161   :  { %469 = dma.hbm_to_vmem [thread:$0]  %s10134_s25, 16, %s467_s20, [#allocation50]  }
 0x162   :  { %s121_s21 = sshll.u32 %s9913_s16, 4  ;;  %s122_s21 = int_to_ptr.vmem [resolvable:$true] %s121_s21 }
 0x166   :  { %s9418_s15 = scalar_lea.hbm %s10679_s11, 8192 }
 0x167   :  { %p9419_p2 = scmp.ne.s32.totalorder %s10679_s11, %s9418_s15  ;;  %p9422_p3 = scmp.lt.u32.totalorder %s9418_s15, %s10679_s11 }
 0x169   :  { %p9424_p4 = pnand %p9422_p3, %p9419_p2 }
 0x16b   :  { %9427 = shalt.err (!%p9424_p4)
}
 0x16c   :  { %s9428_s24 = scalar_lea.vmem %s122_s21, 8192  ;;  %p9433_p6 = scmp.lt.s32.totalorder %s122_s21, %s122_s21 }
 0x16d   :  { %p9429_p5 = scmp.ne.s32.totalorder %s122_s21, %s9428_s24  ;;  %p9434_p7 = scmp.lt.s32.totalorder %s9428_s24, %s9428_s24 }
 0x16f   :  { %p9435_p8 = por %p9434_p7, %p9433_p6 }
 0x171   :  { %p9436_p9 = pnand %p9435_p8, %p9429_p5 }
 0x173   :  { %9439 = shalt.err (!%p9436_p9)
}
 0x174   :  { %s9914_s18 = smov 512   ;;  %s10680_s13 = sld [smem:[#allocation78_spill]] }
 0x175   :  { %s9915_s25 = smov 32   ;;  %s9916_s4 = smov [#allocation6]  }
 0x176   :  { %127 = dma.hbm_to_vmem [thread:$0]  %s10679_s11, 8192, %s122_s21, [#allocation3], %s9914_s18, %s9914_s18, %s9915_s25  }
 0x177   :  { %s143_s22 = sshll.u32 %s9916_s4, 4  ;;  %s9917_s17 = smov [#allocation9]   ;;  %s144_s22 = int_to_ptr.vmem [resolvable:$true] %s143_s22 }
 0x178   :  { %s168_s23 = sshll.u32 %s9917_s17, 4  ;;  %s169_s23 = int_to_ptr.vmem [resolvable:$true] %s168_s23 }
 0x17a   :  { %s9440_s14 = scalar_lea.hbm %s10680_s13, 8192 }
 0x17b   :  { %p9441_p10 = scmp.ne.s32.totalorder %s10680_s13, %s9440_s14  ;;  %p9444_p11 = scmp.lt.u32.totalorder %s9440_s14, %s10680_s13 }
 0x17d   :  { %p9446_p12 = pnand %p9444_p11, %p9441_p10 }
 0x17f   :  { %9449 = shalt.err (!%p9446_p12)
}
 0x180   :  { %s9450_s26 = scalar_lea.vmem %s144_s22, 8192  ;;  %p9455_p0 = scmp.lt.s32.totalorder %s144_s22, %s144_s22 }
 0x181   :  { %p9451_p13 = scmp.ne.s32.totalorder %s144_s22, %s9450_s26  ;;  %p9456_p1 = scmp.lt.s32.totalorder %s9450_s26, %s9450_s26 }
 0x183   :  { %p9457_p2 = por %p9456_p1, %p9455_p0 }
 0x185   :  { %p9458_p3 = pnand %p9457_p2, %p9451_p13 }
 0x187   :  { %9461 = shalt.err (!%p9458_p3)
}
 0x188   :  { %s10681_s29 = sld [smem:[#allocation80_spill]] }
 0x189   :  { %149 = dma.hbm_to_vmem [thread:$0]  %s10680_s13, 8192, %s144_s22, [#allocation5], %s9901_s6, %s9901_s6, %s9902_s28  }
 0x18e   :  { %s9462_s1 = scalar_lea.hbm %s10681_s29, 16 }
 0x18f   :  { %p9463_p4 = scmp.ne.s32.totalorder %s10681_s29, %s9462_s1  ;;  %p9466_p5 = scmp.lt.u32.totalorder %s9462_s1, %s10681_s29 }
 0x191   :  { %p9468_p6 = pnand %p9466_p5, %p9463_p4 }
 0x193   :  { %9471 = shalt.err (!%p9468_p6)
}
 0x194   :  { %s9472_s0 = scalar_lea.vmem %s169_s23, 16  ;;  %s9476_s30 = scalar_lea.vmem %s169_s23, 32 }
 0x195   :  { %p9473_p7 = scmp.ne.s32.totalorder %s169_s23, %s9472_s0  ;;  %p9477_p8 = scmp.lt.s32.totalorder %s169_s23, %s169_s23 }
 0x196   :  { %p9478_p9 = scmp.lt.s32.totalorder %s9476_s30, %s9472_s0 }
 0x198   :  { %p9479_p10 = por %p9478_p9, %p9477_p8 }
 0x19a   :  { %p9480_p11 = pnand %p9479_p10, %p9473_p7 }
 0x19c   :  { %9483 = shalt.err (!%p9480_p11)
}
 0x19d   :  { %s10682_s9 = sld [smem:[#allocation81_spill]]  ;;  %s9918_s20 = smov [#allocation12]  }
 0x19e   :  { %171 = dma.hbm_to_vmem [thread:$0]  %s10681_s29, 16, %s169_s23, [#allocation8]  }
 0x19f   :  { %s190_s5 = sshll.u32 %s9918_s20, 4  ;;  %s9919_s2 = smov [#allocation15]   ;;  %s191_s5 = int_to_ptr.vmem [resolvable:$true] %s190_s5 }
 0x1a0   :  { %s212_s8 = sshll.u32 %s9919_s2, 4  ;;  %s213_s8 = int_to_ptr.vmem [resolvable:$true] %s212_s8 }
 0x1a3   :  { %s9484_s19 = scalar_lea.hbm %s10682_s9, 64 }
 0x1a4   :  { %p9485_p12 = scmp.ne.s32.totalorder %s10682_s9, %s9484_s19  ;;  %p9488_p13 = scmp.lt.u32.totalorder %s9484_s19, %s10682_s9 }
 0x1a6   :  { %p9490_p0 = pnand %p9488_p13, %p9485_p12 }
 0x1a8   :  { %9493 = shalt.err (!%p9490_p0)
}
 0x1a9   :  { %s9494_s7 = scalar_lea.vmem %s191_s5, 64  ;;  %p9499_p2 = scmp.lt.s32.totalorder %s191_s5, %s191_s5 }
 0x1aa   :  { %p9495_p1 = scmp.ne.s32.totalorder %s191_s5, %s9494_s7  ;;  %p9500_p3 = scmp.lt.s32.totalorder %s9494_s7, %s9494_s7 }
 0x1ac   :  { %p9501_p4 = por %p9500_p3, %p9499_p2 }
 0x1ae   :  { %p9502_p5 = pnand %p9501_p4, %p9495_p1 }
 0x1b0   :  { %9505 = shalt.err (!%p9502_p5)
}
 0x1b1   :  { %s10683_s10 = sld [smem:[#allocation82_spill]] }
 0x1b2   :  { %193 = dma.hbm_to_vmem [thread:$0]  %s10682_s9, 64, %s191_s5, [#allocation11]  }
 0x1b7   :  { %s9506_s11 = scalar_lea.hbm %s10683_s10, 32 }
 0x1b8   :  { %p9507_p6 = scmp.ne.s32.totalorder %s10683_s10, %s9506_s11  ;;  %p9510_p7 = scmp.lt.u32.totalorder %s9506_s11, %s10683_s10 }
 0x1ba   :  { %p9512_p8 = pnand %p9510_p7, %p9507_p6 }
 0x1bc   :  { %9515 = shalt.err (!%p9512_p8)
}
 0x1bd   :  { %s9516_s16 = scalar_lea.vmem %s213_s8, 32  ;;  %p9521_p10 = scmp.lt.s32.totalorder %s213_s8, %s213_s8 }
 0x1be   :  { %p9517_p9 = scmp.ne.s32.totalorder %s213_s8, %s9516_s16  ;;  %p9522_p11 = scmp.lt.s32.totalorder %s9516_s16, %s9516_s16 }
 0x1c0   :  { %p9523_p12 = por %p9522_p11, %p9521_p10 }
 0x1c2   :  { %p9524_p13 = pnand %p9523_p12, %p9517_p9 }
 0x1c4   :  { %9527 = shalt.err (!%p9524_p13)
}
 0x1c5   :  { %s10684_s21 = sld [smem:[#allocation83_spill]]  ;;  %s9920_s15 = smov [#allocation18]  }
 0x1c6   :  { %215 = dma.hbm_to_vmem [thread:$0]  %s10683_s10, 32, %s213_s8, [#allocation14]  }
 0x1c7   :  { %s234_s24 = sshll.u32 %s9920_s15, 4  ;;  %s9921_s13 = smov [#allocation21]   ;;  %s235_s24 = int_to_ptr.vmem [resolvable:$true] %s234_s24 }
 0x1c8   :  { %s256_s4 = sshll.u32 %s9921_s13, 4  ;;  %s257_s4 = int_to_ptr.vmem [resolvable:$true] %s256_s4 }
 0x1cb   :  { %s9528_s22 = scalar_lea.hbm %s10684_s21, 16 }
 0x1cc   :  { %p9529_p0 = scmp.ne.s32.totalorder %s10684_s21, %s9528_s22  ;;  %p9532_p1 = scmp.lt.u32.totalorder %s9528_s22, %s10684_s21 }
 0x1ce   :  { %p9534_p2 = pnand %p9532_p1, %p9529_p0 }
 0x1d0   :  { %9537 = shalt.err (!%p9534_p2)
}
 0x1d1   :  { %s9538_s17 = scalar_lea.vmem %s235_s24, 16  ;;  %s9542_s23 = scalar_lea.vmem %s235_s24, 32 }
 0x1d2   :  { %p9539_p3 = scmp.ne.s32.totalorder %s235_s24, %s9538_s17  ;;  %p9543_p4 = scmp.lt.s32.totalorder %s235_s24, %s235_s24 }
 0x1d3   :  { %p9544_p5 = scmp.lt.s32.totalorder %s9542_s23, %s9538_s17 }
 0x1d5   :  { %p9545_p6 = por %p9544_p5, %p9543_p4 }
 0x1d7   :  { %p9546_p7 = pnand %p9545_p6, %p9539_p3 }
 0x1d9   :  { %9549 = shalt.err (!%p9546_p7)
}
 0x1da   :  { %s10685_s14 = sld [smem:[#allocation84_spill]] }
 0x1db   :  { %237 = dma.hbm_to_vmem [thread:$0]  %s10684_s21, 16, %s235_s24, [#allocation17]  }
 0x1e0   :  { %s9550_s26 = scalar_lea.hbm %s10685_s14, 64 }
 0x1e1   :  { %p9551_p8 = scmp.ne.s32.totalorder %s10685_s14, %s9550_s26  ;;  %p9554_p9 = scmp.lt.u32.totalorder %s9550_s26, %s10685_s14 }
 0x1e3   :  { %p9556_p10 = pnand %p9554_p9, %p9551_p8 }
 0x1e5   :  { %9559 = shalt.err (!%p9556_p10)
}
 0x1e6   :  { %s9560_s29 = scalar_lea.vmem %s257_s4, 64  ;;  %p9565_p12 = scmp.lt.s32.totalorder %s257_s4, %s257_s4 }
 0x1e7   :  { %p9561_p11 = scmp.ne.s32.totalorder %s257_s4, %s9560_s29  ;;  %p9566_p13 = scmp.lt.s32.totalorder %s9560_s29, %s9560_s29 }
 0x1e9   :  { %p9567_p0 = por %p9566_p13, %p9565_p12 }
 0x1eb   :  { %p9568_p1 = pnand %p9567_p0, %p9561_p11 }
 0x1ed   :  { %9571 = shalt.err (!%p9568_p1)
}
 0x1ee   :  { %s10686_s1 = sld [smem:[#allocation85_spill]]  ;;  %s9922_s0 = smov [#allocation24]  }
 0x1ef   :  { %259 = dma.hbm_to_vmem [thread:$0]  %s10685_s14, 64, %s257_s4, [#allocation20]  }
 0x1f0   :  { %s278_s30 = sshll.u32 %s9922_s0, 4  ;;  %s9923_s9 = smov [#allocation27]   ;;  %s279_s30 = int_to_ptr.vmem [resolvable:$true] %s278_s30 }
 0x1f1   :  { %s300_s20 = sshll.u32 %s9923_s9, 4  ;;  %s301_s20 = int_to_ptr.vmem [resolvable:$true] %s300_s20 }
 0x1f4   :  { %s9572_s5 = scalar_lea.hbm %s10686_s1, 32 }
 0x1f5   :  { %p9573_p2 = scmp.ne.s32.totalorder %s10686_s1, %s9572_s5  ;;  %p9576_p3 = scmp.lt.u32.totalorder %s9572_s5, %s10686_s1 }
 0x1f7   :  { %p9578_p4 = pnand %p9576_p3, %p9573_p2 }
 0x1f9   :  { %9581 = shalt.err (!%p9578_p4)
}
 0x1fa   :  { %s9582_s2 = scalar_lea.vmem %s279_s30, 32  ;;  %p9587_p6 = scmp.lt.s32.totalorder %s279_s30, %s279_s30 }
 0x1fb   :  { %p9583_p5 = scmp.ne.s32.totalorder %s279_s30, %s9582_s2  ;;  %p9588_p7 = scmp.lt.s32.totalorder %s9582_s2, %s9582_s2 }
 0x1fd   :  { %p9589_p8 = por %p9588_p7, %p9587_p6 }
 0x1ff   :  { %p9590_p9 = pnand %p9589_p8, %p9583_p5 }
 0x201   :  { %9593 = shalt.err (!%p9590_p9)
}
 0x202   :  { %s10687_s8 = sld [smem:[#allocation86_spill]] }
 0x203   :  { %281 = dma.hbm_to_vmem [thread:$0]  %s10686_s1, 32, %s279_s30, [#allocation23]  }
 0x208   :  { %s9594_s19 = scalar_lea.hbm %s10687_s8, 16 }
 0x209   :  { %p9595_p10 = scmp.ne.s32.totalorder %s10687_s8, %s9594_s19  ;;  %p9598_p11 = scmp.lt.u32.totalorder %s9594_s19, %s10687_s8 }
 0x20b   :  { %p9600_p12 = pnand %p9598_p11, %p9595_p10 }
 0x20d   :  { %9603 = shalt.err (!%p9600_p12)
}
 0x20e   :  { %s9604_s7 = scalar_lea.vmem %s301_s20, 16  ;;  %s9608_s10 = scalar_lea.vmem %s301_s20, 32 }
 0x20f   :  { %p9605_p13 = scmp.ne.s32.totalorder %s301_s20, %s9604_s7  ;;  %p9609_p0 = scmp.lt.s32.totalorder %s301_s20, %s301_s20 }
 0x210   :  { %p9610_p1 = scmp.lt.s32.totalorder %s9608_s10, %s9604_s7 }
 0x212   :  { %p9611_p2 = por %p9610_p1, %p9609_p0 }
 0x214   :  { %p9612_p3 = pnand %p9611_p2, %p9605_p13 }
 0x216   :  { %9615 = shalt.err (!%p9612_p3)
}
 0x217   :  { %s10688_s11 = sld [smem:[#allocation87_spill]]  ;;  %s9924_s16 = smov [#allocation30]  }
 0x218   :  { %303 = dma.hbm_to_vmem [thread:$0]  %s10687_s8, 16, %s301_s20, [#allocation26]  }
 0x219   :  { %s322_s21 = sshll.u32 %s9924_s16, 4  ;;  %s9925_s15 = smov [#allocation33]   ;;  %s323_s21 = int_to_ptr.vmem [resolvable:$true] %s322_s21 }
 0x21a   :  { %s344_s24 = sshll.u32 %s9925_s15, 4  ;;  %s345_s24 = int_to_ptr.vmem [resolvable:$true] %s344_s24 }
 0x21d   :  { %s9616_s13 = scalar_lea.hbm %s10688_s11, 64 }
 0x21e   :  { %p9617_p4 = scmp.ne.s32.totalorder %s10688_s11, %s9616_s13  ;;  %p9620_p5 = scmp.lt.u32.totalorder %s9616_s13, %s10688_s11 }
 0x220   :  { %p9622_p6 = pnand %p9620_p5, %p9617_p4 }
 0x222   :  { %9625 = shalt.err (!%p9622_p6)
}
 0x223   :  { %s9626_s4 = scalar_lea.vmem %s323_s21, 64  ;;  %p9631_p8 = scmp.lt.s32.totalorder %s323_s21, %s323_s21 }
 0x224   :  { %p9627_p7 = scmp.ne.s32.totalorder %s323_s21, %s9626_s4  ;;  %p9632_p9 = scmp.lt.s32.totalorder %s9626_s4, %s9626_s4 }
 0x226   :  { %p9633_p10 = por %p9632_p9, %p9631_p8 }
 0x228   :  { %p9634_p11 = pnand %p9633_p10, %p9627_p7 }
 0x22a   :  { %9637 = shalt.err (!%p9634_p11)
}
 0x22b   :  { %s10689_s22 = sld [smem:[#allocation88_spill]] }
 0x22c   :  { %325 = dma.hbm_to_vmem [thread:$0]  %s10688_s11, 64, %s323_s21, [#allocation29]  }
 0x231   :  { %s9638_s17 = scalar_lea.hbm %s10689_s22, 32 }
 0x232   :  { %p9639_p12 = scmp.ne.s32.totalorder %s10689_s22, %s9638_s17  ;;  %p9642_p13 = scmp.lt.u32.totalorder %s9638_s17, %s10689_s22 }
 0x234   :  { %p9644_p0 = pnand %p9642_p13, %p9639_p12 }
 0x236   :  { %9647 = shalt.err (!%p9644_p0)
}
 0x237   :  { %s9648_s23 = scalar_lea.vmem %s345_s24, 32  ;;  %p9653_p2 = scmp.lt.s32.totalorder %s345_s24, %s345_s24 }
 0x238   :  { %p9649_p1 = scmp.ne.s32.totalorder %s345_s24, %s9648_s23  ;;  %p9654_p3 = scmp.lt.s32.totalorder %s9648_s23, %s9648_s23 }
 0x23a   :  { %p9655_p4 = por %p9654_p3, %p9653_p2 }
 0x23c   :  { %p9656_p5 = pnand %p9655_p4, %p9649_p1 }
 0x23e   :  { %9659 = shalt.err (!%p9656_p5)
}
 0x23f   :  { %s10690_s14 = sld [smem:[#allocation90_spill]]  ;;  %s9926_s26 = smov [#allocation36]  }
 0x240   :  { %347 = dma.hbm_to_vmem [thread:$0]  %s10689_s22, 32, %s345_s24, [#allocation32]  }
 0x241   :  { %s365_s29 = sshll.u32 %s9926_s26, 4  ;;  %s9927_s1 = smov [#allocation39]   ;;  %s366_s29 = int_to_ptr.vmem [resolvable:$true] %s365_s29 }
 0x242   :  { %s387_s0 = sshll.u32 %s9927_s1, 4  ;;  %s388_s0 = int_to_ptr.vmem [resolvable:$true] %s387_s0 }
 0x245   :  { %s9660_s30 = scalar_lea.hbm %s10690_s14, 8192 }
 0x246   :  { %p9661_p6 = scmp.ne.s32.totalorder %s10690_s14, %s9660_s30  ;;  %p9664_p7 = scmp.lt.u32.totalorder %s9660_s30, %s10690_s14 }
 0x248   :  { %p9666_p8 = pnand %p9664_p7, %p9661_p6 }
 0x24a   :  { %9669 = shalt.err (!%p9666_p8)
}
 0x24b   :  { %s9670_s9 = scalar_lea.vmem %s366_s29, 8192  ;;  %p9675_p10 = scmp.lt.s32.totalorder %s366_s29, %s366_s29 }
 0x24c   :  { %p9671_p9 = scmp.ne.s32.totalorder %s366_s29, %s9670_s9  ;;  %p9676_p11 = scmp.lt.s32.totalorder %s9670_s9, %s9670_s9 }
 0x24e   :  { %p9677_p12 = por %p9676_p11, %p9675_p10 }
 0x250   :  { %p9678_p13 = pnand %p9677_p12, %p9671_p9 }
 0x252   :  { %9681 = shalt.err (!%p9678_p13)
}
 0x253   :  { %s10691_s20 = sld [smem:[#allocation91_spill]] }
 0x254   :  { %371 = dma.hbm_to_vmem [thread:$0]  %s10690_s14, 8192, %s366_s29, [#allocation35], %s9914_s18, %s9914_s18, %s9915_s25  }
 0x259   :  { %s9682_s5 = scalar_lea.hbm %s10691_s20, 8192 }
 0x25a   :  { %p9683_p0 = scmp.ne.s32.totalorder %s10691_s20, %s9682_s5  ;;  %p9686_p1 = scmp.lt.u32.totalorder %s9682_s5, %s10691_s20 }
 0x25c   :  { %p9688_p2 = pnand %p9686_p1, %p9683_p0 }
 0x25e   :  { %9691 = shalt.err (!%p9688_p2)
}
 0x25f   :  { %s9692_s2 = scalar_lea.vmem %s388_s0, 8192  ;;  %p9697_p4 = scmp.lt.s32.totalorder %s388_s0, %s388_s0 }
 0x260   :  { %p9693_p3 = scmp.ne.s32.totalorder %s388_s0, %s9692_s2  ;;  %p9698_p5 = scmp.lt.s32.totalorder %s9692_s2, %s9692_s2 }
 0x262   :  { %p9699_p6 = por %p9698_p5, %p9697_p4 }
 0x264   :  { %p9700_p7 = pnand %p9699_p6, %p9693_p3 }
 0x266   :  { %9703 = shalt.err (!%p9700_p7)
}
 0x267   :  { %s10692_s8 = sld [smem:[#allocation92_spill]]  ;;  %s9928_s18 = smov [#allocation42]  }
 0x268   :  { %393 = dma.hbm_to_vmem [thread:$0]  %s10691_s20, 8192, %s388_s0, [#allocation38], %s9901_s6, %s9901_s6, %s9902_s28  }
 0x269   :  { %s409_s25 = sshll.u32 %s9928_s18, 4  ;;  %s9929_s19 = smov [#allocation45]   ;;  %s410_s25 = int_to_ptr.vmem [resolvable:$true] %s409_s25 }
 0x26a   :  { %s431_s7 = sshll.u32 %s9929_s19, 4  ;;  %s432_s7 = int_to_ptr.vmem [resolvable:$true] %s431_s7 }
 0x26d   :  { %s9704_s10 = scalar_lea.hbm %s10692_s8, 1024 }
 0x26e   :  { %p9705_p8 = scmp.ne.s32.totalorder %s10692_s8, %s9704_s10  ;;  %p9708_p9 = scmp.lt.u32.totalorder %s9704_s10, %s10692_s8 }
 0x270   :  { %p9710_p10 = pnand %p9708_p9, %p9705_p8 }
 0x272   :  { %9713 = shalt.err (!%p9710_p10)
}
 0x273   :  { %s9714_s11 = scalar_lea.vmem %s410_s25, 1024  ;;  %p9719_p12 = scmp.lt.s32.totalorder %s410_s25, %s410_s25 }
 0x274   :  { %p9715_p11 = scmp.ne.s32.totalorder %s410_s25, %s9714_s11  ;;  %p9720_p13 = scmp.lt.s32.totalorder %s9714_s11, %s9714_s11 }
 0x276   :  { %p9721_p0 = por %p9720_p13, %p9719_p12 }
 0x278   :  { %p9722_p1 = pnand %p9721_p0, %p9715_p11 }
 0x27a   :  { %9725 = shalt.err (!%p9722_p1)
}
 0x27b   :  { %s10693_s16 = sld [smem:[#allocation93_spill]] }
 0x27c   :  { %415 = dma.hbm_to_vmem [thread:$0]  %s10692_s8, 1024, %s410_s25, [#allocation41], %s9901_s6, %s9901_s6, %s9902_s28  }
 0x281   :  { %s9726_s21 = scalar_lea.hbm %s10693_s16, 5120 }
 0x282   :  { %p9727_p2 = scmp.ne.s32.totalorder %s10693_s16, %s9726_s21  ;;  %p9730_p3 = scmp.lt.u32.totalorder %s9726_s21, %s10693_s16 }
 0x284   :  { %p9732_p4 = pnand %p9730_p3, %p9727_p2 }
 0x286   :  { %9735 = shalt.err (!%p9732_p4)
}
 0x287   :  { %s9736_s15 = scalar_lea.vmem %s432_s7, 5120  ;;  %p9741_p6 = scmp.lt.s32.totalorder %s432_s7, %s432_s7 }
 0x288   :  { %p9737_p5 = scmp.ne.s32.totalorder %s432_s7, %s9736_s15  ;;  %p9742_p7 = scmp.lt.s32.totalorder %s9736_s15, %s9736_s15 }
 0x28a   :  { %p9743_p8 = por %p9742_p7, %p9741_p6 }
 0x28c   :  { %p9744_p9 = pnand %p9743_p8, %p9737_p5 }
 0x28e   :  { %9747 = shalt.err (!%p9744_p9)
}
 0x28f   :  { %s10694_s24 = sld [smem:[#allocation95_spill]]  ;;  %s9930_s13 = smov [#allocation48]  }
 0x290   :  { %437 = dma.hbm_to_vmem [thread:$0]  %s10693_s16, 5120, %s432_s7, [#allocation44], %s9901_s6, %s9901_s6, %s9902_s28  }
 0x291   :  { %s453_s4 = sshll.u32 %s9930_s13, 4  ;;  %s9931_s22 = smov [#allocation51]   ;;  %s454_s4 = int_to_ptr.vmem [resolvable:$true] %s453_s4 }
 0x292   :  { %s475_s17 = sshll.u32 %s9931_s22, 4  ;;  %s476_s17 = int_to_ptr.vmem [resolvable:$true] %s475_s17 }
 0x295   :  { %s9748_s23 = scalar_lea.hbm %s10694_s24, 1024 }
 0x296   :  { %p9749_p10 = scmp.ne.s32.totalorder %s10694_s24, %s9748_s23  ;;  %p9752_p11 = scmp.lt.u32.totalorder %s9748_s23, %s10694_s24 }
 0x298   :  { %p9754_p12 = pnand %p9752_p11, %p9749_p10 }
 0x29a   :  { %9757 = shalt.err (!%p9754_p12)
}
 0x29b   :  { %s9758_s14 = scalar_lea.vmem %s454_s4, 1024  ;;  %p9763_p0 = scmp.lt.s32.totalorder %s454_s4, %s454_s4 }
 0x29c   :  { %p9759_p13 = scmp.ne.s32.totalorder %s454_s4, %s9758_s14  ;;  %p9764_p1 = scmp.lt.s32.totalorder %s9758_s14, %s9758_s14 }
 0x29e   :  { %p9765_p2 = por %p9764_p1, %p9763_p0 }
 0x2a0   :  { %p9766_p3 = pnand %p9765_p2, %p9759_p13 }
 0x2a2   :  { %9769 = shalt.err (!%p9766_p3)
}
 0x2a3   :  { %459 = dma.hbm_to_vmem [thread:$0]  %s10694_s24, 1024, %s454_s4, [#allocation47], %s9901_s6, %s9901_s6, %s9902_s28  }
 0x2a4   :  { %s9770_s26 = scalar_lea.hbm %s10139_s27, 1024 }
 0x2a5   :  { %p9771_p4 = scmp.ne.s32.totalorder %s10139_s27, %s9770_s26  ;;  %p9774_p5 = scmp.lt.u32.totalorder %s9770_s26, %s10139_s27 }
 0x2a7   :  { %p9776_p6 = pnand %p9774_p5, %p9771_p4 }
 0x2a9   :  { %9779 = shalt.err (!%p9776_p6)
}
 0x2aa   :  { %s9780_s29 = scalar_lea.vmem %s476_s17, 1024  ;;  %p9785_p8 = scmp.lt.s32.totalorder %s476_s17, %s476_s17 }
 0x2ab   :  { %p9781_p7 = scmp.ne.s32.totalorder %s476_s17, %s9780_s29  ;;  %p9786_p9 = scmp.lt.s32.totalorder %s9780_s29, %s9780_s29 }
 0x2ad   :  { %p9787_p10 = por %p9786_p9, %p9785_p8 }
 0x2af   :  { %p9788_p11 = pnand %p9787_p10, %p9781_p7 }
 0x2b1   :  { %9791 = shalt.err (!%p9788_p11)
}
 0x2b2   :  { %481 = dma.hbm_to_vmem [thread:$0]  %s10139_s27, 1024, %s476_s17, [#allocation50], %s9901_s6, %s9901_s6, %s9902_s28  }
 0x2b3   :  { %s9932_s1 = smov [#allocation52]   ;;  %s9792_s30 = scalar_lea.hbm %s10144_s3, 16 }
 0x2b4   :  { %s488_s0 = sshll.u32 %s9932_s1, 4  ;;  %p9793_p12 = scmp.ne.s32.totalorder %s10144_s3, %s9792_s30  ;;  %s489_s0 = int_to_ptr.vmem [resolvable:$true] %s488_s0 }
 0x2b5   :  { %p9796_p13 = scmp.lt.u32.totalorder %s9792_s30, %s10144_s3 }
 0x2b7   :  { %p9798_p0 = pnand %p9796_p13, %p9793_p12 }
 0x2b9   :  { %9801 = shalt.err (!%p9798_p0)
}
 0x2ba   :  { %s9802_s9 = scalar_lea.vmem %s489_s0, 16  ;;  %s9806_s20 = scalar_lea.vmem %s489_s0, 32 }
 0x2bb   :  { %p9803_p1 = scmp.ne.s32.totalorder %s489_s0, %s9802_s9  ;;  %p9807_p2 = scmp.lt.s32.totalorder %s489_s0, %s489_s0 }
 0x2bc   :  { %p9808_p3 = scmp.lt.s32.totalorder %s9806_s20, %s9802_s9 }
 0x2be   :  { %p9809_p4 = por %p9808_p3, %p9807_p2 }
 0x2c0   :  { %p9810_p5 = pnand %p9809_p4, %p9803_p1 }
 0x2c2   :  { %9813 = shalt.err (!%p9810_p5)
}
 0x2c3   :  { %491 = dma.hbm_to_vmem [thread:$0]  %s10144_s3, 16, %s489_s0, [#allocation53]  }
 0x2c4   :  { %9814 = dma.done.wait [#allocation3], 8192  }
 0x2c5   :  { %9815 = vsyncadd [#allocation3], 4294959104 }
 0x2c6   :  { %9816 = dma.done.wait [#allocation5], 8320  }
 0x2c7   :  { %9817 = vsyncadd [#allocation5], 4294958976 }
 0x2c8   :  { %9818 = dma.done.wait [#allocation8], 32  }
 0x2c9   :  { %9819 = vsyncadd [#allocation8], 4294967264 }
 0x2ca   :  { %9820 = dma.done.wait [#allocation11], 4160  }
 0x2cb   :  { %9821 = vsyncadd [#allocation11], 4294963136 }
 0x2cc   :  { %9822 = dma.done.wait [#allocation14], 8224  }
 0x2cd   :  { %9823 = vsyncadd [#allocation14], 4294959072 }
 0x2ce   :  { %9824 = dma.done.wait [#allocation17], 2064  }
 0x2cf   :  { %9825 = vsyncadd [#allocation17], 4294965232 }
 0x2d0   :  { %9826 = dma.done.wait [#allocation20], 4160  }
 0x2d1   :  { %9827 = vsyncadd [#allocation20], 4294963136 }
 0x2d2   :  { %9828 = dma.done.wait [#allocation23], 8224  }
 0x2d3   :  { %9829 = vsyncadd [#allocation23], 4294959072 }
 0x2d4   :  { %9830 = dma.done.wait [#allocation26], 2064  }
 0x2d5   :  { %9831 = vsyncadd [#allocation26], 4294965232 }
 0x2d6   :  { %9832 = dma.done.wait [#allocation29], 4160  }
 0x2d7   :  { %9833 = vsyncadd [#allocation29], 4294963136 }
 0x2d8   :  { %9834 = dma.done.wait [#allocation32], 8224  }
 0x2d9   :  { %9835 = vsyncadd [#allocation32], 4294959072 }
 0x2da   :  { %9836 = dma.done.wait [#allocation35], 8208  }
 0x2db   :  { %9837 = vsyncadd [#allocation35], 4294959088 }
 0x2dc   :  { %9838 = dma.done.wait [#allocation38], 8320  }
 0x2dd   :  { %9839 = vsyncadd [#allocation38], 4294958976 }
 0x2de   :  { %9840 = dma.done.wait [#allocation41], 1040  }
 0x2df   :  { %9841 = vsyncadd [#allocation41], 4294966256 }
 0x2e0   :  { %9842 = dma.done.wait [#allocation44], 5136  }
 0x2e1   :  { %9843 = vsyncadd [#allocation44], 4294962160 }
 0x2e2   :  { %9844 = dma.done.wait [#allocation47], 1040  }
 0x2e3   :  { %9845 = vsyncadd [#allocation47], 4294966256 }
 0x2e4   :  { %9846 = dma.done.wait [#allocation50], 1040  }
 0x2e5   :  { %9847 = vsyncadd [#allocation50], 4294966256 }
 0x2e6   :  { %9848 = dma.done.wait [#allocation53], 16  }
 0x2e7   :  { %9849 = vsyncadd [#allocation53], 4294967280  ;;  %v9933_v0 = vmov 0   ;;  %v596_v1 = vld [vmem:[#allocation2] sm:$0xff]  ;;  %v597_v3 = vld [vmem:[#allocation2 + $0x8] sm:$0xff]  ;;  %s10695_s3 = sld [smem:[#allocation72_spill]] }
 0x2e8   :  { %1054 = vmatprep.mubr.bf16.mxu0 %v9933_v0  ;;  %1095 = vmatprep.mubr.bf16.mxu1 %v9933_v0  ;;  %v600_v2 = vld [vmem:[#allocation2 + $0x20] sm:$0xff]  ;;  %v601_v5 = vld [vmem:[#allocation2 + $0x28] sm:$0xff]  ;;  %v598_v60 = vld [vmem:[#allocation2 + $0x10] sm:$0xff]  ;;  %s10696_s27 = sld [smem:[#allocation79_spill]]  ;;  %s10697_s6 = sld [smem:[#allocation73_spill]]  ;;  %vm9935_vm0 = vmmov 0  }
 0x2e9   :  { %v7106_v4 = vcombine.high %v596_v1, %v600_v2  ;;  %v7105_v6 = vcombine.low %v596_v1, %v600_v2  ;;  %v604_v7 = vld [vmem:[#allocation2 + $0x40] sm:$0xff]  ;;  %v7108_v9 = vcombine.high %v597_v3, %v601_v5  ;;  %v7107_v10 = vcombine.low %v597_v3, %v601_v5  ;;  %v605_v12 = vld [vmem:[#allocation2 + $0x48] sm:$0xff]  ;;  %v602_v63 = vld [vmem:[#allocation2 + $0x30] sm:$0xff]  ;;  %s10698_s28 = sld [smem:[#allocation74_spill]]  ;;  %s10699_s5 = sld [smem:[#allocation75_spill]] }
 0x2ea   :  { %v608_v8 = vld [vmem:[#allocation2 + $0x60] sm:$0xff]  ;;  %v609_v13 = vld [vmem:[#allocation2 + $0x68] sm:$0xff]  ;;  %v599_v2 = vld [vmem:[#allocation2 + $0x18] sm:$0xff]  ;;  %s10700_s2 = sld [smem:[#allocation89_spill]]  ;;  %s10701_s8 = sld [smem:[#allocation76_spill]] }
 0x2eb   :  { %v7114_v11 = vcombine.high %v604_v7, %v608_v8  ;;  %v612_v14 = vld [vmem:[#allocation2 + $0x80] sm:$0xff]  ;;  %1022 = vmatprep.subr.bf16.mxu0 %v7106_v4  ;;  %v7116_v15 = vcombine.high %v605_v12, %v609_v13  ;;  %v613_v17 = vld [vmem:[#allocation2 + $0x88] sm:$0xff]  ;;  %1063 = vmatprep.subr.bf16.mxu1 %v7108_v9  ;;  %v7113_v19 = vcombine.low %v604_v7, %v608_v8  ;;  %v603_v3 = vld [vmem:[#allocation2 + $0x38] sm:$0xff] }
 0x2ec   :  { %v616_v16 = vld [vmem:[#allocation2 + $0xa0] sm:$0xff]  ;;  %v617_v18 = vld [vmem:[#allocation2 + $0xa8] sm:$0xff]  ;;  %1023 = vmatpush1.bf16.msra.mxu0 %v7105_v6  ;;  %1064 = vmatpush1.bf16.msra.mxu1 %v7107_v10  ;;  %v7115_v20 = vcombine.low %v605_v12, %v609_v13  ;;  %v606_v5 = vld [vmem:[#allocation2 + $0x50] sm:$0xff]  ;;  %v7110_v7 = vcombine.high %v598_v60, %v602_v63  ;;  %v7112_v10 = vcombine.high %v599_v2, %v603_v3 }
 0x2ed   :  { %1024 = vmatprep.subr.bf16.mxu0 %v7114_v11  ;;  %v7122_v21 = vcombine.high %v612_v14, %v616_v16  ;;  %1065 = vmatprep.subr.bf16.mxu1 %v7116_v15  ;;  %v7124_v22 = vcombine.high %v613_v17, %v617_v18  ;;  %v620_v23 = vld [vmem:[#allocation2 + $0xc0] sm:$0xff]  ;;  %v621_v25 = vld [vmem:[#allocation2 + $0xc8] sm:$0xff]  ;;  %v7121_v27 = vcombine.low %v612_v14, %v616_v16  ;;  %v610_v8 = vld [vmem:[#allocation2 + $0x70] sm:$0xff] }
 0x2ee   :  { %v624_v24 = vld [vmem:[#allocation2 + $0xe0] sm:$0xff]  ;;  %v625_v26 = vld [vmem:[#allocation2 + $0xe8] sm:$0xff]  ;;  %v7123_v28 = vcombine.low %v613_v17, %v617_v18  ;;  %v607_v11 = vld [vmem:[#allocation2 + $0x58] sm:$0xff]  ;;  %v7109_v13 = vcombine.low %v598_v60, %v602_v63  ;;  %v7111_v15 = vcombine.low %v599_v2, %v603_v3  ;;  %v7118_v16 = vcombine.high %v606_v5, %v610_v8 }
 0x2ef   :  { %v7130_v29 = vcombine.high %v620_v23, %v624_v24  ;;  %v7132_v30 = vcombine.high %v621_v25, %v625_v26  ;;  %v628_v31 = vld [vmem:[#allocation2 + $0x100] sm:$0xff]  ;;  %v629_v33 = vld [vmem:[#allocation2 + $0x108] sm:$0xff]  ;;  %v7129_v35 = vcombine.low %v620_v23, %v624_v24  ;;  %v7131_v36 = vcombine.low %v621_v25, %v625_v26  ;;  %v611_v12 = vld [vmem:[#allocation2 + $0x78] sm:$0xff] }
 0x2f0   :  { %1025 = vmatpush1.bf16.msra.mxu0 %v7113_v19  ;;  %1066 = vmatpush1.bf16.msra.mxu1 %v7115_v20  ;;  %v632_v32 = vld [vmem:[#allocation2 + $0x120] sm:$0xff]  ;;  %v633_v34 = vld [vmem:[#allocation2 + $0x128] sm:$0xff]  ;;  %v614_v14 = vld [vmem:[#allocation2 + $0x90] sm:$0xff]  ;;  %v7120_v18 = vcombine.high %v607_v11, %v611_v12  ;;  %v7119_v23 = vcombine.low %v607_v11, %v611_v12 }
 0x2f1   :  { %1026 = vmatprep.subr.bf16.mxu0 %v7122_v21  ;;  %1067 = vmatprep.subr.bf16.mxu1 %v7124_v22  ;;  %v7138_v37 = vcombine.high %v628_v31, %v632_v32  ;;  %v7140_v38 = vcombine.high %v629_v33, %v633_v34  ;;  %v636_v39 = vld [vmem:[#allocation2 + $0x140] sm:$0xff]  ;;  %v637_v41 = vld [vmem:[#allocation2 + $0x148] sm:$0xff]  ;;  %v7137_v43 = vcombine.low %v628_v31, %v632_v32  ;;  %v618_v17 = vld [vmem:[#allocation2 + $0xb0] sm:$0xff] }
 0x2f2   :  { %v640_v40 = vld [vmem:[#allocation2 + $0x160] sm:$0xff]  ;;  %v641_v42 = vld [vmem:[#allocation2 + $0x168] sm:$0xff]  ;;  %v7139_v44 = vcombine.low %v629_v33, %v633_v34  ;;  %v615_v19 = vld [vmem:[#allocation2 + $0x98] sm:$0xff]  ;;  %v7117_v21 = vcombine.low %v606_v5, %v610_v8  ;;  %v7126_v24 = vcombine.high %v614_v14, %v618_v17 }
 0x2f3   :  { %v7146_v45 = vcombine.high %v636_v39, %v640_v40  ;;  %v7148_v46 = vcombine.high %v637_v41, %v641_v42  ;;  %v644_v47 = vld [vmem:[#allocation2 + $0x180] sm:$0xff]  ;;  %v645_v49 = vld [vmem:[#allocation2 + $0x188] sm:$0xff]  ;;  %v7145_v51 = vcombine.low %v636_v39, %v640_v40  ;;  %v7147_v52 = vcombine.low %v637_v41, %v641_v42  ;;  %v619_v20 = vld [vmem:[#allocation2 + $0xb8] sm:$0xff] }
 0x2f4   :  { %1027 = vmatpush1.bf16.msra.mxu0 %v7121_v27  ;;  %1068 = vmatpush1.bf16.msra.mxu1 %v7123_v28  ;;  %v648_v48 = vld [vmem:[#allocation2 + $0x1a0] sm:$0xff]  ;;  %v649_v50 = vld [vmem:[#allocation2 + $0x1a8] sm:$0xff]  ;;  %v622_v22 = vld [vmem:[#allocation2 + $0xd0] sm:$0xff]  ;;  %v7128_v26 = vcombine.high %v615_v19, %v619_v20  ;;  %v7127_v31 = vcombine.low %v615_v19, %v619_v20 }
 0x2f5   :  { %1028 = vmatprep.subr.bf16.mxu0 %v7130_v29  ;;  %1069 = vmatprep.subr.bf16.mxu1 %v7132_v30  ;;  %v7154_v53 = vcombine.high %v644_v47, %v648_v48  ;;  %v652_v54 = vld [vmem:[#allocation2 + $0x1c0] sm:$0xff]  ;;  %v7156_v56 = vcombine.high %v645_v49, %v649_v50  ;;  %v653_v57 = vld [vmem:[#allocation2 + $0x1c8] sm:$0xff]  ;;  %v7153_v59 = vcombine.low %v644_v47, %v648_v48  ;;  %v626_v25 = vld [vmem:[#allocation2 + $0xf0] sm:$0xff] }
 0x2f6   :  { %v656_v55 = vld [vmem:[#allocation2 + $0x1e0] sm:$0xff]  ;;  %v657_v58 = vld [vmem:[#allocation2 + $0x1e8] sm:$0xff]  ;;  %v7155_v61 = vcombine.low %v645_v49, %v649_v50  ;;  %v623_v27 = vld [vmem:[#allocation2 + $0xd8] sm:$0xff]  ;;  %v7125_v29 = vcombine.low %v614_v14, %v618_v17  ;;  %v7134_v32 = vcombine.high %v622_v22, %v626_v25 }
 0x2f7   :  { %v7162_v62 = vcombine.high %v652_v54, %v656_v55  ;;  %v7164_v1 = vcombine.high %v653_v57, %v657_v58  ;;  %v7161_v4 = vcombine.low %v652_v54, %v656_v55  ;;  %v7163_v6 = vcombine.low %v653_v57, %v657_v58  ;;  %v10359_v9 = vld [vmem:[%s10695_s3] sm:$0xf]  ;;  %v627_v28 = vld [vmem:[#allocation2 + $0xf8] sm:$0xff]  ;;  %v630_v30 = vld [vmem:[#allocation2 + $0x110] sm:$0xff] }
 0x2f8   :  { %1029 = vmatpush1.bf16.msra.mxu0 %v7129_v35  ;;  %1070 = vmatpush1.bf16.msra.mxu1 %v7131_v36  ;;  %v634_v33 = vld [vmem:[#allocation2 + $0x130] sm:$0xff]  ;;  %v7136_v34 = vcombine.high %v623_v27, %v627_v28  ;;  %v631_v35 = vld [vmem:[#allocation2 + $0x118] sm:$0xff]  ;;  %v7135_v40 = vcombine.low %v623_v27, %v627_v28  ;;  %v8386_v2 = vld [vmem:[#allocation6 + $0x40] sm:$0xff]  }
 0x2f9   :  { %1030 = vmatprep.subr.bf16.mxu0 %v7138_v37  ;;  %1071 = vmatprep.subr.bf16.mxu1 %v7140_v38  ;;  %v635_v36 = vld [vmem:[#allocation2 + $0x138] sm:$0xff]  ;;  %v7133_v37 = vcombine.low %v622_v22, %v626_v25  ;;  %v638_v38 = vld [vmem:[#allocation2 + $0x150] sm:$0xff]  ;;  %v7142_v41 = vcombine.high %v630_v30, %v634_v33  ;;  %v8398_v17 = vld [vmem:[#allocation6 + $0x58] sm:$0xff]  }
 0x2fa   :  { %v642_v39 = vld [vmem:[#allocation2 + $0x170] sm:$0xff]  ;;  %v639_v42 = vld [vmem:[#allocation2 + $0x158] sm:$0xff]  ;;  %v7143_v48 = vcombine.low %v631_v35, %v635_v36  ;;  %v8400_v19 = vld [vmem:[#allocation6 + $0x18] sm:$0xff]  }
 0x2fb   :  { %v650_v47 = vld [vmem:[#allocation2 + $0x1b0] sm:$0xff]  ;;  %v7150_v49 = vcombine.high %v638_v38, %v642_v39  ;;  %v647_v50 = vld [vmem:[#allocation2 + $0x198] sm:$0xff]  ;;  %v8401_v20 = vld [vmem:[#allocation6 + $0x98] sm:$0xff]  }
 0x2fc   :  { %1031 = vmatpush1.bf16.msra.mxu0 %v7137_v43  ;;  %1072 = vmatpush1.bf16.msra.mxu1 %v7139_v44  ;;  %v643_v43 = vld [vmem:[#allocation2 + $0x178] sm:$0xff]  ;;  %v7144_v44 = vcombine.high %v631_v35, %v635_v36  ;;  %v654_v54 = vld [vmem:[#allocation2 + $0x1d0] sm:$0xff]  ;;  %v8403_v22 = vld [vmem:[#allocation6 + $0xe0] sm:$0xff]  }
 0x2fd   :  { %1032 = vmatprep.subr.bf16.mxu0 %v7146_v45  ;;  %1073 = vmatprep.subr.bf16.mxu1 %v7148_v46  ;;  %v7141_v45 = vcombine.low %v630_v30, %v634_v33  ;;  %v646_v46 = vld [vmem:[#allocation2 + $0x190] sm:$0xff]  ;;  %v655_v58 = vld [vmem:[#allocation2 + $0x1d8] sm:$0xff]  ;;  %v8415_v33 = vld [vmem:[#allocation6 + $0xf8] sm:$0xff]  }
 0x2fe   :  { %v658_v55 = vld [vmem:[#allocation2 + $0x1f0] sm:$0xff]  ;;  %v7158_v57 = vcombine.high %v646_v46, %v650_v47  ;;  %v8395_v14 = vld [vmem:[#allocation6 + $0xd0] sm:$0xff]   ;;  %v8417_v35 = vld [vmem:[#allocation6 + $0xb8] sm:$0xff]  }
 0x2ff   :  { %v7166_v63 = vcombine.high %v654_v54, %v658_v55  ;;  %v7165_v3 = vcombine.low %v654_v54, %v658_v55  ;;  %v8390_v8 = vld [vmem:[#allocation6 + $0x48] sm:$0xff]   ;;  %v8410_v28 = vld [vmem:[#allocation6 + $0x70] sm:$0xff]   ;;  %v8418_v36 = vld [vmem:[#allocation6 + $0x140] sm:$0xff]  }
 0x300   :  { %1033 = vmatpush1.bf16.msra.mxu0 %v7145_v51  ;;  %1074 = vmatpush1.bf16.msra.mxu1 %v7147_v52  ;;  %v651_v51 = vld [vmem:[#allocation2 + $0x1b8] sm:$0xff]  ;;  %v7152_v52 = vcombine.high %v639_v42, %v643_v43  ;;  %v8392_v11 = vld [vmem:[#allocation6 + $0x8] sm:$0xff]  }
 0x301   :  { %1034 = vmatprep.subr.bf16.mxu0 %v7154_v53  ;;  %1075 = vmatprep.subr.bf16.mxu1 %v7156_v56  ;;  %v7149_v53 = vcombine.low %v638_v38, %v642_v39  ;;  %v7151_v56 = vcombine.low %v639_v42, %v643_v43  ;;  %v7160_v60 = vcombine.high %v647_v50, %v651_v51  ;;  %v8393_v12 = vld [vmem:[#allocation6 + $0x88] sm:$0xff]   ;;  %v8412_v30 = vld [vmem:[#allocation6 + $0x30] sm:$0xff]   ;;  %v662_v38 = vlaneseq }
 0x302   :  { %v8407_v25 = vld [vmem:[#allocation6 + $0xe8] sm:$0xff]  }
 0x303   :  { %v8409_v27 = vld [vmem:[#allocation6 + $0xa8] sm:$0xff]   ;;  %v10367_v39 = vshrl.u32 %v662_v38, 7 }
 0x304   :  { %1035 = vmatpush1.bf16.msra.mxu0 %v7153_v59  ;;  %1076 = vmatpush1.bf16.msra.mxu1 %v7155_v61  ;;  %v659_v59 = vld [vmem:[#allocation2 + $0x1f8] sm:$0xff]  ;;  %v7157_v61 = vcombine.low %v646_v46, %v650_v47 }
 0x305   :  { %1036 = vmatprep.subr.bf16.mxu0 %v7162_v62  ;;  %1077 = vmatprep.subr.bf16.mxu1 %v7164_v1  ;;  %v7159_v62 = vcombine.low %v647_v50, %v651_v51  ;;  %v7168_v1 = vcombine.high %v655_v58, %v659_v59  ;;  %v7167_v5 = vcombine.low %v655_v58, %v659_v59  ;;  %v10376_v42 = vsub.s32 1, %v10367_v39 }
 0x306   :  { %v10379_v43 = vsub.s32 3, %v10367_v39  ;;  %v680_v50 = vsub.s32 4, %v10367_v39 }
 0x308   :  { %1037 = vmatpush1.bf16.msra.mxu0 %v7161_v4  ;;  %1078 = vmatpush1.bf16.msra.mxu1 %v7163_v6  ;;  %v8387_v4 = vld [vmem:[#allocation6 + $0xc0] sm:$0xff]  }
 0x309   :  { %1104 = vmatprep.subr.bf16.mxu0 %v7110_v7  ;;  %1145 = vmatprep.subr.bf16.mxu1 %v7112_v10  ;;  %v8388_v6 = vld [vmem:[#allocation6] sm:$0xff]   ;;  %v8391_v10 = vld [vmem:[#allocation6 + $0xc8] sm:$0xff]  }
 0x30a   :  { %v8389_v7 = vld [vmem:[#allocation6 + $0x80] sm:$0xff]  }
 0x30b   :  { %1055 = vmatmul.mubr.bf16.vlgmr.msra.gmra.mrb[0].mxu0 %v10359_v9  ;;  %1096 = vmatmul.mubr.bf16.vlgmr.msra.gmra.mrb[0].mxu1 %v10359_v9 }
 0x30c   :  { %1105 = vmatpush1.bf16.msra.mxu0 %v7109_v13  ;;  %1146 = vmatpush1.bf16.msra.mxu1 %v7111_v15  ;;  %v8394_v13 = vld [vmem:[#allocation6 + $0x50] sm:$0xff]  }
 0x30d   :  { %1106 = vmatprep.subr.bf16.mxu0 %v7118_v16  ;;  %1147 = vmatprep.subr.bf16.mxu1 %v7120_v18  ;;  %v8396_v15 = vld [vmem:[#allocation6 + $0x10] sm:$0xff]   ;;  %v8399_v18 = vld [vmem:[#allocation6 + $0xd8] sm:$0xff]  }
 0x30e   :  { %1136 = vmatprep.mubr.bf16.mxu0 %v9933_v0  ;;  %1177 = vmatprep.mubr.bf16.mxu1 %v9933_v0  ;;  %v8397_v16 = vld [vmem:[#allocation6 + $0x90] sm:$0xff]  }
 0x310   :  { %1107 = vmatpush1.bf16.msra.mxu0 %v7117_v21  ;;  %1148 = vmatpush1.bf16.msra.mxu1 %v7119_v23  ;;  %v8402_v21 = vld [vmem:[#allocation6 + $0x60] sm:$0xff]  }
 0x311   :  { %1108 = vmatprep.subr.bf16.mxu0 %v7126_v24  ;;  %1149 = vmatprep.subr.bf16.mxu1 %v7128_v26  ;;  %v8405_v23 = vld [vmem:[#allocation6 + $0xa0] sm:$0xff]   ;;  %v8406_v24 = vld [vmem:[#allocation6 + $0x68] sm:$0xff]  }
 0x312   :  { %v8408_v26 = vld [vmem:[#allocation6 + $0x28] sm:$0xff]  }
 0x314   :  { %1109 = vmatpush1.bf16.msra.mxu0 %v7125_v29  ;;  %1150 = vmatpush1.bf16.msra.mxu1 %v7127_v31  ;;  %v8411_v29 = vld [vmem:[#allocation6 + $0xf0] sm:$0xff]  }
 0x315   :  { %1110 = vmatprep.subr.bf16.mxu0 %v7134_v32  ;;  %1151 = vmatprep.subr.bf16.mxu1 %v7136_v34  ;;  %v8413_v31 = vld [vmem:[#allocation6 + $0xb0] sm:$0xff]   ;;  %v8414_v32 = vld [vmem:[#allocation6 + $0x78] sm:$0xff]  }
 0x316   :  { %v8416_v34 = vld [vmem:[#allocation6 + $0x38] sm:$0xff]  }
 0x318   :  { %1111 = vmatpush1.bf16.msra.mxu0 %v7133_v37  ;;  %1152 = vmatpush1.bf16.msra.mxu1 %v7135_v40  ;;  %v8419_v37 = vld [vmem:[#allocation6 + $0x1c0] sm:$0xff]   ;;  %v10370_v40 = vsub.s32 0, %v10367_v39 }
 0x319   :  { %1112 = vmatprep.subr.bf16.mxu0 %v7142_v41  ;;  %1153 = vmatprep.subr.bf16.mxu1 %v7144_v44  ;;  %v10373_v41 = vsub.s32 2, %v10367_v39  ;;  %v10381_v44 = vld [vmem:[#allocation4] sm:$0xff] }
 0x31a   :  { %v669_v47 = vrot.slane %v10381_v44, %v10376_v42 }
 0x31b   :  { %v673_v46 = vrot.slane %v10381_v44, %v10373_v41 }
 0x31c   :  { %1113 = vmatpush1.bf16.msra.mxu0 %v7141_v45  ;;  %1154 = vmatpush1.bf16.msra.mxu1 %v7143_v48  ;;  %v665_v45 = vrot.slane %v10381_v44, %v10370_v40  ;;  %v677_v48 = vrot.slane %v10381_v44, %v10379_v43 }
 0x31d   :  { %1114 = vmatprep.subr.bf16.mxu0 %v7150_v49  ;;  %1155 = vmatprep.subr.bf16.mxu1 %v7152_v52 }
 0x320   :  { %1115 = vmatpush1.bf16.msra.mxu0 %v7149_v53  ;;  %1156 = vmatpush1.bf16.msra.mxu1 %v7151_v56 }
 0x321   :  { %1116 = vmatprep.subr.bf16.mxu0 %v7158_v57  ;;  %1157 = vmatprep.subr.bf16.mxu1 %v7160_v60 }
 0x324   :  { %1117 = vmatpush1.bf16.msra.mxu0 %v7157_v61  ;;  %1158 = vmatpush1.bf16.msra.mxu1 %v7159_v62  ;;  %v684_v62 = vsub.s32 5, %v10367_v39 }
 0x325   :  { %1118 = vmatprep.subr.bf16.mxu0 %v7166_v63  ;;  %1159 = vmatprep.subr.bf16.mxu1 %v7168_v1 }
 0x328   :  { %1119 = vmatpush1.bf16.msra.mxu0 %v7165_v3  ;;  %1160 = vmatpush1.bf16.msra.mxu1 %v7167_v5  ;;  %v8420_v3 = vld [vmem:[#allocation6 + $0x100] sm:$0xff]  }
 0x329   :  { %7779 = vmatprep.subr.bf16.mxu0 %v8386_v2  ;;  %7801 = vmatprep.subr.bf16.mxu1 %v8387_v4  ;;  %v692_v4 = vsub.s32 7, %v10367_v39 }
 0x32b   :  { %1137 = vmatmul.mubr.bf16.vlgmr.msra.gmra.mrb[4].mxu0 %v10359_v9  ;;  %1178 = vmatmul.mubr.bf16.vlgmr.msra.gmra.mrb[4].mxu1 %v10359_v9  ;;  %v8404_v9 = vld [vmem:[#allocation6 + $0x20] sm:$0xff]  }
 0x32c   :  { %7780 = vmatpush3.bf16.msra.mxu0 %v8388_v6  ;;  %7802 = vmatpush3.bf16.msra.mxu1 %v8389_v7  ;;  %v8421_v7 = vld [vmem:[#allocation6 + $0x180] sm:$0xff]  }
 0x32d   :  { %7781 = vmatprep.subr.bf16.mxu0 %v8390_v8  ;;  %7803 = vmatprep.subr.bf16.mxu1 %v8391_v10  ;;  %v8422_v8 = vld [vmem:[#allocation6 + $0x148] sm:$0xff]   ;;  %v688_v10 = vsub.s32 6, %v10367_v39 }
 0x32e   :  { %v9034_v39 = vld [vmem:[#allocation42] sm:$0xff]  }
 0x32f   :  { %v689_v38 = vrot.slane %v10381_v44, %v688_v10 }
 0x330   :  { %7782 = vmatpush3.bf16.msra.mxu0 %v8392_v11  ;;  %7804 = vmatpush3.bf16.msra.mxu1 %v8393_v12 }
 0x331   :  { %7783 = vmatprep.subr.bf16.mxu0 %v8394_v13  ;;  %7805 = vmatprep.subr.bf16.mxu1 %v8395_v14  ;;  %v8423_v13 = vld [vmem:[#allocation6 + $0x1c8] sm:$0xff]  }
 0x334   :  { %7784 = vmatpush3.bf16.msra.mxu0 %v8396_v15  ;;  %7806 = vmatpush3.bf16.msra.mxu1 %v8397_v16  ;;  %v8424_v15 = vld [vmem:[#allocation6 + $0x108] sm:$0xff]  }
 0x335   :  { %7785 = vmatprep.subr.bf16.mxu0 %v8398_v17  ;;  %7807 = vmatprep.subr.bf16.mxu1 %v8399_v18  ;;  %v8425_v16 = vld [vmem:[#allocation6 + $0x188] sm:$0xff]   ;;  %v8426_v17 = vld [vmem:[#allocation6 + $0x150] sm:$0xff]  }
 0x336   :  { %v8427_v18 = vld [vmem:[#allocation6 + $0x1d0] sm:$0xff]  }
 0x338   :  { %7786 = vmatpush3.bf16.msra.mxu0 %v8400_v19  ;;  %7808 = vmatpush3.bf16.msra.mxu1 %v8401_v20  ;;  %v8428_v19 = vld [vmem:[#allocation6 + $0x110] sm:$0xff]  }
 0x339   :  { %7787 = vmatprep.subr.bf16.mxu0 %v8402_v21  ;;  %7809 = vmatprep.subr.bf16.mxu1 %v8403_v22  ;;  %v8429_v20 = vld [vmem:[#allocation6 + $0x190] sm:$0xff]   ;;  %v8430_v21 = vld [vmem:[#allocation6 + $0x158] sm:$0xff]  }
 0x33a   :  { %v8431_v22 = vld [vmem:[#allocation6 + $0x1d8] sm:$0xff]  }
 0x33c   :  { %7788 = vmatpush3.bf16.msra.mxu0 %v8404_v9  ;;  %7810 = vmatpush3.bf16.msra.mxu1 %v8405_v23  ;;  %v8432_v9 = vld [vmem:[#allocation6 + $0x118] sm:$0xff]  }
 0x33d   :  { %7789 = vmatprep.subr.bf16.mxu0 %v8406_v24  ;;  %7811 = vmatprep.subr.bf16.mxu1 %v8407_v25  ;;  %v8433_v23 = vld [vmem:[#allocation6 + $0x198] sm:$0xff]   ;;  %v8434_v24 = vld [vmem:[#allocation6 + $0x160] sm:$0xff]  }
 0x33e   :  { %v8435_v25 = vld [vmem:[#allocation6 + $0x1e0] sm:$0xff]  }
 0x340   :  { %7790 = vmatpush3.bf16.msra.mxu0 %v8408_v26  ;;  %7812 = vmatpush3.bf16.msra.mxu1 %v8409_v27  ;;  %v8436_v26 = vld [vmem:[#allocation6 + $0x120] sm:$0xff]  }
 0x341   :  { %7791 = vmatprep.subr.bf16.mxu0 %v8410_v28  ;;  %7813 = vmatprep.subr.bf16.mxu1 %v8411_v29  ;;  %v8437_v27 = vld [vmem:[#allocation6 + $0x1a0] sm:$0xff]   ;;  %v8438_v28 = vld [vmem:[#allocation6 + $0x168] sm:$0xff]  }
 0x342   :  { %v8439_v29 = vld [vmem:[#allocation6 + $0x1e8] sm:$0xff]  }
 0x344   :  { %7792 = vmatpush3.bf16.msra.mxu0 %v8412_v30  ;;  %7814 = vmatpush3.bf16.msra.mxu1 %v8413_v31  ;;  %v8440_v30 = vld [vmem:[#allocation6 + $0x128] sm:$0xff]  }
 0x345   :  { %7793 = vmatprep.subr.bf16.mxu0 %v8414_v32  ;;  %7815 = vmatprep.subr.bf16.mxu1 %v8415_v33  ;;  %v8441_v31 = vld [vmem:[#allocation6 + $0x1a8] sm:$0xff]   ;;  %v8442_v32 = vld [vmem:[#allocation6 + $0x170] sm:$0xff]  }
 0x346   :  { %v8443_v33 = vld [vmem:[#allocation6 + $0x1f0] sm:$0xff]  }
 0x348   :  { %7794 = vmatpush3.bf16.msra.mxu0 %v8416_v34  ;;  %7816 = vmatpush3.bf16.msra.mxu1 %v8417_v35  ;;  %v8444_v34 = vld [vmem:[#allocation6 + $0x130] sm:$0xff]   ;;  %v681_v35 = vrot.slane %v10381_v44, %v680_v50 }
 0x349   :  { %7823 = vmatprep.subr.bf16.mxu0 %v8418_v36  ;;  %7845 = vmatprep.subr.bf16.mxu1 %v8419_v37  ;;  %v8445_v36 = vld [vmem:[#allocation6 + $0x1b0] sm:$0xff]   ;;  %v8446_v37 = vld [vmem:[#allocation6 + $0x178] sm:$0xff]  }
 0x3de   :  { %v1056_v49 = vpop.f32.mrb[0].mxu0  ;;  %v1097_v52 = vpop.f32.mrb[0].mxu1 }
 0x3df   :  { %v1057_v51 = vadd.f32 %v1056_v49, %v665_v45  ;;  %v1058_v53 = vpop.f32.mrb[1].mxu0  ;;  %v1098_v54 = vadd.f32 %v1097_v52, %v673_v46  ;;  %v1099_v56 = vpop.f32.mrb[1].mxu1  ;;  %v685_v45 = vrot.slane %v10381_v44, %v684_v62  ;;  %v8447_v46 = vld [vmem:[#allocation6 + $0x1f8] sm:$0xff]  }
 0x3e0   :  { %v1059_v55 = vadd.f32 %v1058_v53, %v669_v47  ;;  %v1060_v57 = vpop.f32.mrb[2].mxu0  ;;  %v1100_v59 = vadd.f32 %v1099_v56, %v677_v48  ;;  %v1101_v60 = vpop.f32.mrb[2].mxu1  ;;  %v693_v47 = vrot.slane %v10381_v44, %v692_v4  ;;  %v8448_v49 = vld [vmem:[#allocation6 + $0x138] sm:$0xff]  }
 0x3e1   :  { %v1186_v58 = vmax.f32 %v1057_v51, 0.0  ;;  %v1061_v61 = vpop.f32.mrb[3].mxu0  ;;  %v1188_v63 = vmax.f32 %v1098_v54, 0.0  ;;  %v1102_v2 = vpop.f32.mrb[3].mxu1  ;;  %v8449_v44 = vld [vmem:[#allocation6 + $0x1b8] sm:$0xff]  }
 0x3e2   :  { %v1187_v1 = vmax.f32 %v1059_v55, 0.0  ;;  %v1189_v6 = vmax.f32 %v1100_v59, 0.0 }
 0x3e3   :  { %v1194_v5 = vpack.c.bf16 %v1186_v58, %v1186_v58  ;;  %v1196_v11 = vpack.c.bf16 %v1188_v63, %v1188_v63  ;;  %v8452_v58 = vld [vmem:[#allocation10 + $0x4] ss:$16 sps:$4 sm:$0xff]  }
 0x3e4   :  { %v1195_v12 = vpack.c.bf16 %v1187_v1, %v1187_v1  ;;  %v1197_v14 = vpack.c.bf16 %v1189_v6, %v1189_v6  ;;  %v8450_v6 = vld [vmem:[#allocation10] ss:$16 sps:$4 sm:$0xff]  }
 0x3e6   :  { %1753 = vmatprep.mubr.bf16.mxu0 %v1195_v12  ;;  %1793 = vmatprep.mubr.bf16.mxu1 %v1197_v14  ;;  %v8453_v14 = vld [vmem:[#allocation10 + $0x20] ss:$16 sps:$4 sm:$0xff]  }
 0x3e7   :  { %1754 = vmatmul.mubr.bf16.vlgmr.msra.gmra.mrb[8].mxu0 %v1194_v5  ;;  %1794 = vmatmul.mubr.bf16.vlgmr.msra.gmra.mrb[8].mxu1 %v1196_v11  ;;  %v8455_v11 = vld [vmem:[#allocation10 + $0x24] ss:$16 sps:$4 sm:$0xff]  }
 0x3e8   :  { %7824 = vmatpush3.bf16.msra.mxu0 %v8420_v3  ;;  %7846 = vmatpush3.bf16.msra.mxu1 %v8421_v7 }
 0x3e9   :  { %7825 = vmatprep.subr.bf16.mxu0 %v8422_v8  ;;  %7847 = vmatprep.subr.bf16.mxu1 %v8423_v13 }
 0x3ec   :  { %7826 = vmatpush3.bf16.msra.mxu0 %v8424_v15  ;;  %7848 = vmatpush3.bf16.msra.mxu1 %v8425_v16  ;;  %v8458_v15 = vld [vmem:[#allocation10 + $0x44] ss:$16 sps:$4 sm:$0xff]   ;;  %v8456_v16 = vld [vmem:[#allocation10 + $0x40] ss:$16 sps:$4 sm:$0xff]  }
 0x3ed   :  { %7827 = vmatprep.subr.bf16.mxu0 %v8426_v17  ;;  %7849 = vmatprep.subr.bf16.mxu1 %v8427_v18  ;;  %v8461_v17 = vld [vmem:[#allocation10 + $0x64] ss:$16 sps:$4 sm:$0xff]   ;;  %v8459_v18 = vld [vmem:[#allocation10 + $0x60] ss:$16 sps:$4 sm:$0xff]  }
 0x3f0   :  { %7828 = vmatpush3.bf16.msra.mxu0 %v8428_v19  ;;  %7850 = vmatpush3.bf16.msra.mxu1 %v8429_v20  ;;  %v8464_v19 = vld [vmem:[#allocation10 + $0x84] ss:$16 sps:$4 sm:$0xff]   ;;  %v8462_v20 = vld [vmem:[#allocation10 + $0x80] ss:$16 sps:$4 sm:$0xff]  }
 0x3f1   :  { %7829 = vmatprep.subr.bf16.mxu0 %v8430_v21  ;;  %7851 = vmatprep.subr.bf16.mxu1 %v8431_v22  ;;  %v8467_v21 = vld [vmem:[#allocation10 + $0xa4] ss:$16 sps:$4 sm:$0xff]   ;;  %v8465_v22 = vld [vmem:[#allocation10 + $0xa0] ss:$16 sps:$4 sm:$0xff]  }
 0x3f4   :  { %7830 = vmatpush3.bf16.msra.mxu0 %v8432_v9  ;;  %7852 = vmatpush3.bf16.msra.mxu1 %v8433_v23  ;;  %v8470_v9 = vld [vmem:[#allocation10 + $0xc4] ss:$16 sps:$4 sm:$0xff]   ;;  %v8468_v23 = vld [vmem:[#allocation10 + $0xc0] ss:$16 sps:$4 sm:$0xff]  }
 0x3f5   :  { %7831 = vmatprep.subr.bf16.mxu0 %v8434_v24  ;;  %7853 = vmatprep.subr.bf16.mxu1 %v8435_v25  ;;  %v8473_v24 = vld [vmem:[#allocation10 + $0xe4] ss:$16 sps:$4 sm:$0xff]   ;;  %v8471_v25 = vld [vmem:[#allocation10 + $0xe0] ss:$16 sps:$4 sm:$0xff]  }
 0x3f8   :  { %7832 = vmatpush3.bf16.msra.mxu0 %v8436_v26  ;;  %7854 = vmatpush3.bf16.msra.mxu1 %v8437_v27  ;;  %v8474_v26 = vld [vmem:[%s10696_s27] sm:$0xff]  }
 0x3f9   :  { %7833 = vmatprep.subr.bf16.mxu0 %v8438_v28  ;;  %7855 = vmatprep.subr.bf16.mxu1 %v8439_v29  ;;  %v10410_v27 = vld [vmem:[%s10697_s6] sm:$0xf]  ;;  %v9934_v28 = vmov 0.0   ;;  %v8475_v29 = vld [vmem:[%s10696_s27 + $0x8] sm:$0xff]  }
 0x3fc   :  { %7834 = vmatpush3.bf16.msra.mxu0 %v8440_v30  ;;  %7856 = vmatpush3.bf16.msra.mxu1 %v8441_v31  ;;  %v8476_v30 = vld [vmem:[%s10696_s27 + $0x10] sm:$0xff]   ;;  %v8477_v31 = vld [vmem:[%s10696_s27 + $0x18] sm:$0xff]  }
 0x3fd   :  { %7835 = vmatprep.subr.bf16.mxu0 %v8442_v32  ;;  %7857 = vmatprep.subr.bf16.mxu1 %v8443_v33  ;;  %v8478_v32 = vld [vmem:[%s10696_s27 + $0x20] sm:$0xff]   ;;  %v8479_v33 = vld [vmem:[%s10696_s27 + $0x28] sm:$0xff]  }
 0x3fe   :  { %v1138_v48 = vpop.f32.mrb[4].mxu0  ;;  %v1179_v52 = vpop.f32.mrb[4].mxu1 }
 0x3ff   :  { %v1139_v51 = vadd.f32 %v1138_v48, %v681_v35  ;;  %v1140_v53 = vpop.f32.mrb[5].mxu0  ;;  %v1180_v54 = vadd.f32 %v1179_v52, %v689_v38  ;;  %v1181_v56 = vpop.f32.mrb[5].mxu1  ;;  %v8481_v35 = vld [vmem:[%s10696_s27 + $0x38] sm:$0xff]  }
 0x400   :  { %v1141_v55 = vadd.f32 %v1140_v53, %v685_v45  ;;  %v1142_v57 = vpop.f32.mrb[6].mxu0  ;;  %7836 = vmatpush3.bf16.msra.mxu0 %v8444_v34  ;;  %v1182_v60 = vadd.f32 %v1181_v56, %v693_v47  ;;  %v1183_v61 = vpop.f32.mrb[6].mxu1  ;;  %7858 = vmatpush3.bf16.msra.mxu1 %v8445_v36  ;;  %v8480_v34 = vld [vmem:[%s10696_s27 + $0x30] sm:$0xff]   ;;  %v8484_v36 = vld [vmem:[#allocation10 + $0xc] ss:$16 sps:$4 sm:$0xff]  }
 0x401   :  { %v1190_v59 = vmax.f32 %v1139_v51, 0.0  ;;  %v1143_v63 = vpop.f32.mrb[7].mxu0  ;;  %7837 = vmatprep.subr.bf16.mxu0 %v8446_v37  ;;  %v1192_v1 = vmax.f32 %v1180_v54, 0.0  ;;  %v1184_v3 = vpop.f32.mrb[7].mxu1  ;;  %7859 = vmatprep.subr.bf16.mxu1 %v8447_v46  ;;  %v8506_v37 = vld [vmem:[#allocation13] ss:$8 sps:$4 sm:$0xff]  }
 0x402   :  { %v1191_v2 = vmax.f32 %v1141_v55, 0.0  ;;  %v1193_v5 = vmax.f32 %v1182_v60, 0.0  ;;  %v8508_v38 = vld [vmem:[#allocation13 + $0x4] ss:$8 sps:$4 sm:$0xff]   ;;  %v8511_v45 = vld [vmem:[#allocation13 + $0x14] ss:$8 sps:$4 sm:$0xff]  }
 0x403   :  { %v1200_v7 = vpack.c.bf16 %v1192_v1, %v1192_v1  ;;  %v1198_v12 = vpack.c.bf16 %v1190_v59, %v1190_v59  ;;  %v8509_v46 = vld [vmem:[#allocation13 + $0x10] ss:$8 sps:$4 sm:$0xff]   ;;  %v8514_v47 = vld [vmem:[#allocation13 + $0x24] ss:$8 sps:$4 sm:$0xff]   ;;  %v8512_v48 = vld [vmem:[#allocation13 + $0x20] ss:$8 sps:$4 sm:$0xff]  }
 0x404   :  { %v1199_v8 = vpack.c.bf16 %v1191_v2, %v1191_v2  ;;  %7838 = vmatpush3.bf16.msra.mxu0 %v8448_v49  ;;  %v1201_v13 = vpack.c.bf16 %v1193_v5, %v1193_v5  ;;  %7860 = vmatpush3.bf16.msra.mxu1 %v8449_v44  ;;  %v8517_v49 = vld [vmem:[#allocation13 + $0x34] ss:$8 sps:$4 sm:$0xff]   ;;  %v8515_v51 = vld [vmem:[#allocation13 + $0x30] ss:$8 sps:$4 sm:$0xff]   ;;  %v8520_v52 = vld [vmem:[#allocation13 + $0x44] ss:$8 sps:$4 sm:$0xff]  }
 0x405   :  { %2226 = vmatprep.subr.bf16.mxu1 %v8452_v58  ;;  %8102 = vmatprep.subr.bf16.mxu0 %v9934_v28  ;;  %v8518_v53 = vld [vmem:[#allocation13 + $0x40] ss:$8 sps:$4 sm:$0xff]   ;;  %v8523_v54 = vld [vmem:[#allocation13 + $0x54] ss:$8 sps:$4 sm:$0xff]   ;;  %v8521_v55 = vld [vmem:[#allocation13 + $0x50] ss:$8 sps:$4 sm:$0xff]  }
 0x406   :  { %1833 = vmatprep.mubr.bf16.mxu0 %v1199_v8  ;;  %1873 = vmatprep.mubr.bf16.mxu1 %v1201_v13  ;;  %v8526_v56 = vld [vmem:[#allocation13 + $0x64] ss:$8 sps:$4 sm:$0xff]   ;;  %v8524_v57 = vld [vmem:[#allocation13 + $0x60] ss:$8 sps:$4 sm:$0xff]   ;;  %v8529_v58 = vld [vmem:[#allocation13 + $0x74] ss:$8 sps:$4 sm:$0xff]  }
 0x407   :  { %1834 = vmatmul.mubr.bf16.vlgmr.msra.gmra.mrb[12].mxu0 %v1198_v12  ;;  %1874 = vmatmul.mubr.bf16.vlgmr.msra.gmra.mrb[12].mxu1 %v1200_v7  ;;  %v8527_v59 = vld [vmem:[#allocation13 + $0x70] ss:$8 sps:$4 sm:$0xff]   ;;  %v8532_v60 = vld [vmem:[#allocation13 + $0x84] ss:$8 sps:$4 sm:$0xff]   ;;  %v8530_v61 = vld [vmem:[#allocation13 + $0x80] ss:$8 sps:$4 sm:$0xff]  }
 0x408   :  { %2227 = vmatpush1.bf16.msra.mxu1 %v8450_v6  ;;  %2258 = vmatprep.mubr.bf16.mxu1 %v9933_v0  ;;  %v8535_v63 = vld [vmem:[#allocation13 + $0x94] ss:$8 sps:$4 sm:$0xff]   ;;  %v8533_v44 = vld [vmem:[#allocation13 + $0x90] ss:$8 sps:$4 sm:$0xff]   ;;  %v8538_v1 = vld [vmem:[#allocation13 + $0xa4] ss:$8 sps:$4 sm:$0xff]  }
 0x409   :  { %2228 = vmatprep.subr.bf16.mxu1 %v8455_v11  ;;  %8103 = vmatpush3.bf16.msra.mxu0 %v8474_v26  ;;  %v8536_v2 = vld [vmem:[#allocation13 + $0xa0] ss:$8 sps:$4 sm:$0xff]   ;;  %v8541_v3 = vld [vmem:[#allocation13 + $0xb4] ss:$8 sps:$4 sm:$0xff]   ;;  %v8539_v5 = vld [vmem:[#allocation13 + $0xb0] ss:$8 sps:$4 sm:$0xff]  }
 0x40a   :  { %8104 = vmatprep.subr.bf16.mxu0 %v9934_v28  ;;  %8118 = vmatprep.mubr.msk.bf16.mxu0 %vm9935_vm0, %v9934_v28  ;;  %v8544_v6 = vld [vmem:[#allocation13 + $0xc4] ss:$8 sps:$4 sm:$0xff]   ;;  %v8542_v7 = vld [vmem:[#allocation13 + $0xc0] ss:$8 sps:$4 sm:$0xff]   ;;  %v8547_v8 = vld [vmem:[#allocation13 + $0xd4] ss:$8 sps:$4 sm:$0xff]  }
 0x40b   :  { %v8545_v11 = vld [vmem:[#allocation13 + $0xd0] ss:$8 sps:$4 sm:$0xff]   ;;  %v8550_v13 = vld [vmem:[#allocation13 + $0xe4] ss:$8 sps:$4 sm:$0xff]  }
 0x40c   :  { %2229 = vmatpush1.bf16.msra.mxu1 %v8453_v14 }
 0x40d   :  { %2230 = vmatprep.subr.bf16.mxu1 %v8458_v15  ;;  %8105 = vmatpush3.bf16.msra.mxu0 %v8475_v29  ;;  %v7169_v15 = vld [vmem:[#allocation7] ss:$0 sm:$0xff] }
 0x40e   :  { %8106 = vmatprep.subr.bf16.mxu0 %v9934_v28  ;;  %v8551_v29 = vld [vmem:[#allocation13 + $0xf0] ss:$8 sps:$4 sm:$0xff]  }
 0x410   :  { %2231 = vmatpush1.bf16.msra.mxu1 %v8456_v16 }
 0x411   :  { %2232 = vmatprep.subr.bf16.mxu1 %v8461_v17  ;;  %8107 = vmatpush3.bf16.msra.mxu0 %v8476_v30  ;;  %v8556_v30 = vld [vmem:[#allocation13 + $0x104] ss:$8 sps:$4 sm:$0xff]  }
 0x412   :  { %8108 = vmatprep.subr.bf16.mxu0 %v9934_v28 }
 0x414   :  { %2233 = vmatpush1.bf16.msra.mxu1 %v8459_v18 }
 0x415   :  { %2234 = vmatprep.subr.bf16.mxu1 %v8464_v19  ;;  %8109 = vmatpush3.bf16.msra.mxu0 %v8477_v31 }
 0x416   :  { %8110 = vmatprep.subr.bf16.mxu0 %v9934_v28 }
 0x418   :  { %2235 = vmatpush1.bf16.msra.mxu1 %v8462_v20 }
 0x419   :  { %2236 = vmatprep.subr.bf16.mxu1 %v8467_v21  ;;  %8111 = vmatpush3.bf16.msra.mxu0 %v8478_v32 }
 0x41a   :  { %8112 = vmatprep.subr.bf16.mxu0 %v9934_v28 }
 0x41c   :  { %2237 = vmatpush1.bf16.msra.mxu1 %v8465_v22 }
 0x41d   :  { %2238 = vmatprep.subr.bf16.mxu1 %v8470_v9  ;;  %8113 = vmatpush3.bf16.msra.mxu0 %v8479_v33  ;;  %v8548_v9 = vld [vmem:[#allocation13 + $0xe0] ss:$8 sps:$4 sm:$0xff]  }
 0x41e   :  { %8114 = vmatprep.subr.bf16.mxu0 %v9934_v28 }
 0x420   :  { %2239 = vmatpush1.bf16.msra.mxu1 %v8468_v23 }
 0x421   :  { %2240 = vmatprep.subr.bf16.mxu1 %v8473_v24  ;;  %8115 = vmatpush3.bf16.msra.mxu0 %v8480_v34 }
 0x422   :  { %8116 = vmatprep.subr.bf16.mxu0 %v9934_v28 }
 0x424   :  { %2241 = vmatpush1.bf16.msra.mxu1 %v8471_v25  ;;  %v8553_v25 = vld [vmem:[#allocation13 + $0xf4] ss:$8 sps:$4 sm:$0xff]  }
 0x425   :  { %8117 = vmatpush3.bf16.msra.mxu0 %v8481_v35  ;;  %2712 = vmatprep.subr.bf16.mxu1 %v8508_v38 }
 0x426   :  { %2267 = vmatprep.subr.bf16.mxu0 %v8484_v36 }
 0x427   :  { %2259 = vmatmul.mubr.bf16.vlgmr.msra.gmra.mrb[16].mxu1 %v10410_v27 }
 0x428   :  { %2713 = vmatpush1.bf16.msra.mxu1 %v8506_v37 }
 0x429   :  { %2714 = vmatprep.subr.bf16.mxu1 %v8511_v45 }
 0x42c   :  { %2715 = vmatpush1.bf16.msra.mxu1 %v8509_v46 }
 0x42d   :  { %2716 = vmatprep.subr.bf16.mxu1 %v8514_v47 }
 0x430   :  { %2717 = vmatpush1.bf16.msra.mxu1 %v8512_v48 }
 0x431   :  { %2718 = vmatprep.subr.bf16.mxu1 %v8517_v49 }
 0x434   :  { %2719 = vmatpush1.bf16.msra.mxu1 %v8515_v51  ;;  %v8482_v51 = vld [vmem:[#allocation10 + $0x8] ss:$16 sps:$4 sm:$0xff]  }
 0x435   :  { %2720 = vmatprep.subr.bf16.mxu1 %v8520_v52 }
 0x438   :  { %2721 = vmatpush1.bf16.msra.mxu1 %v8518_v53  ;;  %v8487_v53 = vld [vmem:[#allocation10 + $0x2c] ss:$16 sps:$4 sm:$0xff]  }
 0x439   :  { %2722 = vmatprep.subr.bf16.mxu1 %v8523_v54  ;;  %v8485_v54 = vld [vmem:[#allocation10 + $0x28] ss:$16 sps:$4 sm:$0xff]  }
 0x43c   :  { %2723 = vmatpush1.bf16.msra.mxu1 %v8521_v55  ;;  %v8490_v55 = vld [vmem:[#allocation10 + $0x4c] ss:$16 sps:$4 sm:$0xff]  }
 0x43d   :  { %2724 = vmatprep.subr.bf16.mxu1 %v8526_v56  ;;  %v8488_v56 = vld [vmem:[#allocation10 + $0x48] ss:$16 sps:$4 sm:$0xff]  }
 0x440   :  { %2725 = vmatpush1.bf16.msra.mxu1 %v8524_v57  ;;  %v8493_v57 = vld [vmem:[#allocation10 + $0x6c] ss:$16 sps:$4 sm:$0xff]  }
 0x441   :  { %2726 = vmatprep.subr.bf16.mxu1 %v8529_v58  ;;  %v8491_v58 = vld [vmem:[#allocation10 + $0x68] ss:$16 sps:$4 sm:$0xff]  }
 0x444   :  { %2727 = vmatpush1.bf16.msra.mxu1 %v8527_v59  ;;  %v8496_v59 = vld [vmem:[#allocation10 + $0x8c] ss:$16 sps:$4 sm:$0xff]  }
 0x445   :  { %2728 = vmatprep.subr.bf16.mxu1 %v8532_v60  ;;  %v8494_v60 = vld [vmem:[#allocation10 + $0x88] ss:$16 sps:$4 sm:$0xff]  }
 0x448   :  { %2729 = vmatpush1.bf16.msra.mxu1 %v8530_v61  ;;  %v8499_v61 = vld [vmem:[#allocation10 + $0xac] ss:$16 sps:$4 sm:$0xff]  }
 0x449   :  { %2730 = vmatprep.subr.bf16.mxu1 %v8535_v63  ;;  %v8497_v63 = vld [vmem:[#allocation10 + $0xa8] ss:$16 sps:$4 sm:$0xff]  }
 0x44c   :  { %2731 = vmatpush1.bf16.msra.mxu1 %v8533_v44  ;;  %v8502_v44 = vld [vmem:[#allocation10 + $0xcc] ss:$16 sps:$4 sm:$0xff]  }
 0x44d   :  { %2732 = vmatprep.subr.bf16.mxu1 %v8538_v1  ;;  %v8500_v1 = vld [vmem:[#allocation10 + $0xc8] ss:$16 sps:$4 sm:$0xff]  }
 0x450   :  { %2733 = vmatpush1.bf16.msra.mxu1 %v8536_v2  ;;  %v8505_v2 = vld [vmem:[#allocation10 + $0xec] ss:$16 sps:$4 sm:$0xff]  }
 0x451   :  { %2734 = vmatprep.subr.bf16.mxu1 %v8541_v3  ;;  %v8503_v3 = vld [vmem:[#allocation10 + $0xe8] ss:$16 sps:$4 sm:$0xff]  }
 0x454   :  { %2735 = vmatpush1.bf16.msra.mxu1 %v8539_v5  ;;  %v10432_v5 = vld [vmem:[#allocation12] sm:$0xf] }
 0x455   :  { %2736 = vmatprep.subr.bf16.mxu1 %v8544_v6  ;;  %v2049_v6 = vrot.slane %v10432_v5, %v10370_v40 }
 0x458   :  { %2737 = vmatpush1.bf16.msra.mxu1 %v8542_v7  ;;  %v2053_v7 = vrot.slane %v10432_v5, %v10376_v42 }
 0x459   :  { %2738 = vmatprep.subr.bf16.mxu1 %v8547_v8 }
 0x45c   :  { %2739 = vmatpush1.bf16.msra.mxu1 %v8545_v11 }
 0x45d   :  { %2740 = vmatprep.subr.bf16.mxu1 %v8550_v13 }
 0x460   :  { %2741 = vmatpush1.bf16.msra.mxu1 %v8548_v9  ;;  %v8560_v9 = vld [vmem:[#allocation13 + $0x120] ss:$8 sps:$4 sm:$0xff]  }
 0x461   :  { %2742 = vmatprep.subr.bf16.mxu1 %v8553_v25  ;;  %v8568_v25 = vld [vmem:[#allocation13 + $0x144] ss:$8 sps:$4 sm:$0xff]  }
 0x464   :  { %2743 = vmatpush1.bf16.msra.mxu1 %v8551_v29  ;;  %v8571_v29 = vld [vmem:[#allocation13 + $0x154] ss:$8 sps:$4 sm:$0xff]  }
 0x465   :  { %2753 = vmatprep.subr.bf16.mxu1 %v8556_v30  ;;  %v8569_v30 = vld [vmem:[#allocation13 + $0x150] ss:$8 sps:$4 sm:$0xff]  }
 0x4ba   :  { %v7795_v12 = vpop.f32.mrb[8].mxu0  ;;  %v7817_v14 = vpop.f32.mrb[8].mxu1 }
 0x4bb   :  { %v7796_v16 = vpop.f32.mrb[9].mxu0  ;;  %v7818_v18 = vpop.f32.mrb[9].mxu1 }
 0x4bc   :  { %v7797_v17 = vadd.f32 %v7796_v16, %v7795_v12  ;;  %v7798_v19 = vpop.f32.mrb[10].mxu0  ;;  %v7819_v20 = vadd.f32 %v7818_v18, %v7817_v14  ;;  %v7820_v21 = vpop.f32.mrb[10].mxu1 }
 0x4bd   :  { %v7799_v22 = vpop.f32.mrb[11].mxu0  ;;  %v7821_v24 = vpop.f32.mrb[11].mxu1  ;;  %v8557_v21 = vld [vmem:[#allocation13 + $0x110] ss:$8 sps:$4 sm:$0xff]  }
 0x4be   :  { %v1756_v23 = vadd.f32 %v7797_v17, %v7169_v15  ;;  %v8562_v22 = vld [vmem:[#allocation13 + $0x124] ss:$8 sps:$4 sm:$0xff]   ;;  %v8563_v24 = vld [vmem:[#allocation13 + $0x130] ss:$8 sps:$4 sm:$0xff]  }
 0x4c0   :  { %v1796_v26 = vadd.f32 %v7819_v20, %v1756_v23  ;;  %v8554_v20 = vld [vmem:[#allocation13 + $0x100] ss:$8 sps:$4 sm:$0xff]   ;;  %v8565_v23 = vld [vmem:[#allocation13 + $0x134] ss:$8 sps:$4 sm:$0xff]  }
 0x4da   :  { %v7839_v31 = vpop.f32.mrb[12].mxu0  ;;  %v7861_v32 = vpop.f32.mrb[12].mxu1 }
 0x4db   :  { %v7840_v33 = vpop.f32.mrb[13].mxu0  ;;  %v7862_v35 = vpop.f32.mrb[13].mxu1 }
 0x4dc   :  { %v7841_v34 = vadd.f32 %v7840_v33, %v7839_v31  ;;  %v7842_v36 = vpop.f32.mrb[14].mxu0  ;;  %v7863_v37 = vadd.f32 %v7862_v35, %v7861_v32  ;;  %v7864_v38 = vpop.f32.mrb[14].mxu1  ;;  %v8574_v31 = vld [vmem:[#allocation13 + $0x164] ss:$8 sps:$4 sm:$0xff]   ;;  %v8572_v32 = vld [vmem:[#allocation13 + $0x160] ss:$8 sps:$4 sm:$0xff]  }
 0x4dd   :  { %v7843_v45 = vpop.f32.mrb[15].mxu0  ;;  %v7865_v47 = vpop.f32.mrb[15].mxu1  ;;  %v8575_v33 = vld [vmem:[#allocation13 + $0x170] ss:$8 sps:$4 sm:$0xff]   ;;  %v8580_v35 = vld [vmem:[#allocation13 + $0x184] ss:$8 sps:$4 sm:$0xff]  }
 0x4de   :  { %v1836_v46 = vadd.f32 %v7841_v34, %v1796_v26  ;;  %v8566_v26 = vld [vmem:[#allocation13 + $0x140] ss:$8 sps:$4 sm:$0xff]   ;;  %v8577_v34 = vld [vmem:[#allocation13 + $0x174] ss:$8 sps:$4 sm:$0xff]   ;;  %v8581_v38 = vld [vmem:[#allocation13 + $0x190] ss:$8 sps:$4 sm:$0xff]  }
 0x4df   :  { %v8578_v36 = vld [vmem:[#allocation13 + $0x180] ss:$8 sps:$4 sm:$0xff]   ;;  %v8586_v45 = vld [vmem:[#allocation13 + $0x1a4] ss:$8 sps:$4 sm:$0xff]   ;;  %v8589_v47 = vld [vmem:[#allocation13 + $0x1b4] ss:$8 sps:$4 sm:$0xff]  }
 0x4e0   :  { %v1876_v48 = vadd.f32 %v7863_v37, %v1836_v46  ;;  %v8583_v37 = vld [vmem:[#allocation13 + $0x194] ss:$8 sps:$4 sm:$0xff]   ;;  %v8584_v46 = vld [vmem:[#allocation13 + $0x1a0] ss:$8 sps:$4 sm:$0xff]  }
 0x4e2   :  { %v1881_v49 = vmax.f32 %v1876_v48, 0.0  ;;  %v8587_v48 = vld [vmem:[#allocation13 + $0x1b0] ss:$8 sps:$4 sm:$0xff]  }
 0x4e4   :  { %v1882_v52 = vpack.c.bf16 %v1881_v49, %v1881_v49  ;;  %v8592_v49 = vld [vmem:[#allocation13 + $0x1c4] ss:$8 sps:$4 sm:$0xff]  }
 0x4e6   :  { %8119 = vmatmul.mubr.bf16.vlgmr.msra.gmra.mrb[16].mxu0 %v1882_v52  ;;  %v8595_v52 = vld [vmem:[#allocation13 + $0x1d4] ss:$8 sps:$4 sm:$0xff]  }
 0x4e7   :  { %2268 = vmatpush1.bf16.msra.mxu0 %v8482_v51  ;;  %2299 = vmatprep.mubr.bf16.mxu0 %v9933_v0  ;;  %v8590_v51 = vld [vmem:[#allocation13 + $0x1c0] ss:$8 sps:$4 sm:$0xff]  }
 0x4e8   :  { %2269 = vmatprep.subr.bf16.mxu0 %v8487_v53  ;;  %v8593_v53 = vld [vmem:[#allocation13 + $0x1d0] ss:$8 sps:$4 sm:$0xff]  }
 0x4eb   :  { %2270 = vmatpush1.bf16.msra.mxu0 %v8485_v54  ;;  %v8598_v54 = vld [vmem:[#allocation13 + $0x1e4] ss:$8 sps:$4 sm:$0xff]  }
 0x4ec   :  { %2271 = vmatprep.subr.bf16.mxu0 %v8490_v55  ;;  %v8596_v55 = vld [vmem:[#allocation13 + $0x1e0] ss:$8 sps:$4 sm:$0xff]  }
 0x4ef   :  { %2272 = vmatpush1.bf16.msra.mxu0 %v8488_v56  ;;  %v8601_v56 = vld [vmem:[#allocation13 + $0x1f4] ss:$8 sps:$4 sm:$0xff]  }
 0x4f0   :  { %2273 = vmatprep.subr.bf16.mxu0 %v8493_v57  ;;  %v8599_v57 = vld [vmem:[#allocation13 + $0x1f0] ss:$8 sps:$4 sm:$0xff]  }
 0x4f3   :  { %2274 = vmatpush1.bf16.msra.mxu0 %v8491_v58  ;;  %v8602_v58 = vld [vmem:[#allocation16 + $0x40] sm:$0xff]  }
 0x4f4   :  { %2275 = vmatprep.subr.bf16.mxu0 %v8496_v59  ;;  %v8603_v59 = vld [vmem:[#allocation16] sm:$0xff]  }
 0x4f7   :  { %2276 = vmatpush1.bf16.msra.mxu0 %v8494_v60  ;;  %v8604_v60 = vld [vmem:[#allocation16 + $0x48] sm:$0xff]  }
 0x4f8   :  { %2277 = vmatprep.subr.bf16.mxu0 %v8499_v61  ;;  %v8605_v61 = vld [vmem:[#allocation16 + $0x8] sm:$0xff]  }
 0x4fa   :  { %v2260_v8 = vpop.f32.mrb[16].mxu1 }
 0x4fb   :  { %2278 = vmatpush1.bf16.msra.mxu0 %v8497_v63  ;;  %v2261_v11 = vadd.f32 %v2260_v8, %v2049_v6  ;;  %v2262_v12 = vpop.f32.mrb[17].mxu1  ;;  %v8606_v63 = vld [vmem:[#allocation16 + $0x50] sm:$0xff]   ;;  %v8611_v6 = vld [vmem:[#allocation16 + $0x20] sm:$0xff]   ;;  %v8613_v8 = vld [vmem:[#allocation16 + $0x28] sm:$0xff]  }
 0x4fc   :  { %2279 = vmatprep.subr.bf16.mxu0 %v8502_v44  ;;  %v2263_v13 = vadd.f32 %v2262_v12, %v2053_v7  ;;  %v2264_v14 = vpop.f32.mrb[18].mxu1  ;;  %v8607_v44 = vld [vmem:[#allocation16 + $0x10] sm:$0xff]   ;;  %v8612_v7 = vld [vmem:[#allocation16 + $0x68] sm:$0xff]  }
 0x4fd   :  { %v2308_v15 = vmax.f32 %v2261_v11, 0.0  ;;  %v2265_v16 = vpop.f32.mrb[19].mxu1 }
 0x4fe   :  { %v2309_v17 = vmax.f32 %v2263_v13, 0.0  ;;  %v2061_v16 = vrot.slane %v10432_v5, %v10379_v43 }
 0x4ff   :  { %2280 = vmatpush1.bf16.msra.mxu0 %v8500_v1  ;;  %v2312_v18 = vpack.c.bf16 %v2308_v15, %v2308_v15  ;;  %v8608_v1 = vld [vmem:[#allocation16 + $0x58] sm:$0xff]   ;;  %v2057_v15 = vrot.slane %v10432_v5, %v10373_v41 }
 0x500   :  { %2281 = vmatprep.subr.bf16.mxu0 %v8505_v2  ;;  %v2313_v19 = vpack.c.bf16 %v2309_v17, %v2309_v17  ;;  %v8609_v2 = vld [vmem:[#allocation16 + $0x18] sm:$0xff]  }
 0x501   :  { %v8617_v5 = vld [vmem:[#allocation16 + $0x38] sm:$0xff]  }
 0x502   :  { %2744 = vmatprep.mubr.bf16.mxu1 %v2313_v19 }
 0x503   :  { %2282 = vmatpush1.bf16.msra.mxu0 %v8503_v3  ;;  %2745 = vmatmul.mubr.bf16.vlgmr.msra.gmra.mrb[20].mxu1 %v2312_v18  ;;  %v8610_v3 = vld [vmem:[#allocation16 + $0x60] sm:$0xff]  }
 0x504   :  { %2754 = vmatpush1.bf16.msra.mxu1 %v8554_v20  ;;  %7876 = vmatprep.subr.bf16.mxu0 %v8602_v58  ;;  %v8658_v58 = vld [vmem:[#allocation19 + $0x8] ss:$16 sps:$4 sm:$0xff]  }
 0x506   :  { %2300 = vmatmul.mubr.bf16.vlgmr.msra.gmra.mrb[20].mxu0 %v10410_v27  ;;  %v8559_v27 = vld [vmem:[#allocation13 + $0x114] ss:$8 sps:$4 sm:$0xff]  }
 0x507   :  { %2755 = vmatprep.subr.bf16.mxu1 %v8559_v27  ;;  %7877 = vmatpush3.bf16.msra.mxu0 %v8603_v59  ;;  %v8660_v59 = vld [vmem:[#allocation19 + $0xc] ss:$16 sps:$4 sm:$0xff]  }
 0x508   :  { %2756 = vmatpush1.bf16.msra.mxu1 %v8557_v21  ;;  %7878 = vmatprep.subr.bf16.mxu0 %v8604_v60  ;;  %v8663_v60 = vld [vmem:[#allocation19 + $0x2c] ss:$16 sps:$4 sm:$0xff]  }
 0x509   :  { %2757 = vmatprep.subr.bf16.mxu1 %v8562_v22 }
 0x50b   :  { %7879 = vmatpush3.bf16.msra.mxu0 %v8605_v61  ;;  %v8661_v61 = vld [vmem:[#allocation19 + $0x28] ss:$16 sps:$4 sm:$0xff]  }
 0x50c   :  { %2758 = vmatpush1.bf16.msra.mxu1 %v8560_v9  ;;  %7880 = vmatprep.subr.bf16.mxu0 %v8606_v63  ;;  %v8666_v63 = vld [vmem:[#allocation19 + $0x4c] ss:$16 sps:$4 sm:$0xff]  }
 0x50d   :  { %2759 = vmatprep.subr.bf16.mxu1 %v8565_v23 }
 0x50f   :  { %7881 = vmatpush3.bf16.msra.mxu0 %v8607_v44  ;;  %v8664_v44 = vld [vmem:[#allocation19 + $0x48] ss:$16 sps:$4 sm:$0xff]  }
 0x510   :  { %2760 = vmatpush1.bf16.msra.mxu1 %v8563_v24  ;;  %7882 = vmatprep.subr.bf16.mxu0 %v8608_v1  ;;  %v8669_v1 = vld [vmem:[#allocation19 + $0x6c] ss:$16 sps:$4 sm:$0xff]  }
 0x511   :  { %2761 = vmatprep.subr.bf16.mxu1 %v8568_v25  ;;  %v8614_v25 = vld [vmem:[#allocation16 + $0x70] sm:$0xff]  }
 0x513   :  { %7883 = vmatpush3.bf16.msra.mxu0 %v8609_v2  ;;  %v8667_v2 = vld [vmem:[#allocation19 + $0x68] ss:$16 sps:$4 sm:$0xff]  }
 0x514   :  { %2762 = vmatpush1.bf16.msra.mxu1 %v8566_v26  ;;  %7884 = vmatprep.subr.bf16.mxu0 %v8610_v3  ;;  %v8615_v26 = vld [vmem:[#allocation16 + $0x30] sm:$0xff]  }
 0x515   :  { %2763 = vmatprep.subr.bf16.mxu1 %v8571_v29  ;;  %v8616_v29 = vld [vmem:[#allocation16 + $0x78] sm:$0xff]  }
 0x516   :  { %v8672_v3 = vld [vmem:[#allocation19 + $0x8c] ss:$16 sps:$4 sm:$0xff]  }
 0x517   :  { %7885 = vmatpush3.bf16.msra.mxu0 %v8611_v6  ;;  %v8670_v6 = vld [vmem:[#allocation19 + $0x88] ss:$16 sps:$4 sm:$0xff]  }
 0x518   :  { %2764 = vmatpush1.bf16.msra.mxu1 %v8569_v30  ;;  %7886 = vmatprep.subr.bf16.mxu0 %v8612_v7  ;;  %v2380_v30 = vld [vmem:[#allocation15] sm:$0x3] }
 0x519   :  { %2765 = vmatprep.subr.bf16.mxu1 %v8574_v31  ;;  %v2385_v31 = vrot.slane %v2380_v30, %v10370_v40  ;;  %v8675_v7 = vld [vmem:[#allocation19 + $0xac] ss:$16 sps:$4 sm:$0xff]  }
 0x51b   :  { %7887 = vmatpush3.bf16.msra.mxu0 %v8613_v8  ;;  %v8673_v8 = vld [vmem:[#allocation19 + $0xa8] ss:$16 sps:$4 sm:$0xff]  }
 0x51c   :  { %2766 = vmatpush1.bf16.msra.mxu1 %v8572_v32  ;;  %7888 = vmatprep.subr.bf16.mxu0 %v8614_v25  ;;  %v2389_v32 = vrot.slane %v2380_v30, %v10376_v42  ;;  %v8628_v25 = vld [vmem:[#allocation45 + $0x10] sm:$0xff]  }
 0x51d   :  { %2767 = vmatprep.subr.bf16.mxu1 %v8577_v34  ;;  %v8632_v30 = vld [vmem:[#allocation45 + $0x30] sm:$0xff]  }
 0x51f   :  { %7889 = vmatpush3.bf16.msra.mxu0 %v8615_v26  ;;  %v8629_v26 = vld [vmem:[#allocation45 + $0x18] sm:$0xff]  }
 0x520   :  { %2768 = vmatpush1.bf16.msra.mxu1 %v8575_v33  ;;  %7890 = vmatprep.subr.bf16.mxu0 %v8616_v29  ;;  %v8630_v29 = vld [vmem:[#allocation45 + $0x20] sm:$0xff]  }
 0x521   :  { %2769 = vmatprep.subr.bf16.mxu1 %v8580_v35 }
 0x523   :  { %7891 = vmatpush3.bf16.msra.mxu0 %v8617_v5  ;;  %v8631_v5 = vld [vmem:[#allocation45 + $0x28] sm:$0xff]  }
 0x524   :  { %2770 = vmatpush1.bf16.msra.mxu1 %v8578_v36  ;;  %8122 = vmatprep.subr.bf16.mxu0 %v9934_v28 }
 0x525   :  { %2771 = vmatprep.subr.bf16.mxu1 %v8583_v37 }
 0x528   :  { %2772 = vmatpush1.bf16.msra.mxu1 %v8581_v38 }
 0x529   :  { %2773 = vmatprep.subr.bf16.mxu1 %v8586_v45 }
 0x52c   :  { %2774 = vmatpush1.bf16.msra.mxu1 %v8584_v46 }
 0x52d   :  { %2775 = vmatprep.subr.bf16.mxu1 %v8589_v47 }
 0x530   :  { %2776 = vmatpush1.bf16.msra.mxu1 %v8587_v48  ;;  %v8618_v48 = vld [vmem:[#allocation45 + $0x40] sm:$0xff]  }
 0x531   :  { %2777 = vmatprep.subr.bf16.mxu1 %v8592_v49 }
 0x534   :  { %2778 = vmatpush1.bf16.msra.mxu1 %v8590_v51  ;;  %v8619_v51 = vld [vmem:[#allocation45 + $0x48] sm:$0xff]  }
 0x535   :  { %2779 = vmatprep.subr.bf16.mxu1 %v8595_v52  ;;  %v8620_v52 = vld [vmem:[#allocation45 + $0x50] sm:$0xff]  }
 0x538   :  { %2780 = vmatpush1.bf16.msra.mxu1 %v8593_v53  ;;  %v8621_v53 = vld [vmem:[#allocation45 + $0x58] sm:$0xff]  }
 0x539   :  { %2781 = vmatprep.subr.bf16.mxu1 %v8598_v54  ;;  %v8622_v54 = vld [vmem:[#allocation45 + $0x60] sm:$0xff]  }
 0x53c   :  { %2782 = vmatpush1.bf16.msra.mxu1 %v8596_v55  ;;  %v8623_v55 = vld [vmem:[#allocation45 + $0x68] sm:$0xff]  }
 0x53d   :  { %2783 = vmatprep.subr.bf16.mxu1 %v8601_v56  ;;  %v8624_v56 = vld [vmem:[#allocation45 + $0x70] sm:$0xff]  }
 0x540   :  { %2784 = vmatpush1.bf16.msra.mxu1 %v8599_v57  ;;  %v8625_v57 = vld [vmem:[#allocation45 + $0x78] sm:$0xff]  }
 0x541   :  { %3422 = vmatprep.subr.bf16.mxu1 %v8660_v59  ;;  %v8687_v59 = vld [vmem:[#allocation22 + $0x14] ss:$8 sps:$4 sm:$0xff]  }
 0x5b9   :  { %v10438_v11 = vpop.f32.mrb[16].mxu0 }
 0x5ba   :  { %v8120_v12 = vpop.f32.mrb[17].mxu0 }
 0x5bb   :  { %v1991_v13 = vpop.f32.mrb[18].mxu0  ;;  %v8678_v12 = vld [vmem:[#allocation19 + $0xcc] ss:$16 sps:$4 sm:$0xff]  }
 0x5bc   :  { %v8121_v14 = vpop.f32.mrb[19].mxu0  ;;  %v8676_v13 = vld [vmem:[#allocation19 + $0xc8] ss:$16 sps:$4 sm:$0xff]  }
 0x5bd   :  { %v8681_v14 = vld [vmem:[#allocation19 + $0xec] ss:$16 sps:$4 sm:$0xff]  }
 0x5d9   :  { %v2301_v17 = vpop.f32.mrb[20].mxu0 }
 0x5da   :  { %v2302_v18 = vadd.f32 %v2301_v17, %v2057_v15  ;;  %v2303_v19 = vpop.f32.mrb[21].mxu0  ;;  %v8679_v15 = vld [vmem:[#allocation19 + $0xe8] ss:$16 sps:$4 sm:$0xff]  }
 0x5db   :  { %v2304_v20 = vadd.f32 %v2303_v19, %v2061_v16  ;;  %v2305_v27 = vpop.f32.mrb[22].mxu0  ;;  %v10459_v16 = vld [vmem:[%s10698_s28] sm:$0xf] }
 0x5dc   :  { %v2310_v21 = vmax.f32 %v2302_v18, 0.0  ;;  %v2306_v22 = vpop.f32.mrb[23].mxu0  ;;  %v7339_v18 = vld [vmem:[#allocation18] ss:$0 sm:$0xff] }
 0x5dd   :  { %v2311_v9 = vmax.f32 %v2304_v20, 0.0 }
 0x5de   :  { %v2314_v24 = vpack.c.bf16 %v2310_v21, %v2310_v21 }
 0x5df   :  { %v2315_v23 = vpack.c.bf16 %v2311_v9, %v2311_v9  ;;  %v8626_v9 = vld [vmem:[#allocation45] sm:$0xff]  }
 0x5e1   :  { %2785 = vmatprep.mubr.bf16.mxu1 %v2315_v23 }
 0x5e2   :  { %2786 = vmatmul.mubr.bf16.vlgmr.msra.gmra.mrb[20].mxu1 %v2314_v24  ;;  %v8627_v24 = vld [vmem:[#allocation45 + $0x8] sm:$0xff]  }
 0x5e3   :  { %3454 = vmatprep.mubr.bf16.mxu1 %v9933_v0  ;;  %3423 = vmatpush1.bf16.msra.mxu1 %v8658_v58  ;;  %v8684_v58 = vld [vmem:[#allocation22 + $0x4] ss:$8 sps:$4 sm:$0xff]  }
 0x5e4   :  { %3424 = vmatprep.subr.bf16.mxu1 %v8663_v60  ;;  %v8685_v60 = vld [vmem:[#allocation22 + $0x10] ss:$8 sps:$4 sm:$0xff]  }
 0x5e7   :  { %3425 = vmatpush1.bf16.msra.mxu1 %v8661_v61  ;;  %v8690_v61 = vld [vmem:[#allocation22 + $0x24] ss:$8 sps:$4 sm:$0xff]  }
 0x5e8   :  { %3426 = vmatprep.subr.bf16.mxu1 %v8666_v63  ;;  %v8688_v63 = vld [vmem:[#allocation22 + $0x20] ss:$8 sps:$4 sm:$0xff]  }
 0x5eb   :  { %3427 = vmatpush1.bf16.msra.mxu1 %v8664_v44  ;;  %v8693_v44 = vld [vmem:[#allocation22 + $0x34] ss:$8 sps:$4 sm:$0xff]  }
 0x5ec   :  { %3428 = vmatprep.subr.bf16.mxu1 %v8669_v1  ;;  %v8691_v1 = vld [vmem:[#allocation22 + $0x30] ss:$8 sps:$4 sm:$0xff]  }
 0x5ef   :  { %3429 = vmatpush1.bf16.msra.mxu1 %v8667_v2  ;;  %v8696_v2 = vld [vmem:[#allocation22 + $0x44] ss:$8 sps:$4 sm:$0xff]  }
 0x5f0   :  { %3430 = vmatprep.subr.bf16.mxu1 %v8672_v3  ;;  %v8694_v3 = vld [vmem:[#allocation22 + $0x40] ss:$8 sps:$4 sm:$0xff]  }
 0x5f3   :  { %3431 = vmatpush1.bf16.msra.mxu1 %v8670_v6  ;;  %v8699_v6 = vld [vmem:[#allocation22 + $0x54] ss:$8 sps:$4 sm:$0xff]  }
 0x5f4   :  { %3432 = vmatprep.subr.bf16.mxu1 %v8675_v7  ;;  %v8697_v7 = vld [vmem:[#allocation22 + $0x50] ss:$8 sps:$4 sm:$0xff]  }
 0x5f7   :  { %3433 = vmatpush1.bf16.msra.mxu1 %v8673_v8  ;;  %v8702_v8 = vld [vmem:[#allocation22 + $0x64] ss:$8 sps:$4 sm:$0xff]  }
 0x5f8   :  { %3434 = vmatprep.subr.bf16.mxu1 %v8678_v12  ;;  %v8700_v12 = vld [vmem:[#allocation22 + $0x60] ss:$8 sps:$4 sm:$0xff]  }
 0x5fb   :  { %3435 = vmatpush1.bf16.msra.mxu1 %v8676_v13  ;;  %v8705_v13 = vld [vmem:[#allocation22 + $0x74] ss:$8 sps:$4 sm:$0xff]  }
 0x5fc   :  { %3436 = vmatprep.subr.bf16.mxu1 %v8681_v14  ;;  %v8703_v14 = vld [vmem:[#allocation22 + $0x70] ss:$8 sps:$4 sm:$0xff]  }
 0x5ff   :  { %3437 = vmatpush1.bf16.msra.mxu1 %v8679_v15  ;;  %v8708_v15 = vld [vmem:[#allocation22 + $0x84] ss:$8 sps:$4 sm:$0xff]  }
 0x602   :  { %3455 = vmatmul.mubr.bf16.vlgmr.msra.gmra.mrb[24].mxu1 %v10459_v16 }
 0x6b5   :  { %v2787_v33 = vpop.f32.mrb[20].mxu1 }
 0x6b6   :  { %v8282_v34 = vadd.f32 %v2787_v33, %v2385_v31  ;;  %v2789_v35 = vpop.f32.mrb[21].mxu1  ;;  %v7234_v31 = vld [vmem:[#allocation9] ss:$0 sm:$0xff] }
 0x6b7   :  { %v8283_v36 = vadd.f32 %v2789_v35, %v2389_v32  ;;  %v2791_v37 = vpop.f32.mrb[22].mxu1  ;;  %v8633_v32 = vld [vmem:[#allocation45 + $0x38] sm:$0xff]   ;;  %v1989_v33 = vadd.f32 %v7234_v31, %v10438_v11  ;;  %v8634_v35 = vld [vmem:[#allocation19] ss:$16 sps:$4 sm:$0xff]  }
 0x6b8   :  { %v2794_v38 = vmax.f32 %v8282_v34, 0.0  ;;  %v2792_v45 = vpop.f32.mrb[23].mxu1  ;;  %v8636_v34 = vld [vmem:[#allocation19 + $0x4] ss:$16 sps:$4 sm:$0xff]   ;;  %v8643_v11 = vld [vmem:[#allocation19 + $0x60] ss:$16 sps:$4 sm:$0xff]  }
 0x6b9   :  { %v2795_v46 = vmax.f32 %v8283_v36, 0.0  ;;  %v1994_v36 = vpack.c.bf16 %v1989_v33, %v1989_v33  ;;  %v8639_v37 = vld [vmem:[#allocation19 + $0x24] ss:$16 sps:$4 sm:$0xff]  }
 0x6ba   :  { %v2796_v49 = vpack.c.bf16 %v2794_v38, %v2794_v38  ;;  %v8637_v38 = vld [vmem:[#allocation19 + $0x20] ss:$16 sps:$4 sm:$0xff]   ;;  %v8642_v45 = vld [vmem:[#allocation19 + $0x44] ss:$16 sps:$4 sm:$0xff]  }
 0x6bb   :  { %v2797_v47 = vpack.c.bf16 %v2795_v46, %v2795_v46  ;;  %v8640_v46 = vld [vmem:[#allocation19 + $0x40] ss:$16 sps:$4 sm:$0xff]  }
 0x6bd   :  { %2965 = vmatprep.mubr.bf16.mxu0 %v2797_v47  ;;  %v8645_v47 = vld [vmem:[#allocation19 + $0x64] ss:$16 sps:$4 sm:$0xff]  }
 0x6be   :  { %2966 = vmatmul.mubr.bf16.vlgmr.msra.gmra.mrb[24].mxu0 %v2796_v49  ;;  %v8646_v49 = vld [vmem:[#allocation19 + $0x80] ss:$16 sps:$4 sm:$0xff]  }
 0x6bf   :  { %8123 = vmatpush3.bf16.msra.mxu0 %v8618_v48  ;;  %8138 = vmatprep.mubr.msk.bf16.mxu0 %vm9935_vm0, %v9934_v28  ;;  %v8648_v48 = vld [vmem:[#allocation19 + $0x84] ss:$16 sps:$4 sm:$0xff]  }
 0x6c0   :  { %8124 = vmatprep.subr.bf16.mxu0 %v9934_v28 }
 0x6c3   :  { %8125 = vmatpush3.bf16.msra.mxu0 %v8619_v51  ;;  %v8651_v51 = vld [vmem:[#allocation19 + $0xa4] ss:$16 sps:$4 sm:$0xff]  }
 0x6c4   :  { %8126 = vmatprep.subr.bf16.mxu0 %v9934_v28 }
 0x6c7   :  { %8127 = vmatpush3.bf16.msra.mxu0 %v8620_v52  ;;  %v8649_v52 = vld [vmem:[#allocation19 + $0xa0] ss:$16 sps:$4 sm:$0xff]  }
 0x6c8   :  { %8128 = vmatprep.subr.bf16.mxu0 %v9934_v28 }
 0x6cb   :  { %8129 = vmatpush3.bf16.msra.mxu0 %v8621_v53  ;;  %v8654_v53 = vld [vmem:[#allocation19 + $0xc4] ss:$16 sps:$4 sm:$0xff]  }
 0x6cc   :  { %8130 = vmatprep.subr.bf16.mxu0 %v9934_v28 }
 0x6cf   :  { %8131 = vmatpush3.bf16.msra.mxu0 %v8622_v54  ;;  %v8652_v54 = vld [vmem:[#allocation19 + $0xc0] ss:$16 sps:$4 sm:$0xff]  }
 0x6d0   :  { %8132 = vmatprep.subr.bf16.mxu0 %v9934_v28 }
 0x6d3   :  { %8133 = vmatpush3.bf16.msra.mxu0 %v8623_v55  ;;  %v8657_v55 = vld [vmem:[#allocation19 + $0xe4] ss:$16 sps:$4 sm:$0xff]  }
 0x6d4   :  { %8134 = vmatprep.subr.bf16.mxu0 %v9934_v28 }
 0x6d5   :  { %v10474_v31 = vpop.f32.mrb[24].mxu1 }
 0x6d7   :  { %8135 = vmatpush3.bf16.msra.mxu0 %v8624_v56  ;;  %v8655_v56 = vld [vmem:[#allocation19 + $0xe0] ss:$16 sps:$4 sm:$0xff]  }
 0x6d8   :  { %8136 = vmatprep.subr.bf16.mxu0 %v9934_v28 }
 0x6db   :  { %8137 = vmatpush3.bf16.msra.mxu0 %v8625_v57  ;;  %v8682_v57 = vld [vmem:[#allocation22] ss:$8 sps:$4 sm:$0xff]  }
 0x6dc   :  { %8142 = vmatprep.subr.bf16.mxu0 %v9934_v28 }
 0x791   :  { %v7892_v17 = vpop.f32.mrb[24].mxu0 }
 0x792   :  { %v7893_v19 = vpop.f32.mrb[25].mxu0 }
 0x793   :  { %v7894_v20 = vadd.f32 %v7893_v19, %v7892_v17  ;;  %v7895_v27 = vpop.f32.mrb[26].mxu0  ;;  %v8711_v17 = vld [vmem:[#allocation22 + $0x94] ss:$8 sps:$4 sm:$0xff]   ;;  %v8714_v19 = vld [vmem:[#allocation22 + $0xa4] ss:$8 sps:$4 sm:$0xff]  }
 0x794   :  { %v7896_v21 = vpop.f32.mrb[27].mxu0  ;;  %v8717_v27 = vld [vmem:[#allocation22 + $0xb4] ss:$8 sps:$4 sm:$0xff]  }
 0x795   :  { %v2968_v22 = vadd.f32 %v7894_v20, %v7339_v18  ;;  %v8709_v18 = vld [vmem:[#allocation22 + $0x90] ss:$8 sps:$4 sm:$0xff]   ;;  %v8712_v20 = vld [vmem:[#allocation22 + $0xa0] ss:$8 sps:$4 sm:$0xff]  }
 0x796   :  { %v8715_v21 = vld [vmem:[#allocation22 + $0xb0] ss:$8 sps:$4 sm:$0xff]  }
 0x797   :  { %v2973_v23 = vpack.c.bf16 %v2968_v22, %v2968_v22  ;;  %v8720_v22 = vld [vmem:[#allocation22 + $0xc4] ss:$8 sps:$4 sm:$0xff]  }
 0x799   :  { %8139 = vmatmul.mubr.bf16.vlgmr.msra.gmra.mrb[28].mxu0 %v2973_v23  ;;  %v8723_v23 = vld [vmem:[#allocation22 + $0xd4] ss:$8 sps:$4 sm:$0xff]  }
 0x79a   :  { %8143 = vmatpush3.bf16.msra.mxu0 %v8626_v9  ;;  %8158 = vmatprep.mubr.msk.bf16.mxu0 %vm9935_vm0, %v9934_v28  ;;  %v8718_v9 = vld [vmem:[#allocation22 + $0xc0] ss:$8 sps:$4 sm:$0xff]  }
 0x79b   :  { %8144 = vmatprep.subr.bf16.mxu0 %v9934_v28 }
 0x79e   :  { %8145 = vmatpush3.bf16.msra.mxu0 %v8627_v24  ;;  %v8721_v24 = vld [vmem:[#allocation22 + $0xd0] ss:$8 sps:$4 sm:$0xff]  }
 0x79f   :  { %8146 = vmatprep.subr.bf16.mxu0 %v9934_v28 }
 0x7a2   :  { %8147 = vmatpush3.bf16.msra.mxu0 %v8628_v25  ;;  %v8726_v25 = vld [vmem:[#allocation22 + $0xe4] ss:$8 sps:$4 sm:$0xff]  }
 0x7a3   :  { %8148 = vmatprep.subr.bf16.mxu0 %v9934_v28 }
 0x7a6   :  { %8149 = vmatpush3.bf16.msra.mxu0 %v8629_v26  ;;  %v8724_v26 = vld [vmem:[#allocation22 + $0xe0] ss:$8 sps:$4 sm:$0xff]  }
 0x7a7   :  { %8150 = vmatprep.subr.bf16.mxu0 %v9934_v28 }
 0x7aa   :  { %8151 = vmatpush3.bf16.msra.mxu0 %v8630_v29  ;;  %v8729_v29 = vld [vmem:[#allocation22 + $0xf4] ss:$8 sps:$4 sm:$0xff]  }
 0x7ab   :  { %8152 = vmatprep.subr.bf16.mxu0 %v9934_v28 }
 0x7ae   :  { %8153 = vmatpush3.bf16.msra.mxu0 %v8631_v5  ;;  %v8727_v5 = vld [vmem:[#allocation22 + $0xf0] ss:$8 sps:$4 sm:$0xff]  }
 0x7af   :  { %8154 = vmatprep.subr.bf16.mxu0 %v9934_v28 }
 0x7b2   :  { %8155 = vmatpush3.bf16.msra.mxu0 %v8632_v30  ;;  %v8732_v30 = vld [vmem:[#allocation22 + $0x104] ss:$8 sps:$4 sm:$0xff]  }
 0x7b3   :  { %8156 = vmatprep.subr.bf16.mxu0 %v9934_v28 }
 0x7b6   :  { %8157 = vmatpush3.bf16.msra.mxu0 %v8633_v32  ;;  %v3458_v32 = vpop.f32.mrb[25].mxu1 }
 0x7b7   :  { %3381 = vmatprep.subr.bf16.mxu0 %v8636_v34  ;;  %v3460_v33 = vpop.f32.mrb[26].mxu1 }
 0x7b8   :  { %v3461_v34 = vpop.f32.mrb[27].mxu1  ;;  %v8748_v33 = vld [vmem:[#allocation22 + $0x160] ss:$8 sps:$4 sm:$0xff]  }
 0x7b9   :  { %8159 = vmatmul.mubr.bf16.vlgmr.msra.gmra.mrb[32].mxu0 %v1994_v36  ;;  %v8753_v34 = vld [vmem:[#allocation22 + $0x174] ss:$8 sps:$4 sm:$0xff]  }
 0x7ba   :  { %3382 = vmatpush1.bf16.msra.mxu0 %v8634_v35  ;;  %3413 = vmatprep.mubr.bf16.mxu0 %v9933_v0 }
 0x7bb   :  { %3383 = vmatprep.subr.bf16.mxu0 %v8639_v37 }
 0x7be   :  { %3384 = vmatpush1.bf16.msra.mxu0 %v8637_v38 }
 0x7bf   :  { %3385 = vmatprep.subr.bf16.mxu0 %v8642_v45  ;;  %v8778_v45 = vld [vmem:[#allocation25 + $0x40] sm:$0xff]  }
 0x7c0   :  { %7916 = vmatprep.subr.bf16.mxu1 %v8778_v45  ;;  %v8757_v45 = vld [vmem:[#allocation22 + $0x190] ss:$8 sps:$4 sm:$0xff]  }
 0x7c2   :  { %3386 = vmatpush1.bf16.msra.mxu0 %v8640_v46  ;;  %v8779_v46 = vld [vmem:[#allocation25] sm:$0xff]  }
 0x7c3   :  { %3387 = vmatprep.subr.bf16.mxu0 %v8645_v47  ;;  %v8780_v47 = vld [vmem:[#allocation25 + $0x48] sm:$0xff]   ;;  %7917 = vmatpush3.bf16.msra.mxu1 %v8779_v46 }
 0x7c4   :  { %7918 = vmatprep.subr.bf16.mxu1 %v8780_v47  ;;  %v8762_v46 = vld [vmem:[#allocation22 + $0x1a4] ss:$8 sps:$4 sm:$0xff]   ;;  %v8760_v47 = vld [vmem:[#allocation22 + $0x1a0] ss:$8 sps:$4 sm:$0xff]  }
 0x7c6   :  { %3388 = vmatpush1.bf16.msra.mxu0 %v8643_v11  ;;  %v8781_v11 = vld [vmem:[#allocation25 + $0x8] sm:$0xff]  }
 0x7c7   :  { %3389 = vmatprep.subr.bf16.mxu0 %v8648_v48  ;;  %v8782_v48 = vld [vmem:[#allocation25 + $0x50] sm:$0xff]   ;;  %7919 = vmatpush3.bf16.msra.mxu1 %v8781_v11 }
 0x7c8   :  { %7920 = vmatprep.subr.bf16.mxu1 %v8782_v48  ;;  %v8765_v11 = vld [vmem:[#allocation22 + $0x1b4] ss:$8 sps:$4 sm:$0xff]   ;;  %v8763_v48 = vld [vmem:[#allocation22 + $0x1b0] ss:$8 sps:$4 sm:$0xff]  }
 0x7ca   :  { %3390 = vmatpush1.bf16.msra.mxu0 %v8646_v49  ;;  %v8783_v49 = vld [vmem:[#allocation25 + $0x10] sm:$0xff]  }
 0x7cb   :  { %3391 = vmatprep.subr.bf16.mxu0 %v8651_v51  ;;  %v8784_v51 = vld [vmem:[#allocation25 + $0x58] sm:$0xff]   ;;  %7921 = vmatpush3.bf16.msra.mxu1 %v8783_v49  ;;  %v8768_v49 = vld [vmem:[#allocation22 + $0x1c4] ss:$8 sps:$4 sm:$0xff]  }
 0x7cc   :  { %7922 = vmatprep.subr.bf16.mxu1 %v8784_v51  ;;  %v8766_v51 = vld [vmem:[#allocation22 + $0x1c0] ss:$8 sps:$4 sm:$0xff]  }
 0x7ce   :  { %3392 = vmatpush1.bf16.msra.mxu0 %v8649_v52  ;;  %v8785_v52 = vld [vmem:[#allocation25 + $0x18] sm:$0xff]  }
 0x7cf   :  { %3393 = vmatprep.subr.bf16.mxu0 %v8654_v53  ;;  %v8786_v53 = vld [vmem:[#allocation25 + $0x60] sm:$0xff]   ;;  %7923 = vmatpush3.bf16.msra.mxu1 %v8785_v52  ;;  %v8771_v52 = vld [vmem:[#allocation22 + $0x1d4] ss:$8 sps:$4 sm:$0xff]  }
 0x7d0   :  { %7924 = vmatprep.subr.bf16.mxu1 %v8786_v53  ;;  %v8769_v53 = vld [vmem:[#allocation22 + $0x1d0] ss:$8 sps:$4 sm:$0xff]  }
 0x7d2   :  { %3394 = vmatpush1.bf16.msra.mxu0 %v8652_v54  ;;  %v8787_v54 = vld [vmem:[#allocation25 + $0x20] sm:$0xff]  }
 0x7d3   :  { %3395 = vmatprep.subr.bf16.mxu0 %v8657_v55  ;;  %v8788_v55 = vld [vmem:[#allocation25 + $0x68] sm:$0xff]   ;;  %7925 = vmatpush3.bf16.msra.mxu1 %v8787_v54 }
 0x7d4   :  { %7926 = vmatprep.subr.bf16.mxu1 %v8788_v55  ;;  %v8774_v55 = vld [vmem:[#allocation22 + $0x1e4] ss:$8 sps:$4 sm:$0xff]  }
 0x7d6   :  { %3396 = vmatpush1.bf16.msra.mxu0 %v8655_v56  ;;  %v8789_v56 = vld [vmem:[#allocation25 + $0x28] sm:$0xff]  }
 0x7d7   :  { %3867 = vmatprep.subr.bf16.mxu0 %v8684_v58  ;;  %7927 = vmatpush3.bf16.msra.mxu1 %v8789_v56  ;;  %v8772_v56 = vld [vmem:[#allocation22 + $0x1e0] ss:$8 sps:$4 sm:$0xff]  }
 0x7d9   :  { %3414 = vmatmul.mubr.bf16.vlgmr.msra.gmra.mrb[36].mxu0 %v10459_v16  ;;  %v8706_v16 = vld [vmem:[#allocation22 + $0x80] ss:$8 sps:$4 sm:$0xff]  }
 0x7da   :  { %3868 = vmatpush1.bf16.msra.mxu0 %v8682_v57 }
 0x7db   :  { %3869 = vmatprep.subr.bf16.mxu0 %v8687_v59 }
 0x7de   :  { %3870 = vmatpush1.bf16.msra.mxu0 %v8685_v60 }
 0x7df   :  { %3871 = vmatprep.subr.bf16.mxu0 %v8690_v61 }
 0x7e2   :  { %3872 = vmatpush1.bf16.msra.mxu0 %v8688_v63  ;;  %v10478_v63 = vld [vmem:[#allocation21] sm:$0xf] }
 0x7e3   :  { %3873 = vmatprep.subr.bf16.mxu0 %v8693_v44  ;;  %v3216_v44 = vrot.slane %v10478_v63, %v10379_v43  ;;  %v3212_v54 = vrot.slane %v10478_v63, %v10373_v41 }
 0x7e6   :  { %3874 = vmatpush1.bf16.msra.mxu0 %v8691_v1  ;;  %v3204_v1 = vrot.slane %v10478_v63, %v10370_v40 }
 0x7e7   :  { %3875 = vmatprep.subr.bf16.mxu0 %v8696_v2  ;;  %v3208_v2 = vrot.slane %v10478_v63, %v10376_v42  ;;  %v8792_v63 = vld [vmem:[#allocation25 + $0x78] sm:$0xff]  }
 0x7ea   :  { %3876 = vmatpush1.bf16.msra.mxu0 %v8694_v3  ;;  %v3459_v3 = vadd.f32 %v3458_v32, %v3216_v44  ;;  %v8750_v32 = vld [vmem:[#allocation22 + $0x164] ss:$8 sps:$4 sm:$0xff]  }
 0x7eb   :  { %3877 = vmatprep.subr.bf16.mxu0 %v8699_v6 }
 0x7ee   :  { %3878 = vmatpush1.bf16.msra.mxu0 %v8697_v7 }
 0x7ef   :  { %3879 = vmatprep.subr.bf16.mxu0 %v8702_v8 }
 0x7f2   :  { %3880 = vmatpush1.bf16.msra.mxu0 %v8700_v12 }
 0x7f3   :  { %3881 = vmatprep.subr.bf16.mxu0 %v8705_v13 }
 0x7f6   :  { %3882 = vmatpush1.bf16.msra.mxu0 %v8703_v14  ;;  %v3466_v14 = vmax.f32 %v3459_v3, 0.0  ;;  %v8793_v3 = vld [vmem:[#allocation25 + $0x38] sm:$0xff]  }
 0x7f7   :  { %3883 = vmatprep.subr.bf16.mxu0 %v8708_v15 }
 0x7fa   :  { %3884 = vmatpush1.bf16.msra.mxu0 %v8706_v16 }
 0x7fb   :  { %3885 = vmatprep.subr.bf16.mxu0 %v8711_v17 }
 0x7fe   :  { %3886 = vmatpush1.bf16.msra.mxu0 %v8709_v18 }
 0x7ff   :  { %3887 = vmatprep.subr.bf16.mxu0 %v8714_v19  ;;  %v8730_v19 = vld [vmem:[#allocation22 + $0x100] ss:$8 sps:$4 sm:$0xff]  }
 0x802   :  { %3888 = vmatpush1.bf16.msra.mxu0 %v8712_v20  ;;  %v3470_v20 = vpack.c.bf16 %v3466_v14, %v3466_v14 }
 0x803   :  { %3889 = vmatprep.subr.bf16.mxu0 %v8717_v27 }
 0x806   :  { %3890 = vmatpush1.bf16.msra.mxu0 %v8715_v21  ;;  %v8735_v21 = vld [vmem:[#allocation22 + $0x114] ss:$8 sps:$4 sm:$0xff]  }
 0x807   :  { %3891 = vmatprep.subr.bf16.mxu0 %v8720_v22  ;;  %v8733_v22 = vld [vmem:[#allocation22 + $0x110] ss:$8 sps:$4 sm:$0xff]  }
 0x80a   :  { %3892 = vmatpush1.bf16.msra.mxu0 %v8718_v9  ;;  %v8738_v9 = vld [vmem:[#allocation22 + $0x124] ss:$8 sps:$4 sm:$0xff]  }
 0x80b   :  { %3893 = vmatprep.subr.bf16.mxu0 %v8723_v23  ;;  %v8736_v23 = vld [vmem:[#allocation22 + $0x120] ss:$8 sps:$4 sm:$0xff]  }
 0x80e   :  { %3894 = vmatpush1.bf16.msra.mxu0 %v8721_v24  ;;  %v8741_v24 = vld [vmem:[#allocation22 + $0x134] ss:$8 sps:$4 sm:$0xff]  }
 0x80f   :  { %3895 = vmatprep.subr.bf16.mxu0 %v8726_v25  ;;  %v8739_v25 = vld [vmem:[#allocation22 + $0x130] ss:$8 sps:$4 sm:$0xff]  }
 0x812   :  { %3896 = vmatpush1.bf16.msra.mxu0 %v8724_v26  ;;  %v8744_v26 = vld [vmem:[#allocation22 + $0x144] ss:$8 sps:$4 sm:$0xff]  }
 0x813   :  { %3897 = vmatprep.subr.bf16.mxu0 %v8729_v29  ;;  %v8742_v29 = vld [vmem:[#allocation22 + $0x140] ss:$8 sps:$4 sm:$0xff]  }
 0x816   :  { %3898 = vmatpush1.bf16.msra.mxu0 %v8727_v5  ;;  %v8747_v5 = vld [vmem:[#allocation22 + $0x154] ss:$8 sps:$4 sm:$0xff]  }
 0x817   :  { %3908 = vmatprep.subr.bf16.mxu0 %v8732_v30  ;;  %v8745_v30 = vld [vmem:[#allocation22 + $0x150] ss:$8 sps:$4 sm:$0xff]  }
 0x86c   :  { %v3072_v35 = vpop.f32.mrb[28].mxu0 }
 0x86d   :  { %v8140_v36 = vpop.f32.mrb[29].mxu0 }
 0x86e   :  { %v3075_v37 = vpop.f32.mrb[30].mxu0  ;;  %v8756_v36 = vld [vmem:[#allocation22 + $0x184] ss:$8 sps:$4 sm:$0xff]  }
 0x86f   :  { %v8141_v38 = vpop.f32.mrb[31].mxu0  ;;  %v8754_v37 = vld [vmem:[#allocation22 + $0x180] ss:$8 sps:$4 sm:$0xff]  }
 0x870   :  { %v8759_v38 = vld [vmem:[#allocation22 + $0x194] ss:$8 sps:$4 sm:$0xff]  }
 0x88c   :  { %v3160_v57 = vpop.f32.mrb[32].mxu0 }
 0x88d   :  { %v10476_v58 = vadd.f32 %v3160_v57, %v3072_v35  ;;  %v8160_v59 = vpop.f32.mrb[33].mxu0  ;;  %v8751_v35 = vld [vmem:[#allocation22 + $0x170] ss:$8 sps:$4 sm:$0xff]   ;;  %v3457_v57 = vadd.f32 %v10474_v31, %v3212_v54  ;;  %v3535_v31 = vld [vmem:[#allocation24] sm:$0x3] }
 0x88e   :  { %v3163_v60 = vpop.f32.mrb[34].mxu0  ;;  %v8777_v59 = vld [vmem:[#allocation22 + $0x1f4] ss:$8 sps:$4 sm:$0xff]  }
 0x88f   :  { %v8161_v61 = vpop.f32.mrb[35].mxu0  ;;  %v8775_v60 = vld [vmem:[#allocation22 + $0x1f0] ss:$8 sps:$4 sm:$0xff]  }
 0x890   :  { %v3465_v61 = vmax.f32 %v3457_v57, 0.0  ;;  %v8802_v57 = vld [vmem:[#allocation28] ss:$16 sps:$4 sm:$0xff]  }
 0x892   :  { %v3469_v44 = vpack.c.bf16 %v3465_v61, %v3465_v61  ;;  %v8805_v61 = vld [vmem:[#allocation28 + $0x20] ss:$16 sps:$4 sm:$0xff]  }
 0x8ac   :  { %v3415_v6 = vpop.f32.mrb[36].mxu0 }
 0x8ad   :  { %v3416_v7 = vadd.f32 %v3415_v6, %v3204_v1  ;;  %v3417_v8 = vpop.f32.mrb[37].mxu0  ;;  %v8790_v1 = vld [vmem:[#allocation25 + $0x70] sm:$0xff]   ;;  %v3540_v6 = vrot.slane %v3535_v31, %v10370_v40 }
 0x8ae   :  { %v3418_v12 = vadd.f32 %v3417_v8, %v3208_v2  ;;  %v3419_v13 = vpop.f32.mrb[38].mxu0  ;;  %v8791_v2 = vld [vmem:[#allocation25 + $0x30] sm:$0xff]   ;;  %7928 = vmatprep.subr.bf16.mxu1 %v8790_v1 }
 0x8af   :  { %v3463_v15 = vmax.f32 %v3416_v7, 0.0  ;;  %v3420_v16 = vpop.f32.mrb[39].mxu0  ;;  %7929 = vmatpush3.bf16.msra.mxu1 %v8791_v2  ;;  %v3544_v7 = vrot.slane %v3535_v31, %v10376_v42  ;;  %v8808_v1 = vld [vmem:[#allocation28 + $0x40] ss:$16 sps:$4 sm:$0xff]   ;;  %v8813_v2 = vld [vmem:[#allocation28 + $0x64] ss:$16 sps:$4 sm:$0xff]  }
 0x8b0   :  { %v3464_v17 = vmax.f32 %v3418_v12, 0.0  ;;  %7930 = vmatprep.subr.bf16.mxu1 %v8792_v63  ;;  %v8811_v63 = vld [vmem:[#allocation28 + $0x60] ss:$16 sps:$4 sm:$0xff]  }
 0x8b1   :  { %v3467_v27 = vpack.c.bf16 %v3463_v15, %v3463_v15  ;;  %v8814_v31 = vld [vmem:[#allocation28 + $0x80] ss:$16 sps:$4 sm:$0xff]  }
 0x8b2   :  { %v3468_v18 = vpack.c.bf16 %v3464_v17, %v3464_v17 }
 0x8b3   :  { %7931 = vmatpush3.bf16.msra.mxu1 %v8793_v3  ;;  %v8816_v3 = vld [vmem:[#allocation28 + $0x84] ss:$16 sps:$4 sm:$0xff]  }
 0x8b4   :  { %3899 = vmatprep.mubr.bf16.mxu0 %v3468_v18  ;;  %8162 = vmatprep.subr.bf16.mxu1 %v9934_v28 }
 0x8b5   :  { %3900 = vmatmul.mubr.bf16.vlgmr.msra.gmra.mrb[40].mxu0 %v3467_v27 }
 0x8b6   :  { %3909 = vmatpush1.bf16.msra.mxu0 %v8730_v19  ;;  %3940 = vmatprep.mubr.bf16.mxu0 %v3470_v20  ;;  %v8794_v20 = vld [vmem:[#allocation45 + $0x80] sm:$0xff]  }
 0x8b7   :  { %3910 = vmatprep.subr.bf16.mxu0 %v8735_v21  ;;  %v8795_v21 = vld [vmem:[#allocation45 + $0x88] sm:$0xff]  }
 0x8ba   :  { %3911 = vmatpush1.bf16.msra.mxu0 %v8733_v22  ;;  %v8796_v22 = vld [vmem:[#allocation45 + $0x90] sm:$0xff]  }
 0x8bb   :  { %3912 = vmatprep.subr.bf16.mxu0 %v8738_v9  ;;  %v8797_v9 = vld [vmem:[#allocation45 + $0x98] sm:$0xff]  }
 0x8be   :  { %3913 = vmatpush1.bf16.msra.mxu0 %v8736_v23  ;;  %v8798_v23 = vld [vmem:[#allocation45 + $0xa0] sm:$0xff]  }
 0x8bf   :  { %3914 = vmatprep.subr.bf16.mxu0 %v8741_v24  ;;  %v8799_v24 = vld [vmem:[#allocation45 + $0xa8] sm:$0xff]  }
 0x8c2   :  { %3915 = vmatpush1.bf16.msra.mxu0 %v8739_v25  ;;  %v8800_v25 = vld [vmem:[#allocation45 + $0xb0] sm:$0xff]  }
 0x8c3   :  { %3916 = vmatprep.subr.bf16.mxu0 %v8744_v26  ;;  %v8801_v26 = vld [vmem:[#allocation45 + $0xb8] sm:$0xff]  }
 0x8c6   :  { %3917 = vmatpush1.bf16.msra.mxu0 %v8742_v29  ;;  %v8804_v29 = vld [vmem:[#allocation28 + $0x4] ss:$16 sps:$4 sm:$0xff]  }
 0x8c7   :  { %3918 = vmatprep.subr.bf16.mxu0 %v8747_v5  ;;  %v8850_v5 = vld [vmem:[#allocation31] ss:$8 sps:$4 sm:$0xff]  }
 0x8ca   :  { %3919 = vmatpush1.bf16.msra.mxu0 %v8745_v30  ;;  %v8852_v30 = vld [vmem:[#allocation31 + $0x4] ss:$8 sps:$4 sm:$0xff]  }
 0x8cb   :  { %3920 = vmatprep.subr.bf16.mxu0 %v8750_v32  ;;  %v8855_v32 = vld [vmem:[#allocation31 + $0x14] ss:$8 sps:$4 sm:$0xff]  }
 0x8ce   :  { %3921 = vmatpush1.bf16.msra.mxu0 %v8748_v33  ;;  %v8853_v33 = vld [vmem:[#allocation31 + $0x10] ss:$8 sps:$4 sm:$0xff]  }
 0x8cf   :  { %3922 = vmatprep.subr.bf16.mxu0 %v8753_v34  ;;  %v8858_v34 = vld [vmem:[#allocation31 + $0x24] ss:$8 sps:$4 sm:$0xff]  }
 0x8d2   :  { %3923 = vmatpush1.bf16.msra.mxu0 %v8751_v35  ;;  %v8856_v35 = vld [vmem:[#allocation31 + $0x20] ss:$8 sps:$4 sm:$0xff]  }
 0x8d3   :  { %3924 = vmatprep.subr.bf16.mxu0 %v8756_v36  ;;  %v8861_v36 = vld [vmem:[#allocation31 + $0x34] ss:$8 sps:$4 sm:$0xff]  }
 0x8d6   :  { %3925 = vmatpush1.bf16.msra.mxu0 %v8754_v37  ;;  %v8859_v37 = vld [vmem:[#allocation31 + $0x30] ss:$8 sps:$4 sm:$0xff]  }
 0x8d7   :  { %3926 = vmatprep.subr.bf16.mxu0 %v8759_v38  ;;  %v8864_v38 = vld [vmem:[#allocation31 + $0x44] ss:$8 sps:$4 sm:$0xff]  }
 0x8da   :  { %3927 = vmatpush1.bf16.msra.mxu0 %v8757_v45  ;;  %v8862_v45 = vld [vmem:[#allocation31 + $0x40] ss:$8 sps:$4 sm:$0xff]  }
 0x8db   :  { %3928 = vmatprep.subr.bf16.mxu0 %v8762_v46  ;;  %v8867_v46 = vld [vmem:[#allocation31 + $0x54] ss:$8 sps:$4 sm:$0xff]  }
 0x8de   :  { %3929 = vmatpush1.bf16.msra.mxu0 %v8760_v47  ;;  %v8865_v47 = vld [vmem:[#allocation31 + $0x50] ss:$8 sps:$4 sm:$0xff]  }
 0x8df   :  { %3930 = vmatprep.subr.bf16.mxu0 %v8765_v11  ;;  %v8870_v11 = vld [vmem:[#allocation31 + $0x64] ss:$8 sps:$4 sm:$0xff]  }
 0x8e2   :  { %3931 = vmatpush1.bf16.msra.mxu0 %v8763_v48  ;;  %v8868_v48 = vld [vmem:[#allocation31 + $0x60] ss:$8 sps:$4 sm:$0xff]  }
 0x8e3   :  { %3932 = vmatprep.subr.bf16.mxu0 %v8768_v49 }
 0x8e6   :  { %3933 = vmatpush1.bf16.msra.mxu0 %v8766_v51  ;;  %v7468_v51 = vld [vmem:[#allocation27] ss:$0 sm:$0xff] }
 0x8e7   :  { %3934 = vmatprep.subr.bf16.mxu0 %v8771_v52 }
 0x8ea   :  { %3935 = vmatpush1.bf16.msra.mxu0 %v8769_v53 }
 0x8eb   :  { %3936 = vmatprep.subr.bf16.mxu0 %v8774_v55 }
 0x8ee   :  { %3937 = vmatpush1.bf16.msra.mxu0 %v8772_v56 }
 0x8ef   :  { %3938 = vmatprep.subr.bf16.mxu0 %v8777_v59 }
 0x8f2   :  { %3939 = vmatpush1.bf16.msra.mxu0 %v8775_v60  ;;  %v8807_v60 = vld [vmem:[#allocation28 + $0x24] ss:$16 sps:$4 sm:$0xff]  }
 0x8f3   :  { %4935 = vmatprep.subr.bf16.mxu0 %v8852_v30  ;;  %v8847_v30 = vld [vmem:[#allocation28 + $0xe8] ss:$16 sps:$4 sm:$0xff]  }
 0x8f5   :  { %3941 = vmatmul.mubr.bf16.vlgmr.msra.gmra.mrb[40].mxu0 %v3469_v44  ;;  %v8810_v44 = vld [vmem:[#allocation28 + $0x44] ss:$16 sps:$4 sm:$0xff]  }
 0x8f6   :  { %4936 = vmatpush1.bf16.msra.mxu0 %v8850_v5  ;;  %v8849_v5 = vld [vmem:[#allocation28 + $0xec] ss:$16 sps:$4 sm:$0xff]  }
 0x8f7   :  { %4937 = vmatprep.subr.bf16.mxu0 %v8855_v32  ;;  %v8873_v32 = vld [vmem:[#allocation31 + $0x74] ss:$8 sps:$4 sm:$0xff]  }
 0x8fa   :  { %4938 = vmatpush1.bf16.msra.mxu0 %v8853_v33  ;;  %v8871_v33 = vld [vmem:[#allocation31 + $0x70] ss:$8 sps:$4 sm:$0xff]  }
 0x8fb   :  { %4939 = vmatprep.subr.bf16.mxu0 %v8858_v34  ;;  %v8876_v34 = vld [vmem:[#allocation31 + $0x84] ss:$8 sps:$4 sm:$0xff]  }
 0x8fe   :  { %4940 = vmatpush1.bf16.msra.mxu0 %v8856_v35  ;;  %v8874_v35 = vld [vmem:[#allocation31 + $0x80] ss:$8 sps:$4 sm:$0xff]  }
 0x8ff   :  { %4941 = vmatprep.subr.bf16.mxu0 %v8861_v36  ;;  %v8879_v36 = vld [vmem:[#allocation31 + $0x94] ss:$8 sps:$4 sm:$0xff]  }
 0x902   :  { %4942 = vmatpush1.bf16.msra.mxu0 %v8859_v37  ;;  %v8877_v37 = vld [vmem:[#allocation31 + $0x90] ss:$8 sps:$4 sm:$0xff]  }
 0x903   :  { %4943 = vmatprep.subr.bf16.mxu0 %v8864_v38  ;;  %v8882_v38 = vld [vmem:[#allocation31 + $0xa4] ss:$8 sps:$4 sm:$0xff]  }
 0x906   :  { %4944 = vmatpush1.bf16.msra.mxu0 %v8862_v45  ;;  %v8880_v45 = vld [vmem:[#allocation31 + $0xa0] ss:$8 sps:$4 sm:$0xff]  }
 0x907   :  { %4945 = vmatprep.subr.bf16.mxu0 %v8867_v46  ;;  %v8885_v46 = vld [vmem:[#allocation31 + $0xb4] ss:$8 sps:$4 sm:$0xff]  }
 0x90a   :  { %4946 = vmatpush1.bf16.msra.mxu0 %v8865_v47  ;;  %v8883_v47 = vld [vmem:[#allocation31 + $0xb0] ss:$8 sps:$4 sm:$0xff]  }
 0x90b   :  { %4947 = vmatprep.subr.bf16.mxu0 %v8870_v11  ;;  %v8888_v11 = vld [vmem:[#allocation31 + $0xc4] ss:$8 sps:$4 sm:$0xff]  }
 0x90e   :  { %4948 = vmatpush1.bf16.msra.mxu0 %v8868_v48  ;;  %v8886_v48 = vld [vmem:[#allocation31 + $0xc0] ss:$8 sps:$4 sm:$0xff]  }
 0x90f   :  { %4949 = vmatprep.subr.bf16.mxu0 %v8873_v32  ;;  %v8904_v32 = vld [vmem:[#allocation31 + $0x120] ss:$8 sps:$4 sm:$0xff]  }
 0x912   :  { %4950 = vmatpush1.bf16.msra.mxu0 %v8871_v33  ;;  %v8909_v33 = vld [vmem:[#allocation31 + $0x134] ss:$8 sps:$4 sm:$0xff]  }
 0x913   :  { %4951 = vmatprep.subr.bf16.mxu0 %v8876_v34  ;;  %v8907_v34 = vld [vmem:[#allocation31 + $0x130] ss:$8 sps:$4 sm:$0xff]  }
 0x916   :  { %4952 = vmatpush1.bf16.msra.mxu0 %v8874_v35  ;;  %v8912_v35 = vld [vmem:[#allocation31 + $0x144] ss:$8 sps:$4 sm:$0xff]  }
 0x917   :  { %4953 = vmatprep.subr.bf16.mxu0 %v8879_v36  ;;  %v8910_v36 = vld [vmem:[#allocation31 + $0x140] ss:$8 sps:$4 sm:$0xff]  }
 0x91a   :  { %4954 = vmatpush1.bf16.msra.mxu0 %v8877_v37  ;;  %v8915_v37 = vld [vmem:[#allocation31 + $0x154] ss:$8 sps:$4 sm:$0xff]  }
 0x91b   :  { %4955 = vmatprep.subr.bf16.mxu0 %v8882_v38  ;;  %v8913_v38 = vld [vmem:[#allocation31 + $0x150] ss:$8 sps:$4 sm:$0xff]  }
 0x91e   :  { %4956 = vmatpush1.bf16.msra.mxu0 %v8880_v45  ;;  %v8918_v45 = vld [vmem:[#allocation31 + $0x164] ss:$8 sps:$4 sm:$0xff]  }
 0x91f   :  { %4957 = vmatprep.subr.bf16.mxu0 %v8885_v46  ;;  %v8916_v46 = vld [vmem:[#allocation31 + $0x160] ss:$8 sps:$4 sm:$0xff]  }
 0x922   :  { %4958 = vmatpush1.bf16.msra.mxu0 %v8883_v47 }
 0x923   :  { %4959 = vmatprep.subr.bf16.mxu0 %v8888_v11  ;;  %v8921_v11 = vld [vmem:[#allocation31 + $0x174] ss:$8 sps:$4 sm:$0xff]  }
 0x926   :  { %4960 = vmatpush1.bf16.msra.mxu0 %v8886_v48 }
 0x9c8   :  { %v3942_v8 = vpop.f32.mrb[40].mxu0 }
 0x9c9   :  { %v8284_v12 = vadd.f32 %v3942_v8, %v3540_v6  ;;  %v3944_v13 = vpop.f32.mrb[41].mxu0  ;;  %v8819_v6 = vld [vmem:[#allocation28 + $0xa4] ss:$16 sps:$4 sm:$0xff]  }
 0x9ca   :  { %v8285_v14 = vadd.f32 %v3944_v13, %v3544_v7  ;;  %v3946_v15 = vpop.f32.mrb[42].mxu0  ;;  %v8817_v7 = vld [vmem:[#allocation28 + $0xa0] ss:$16 sps:$4 sm:$0xff]   ;;  %v8822_v8 = vld [vmem:[#allocation28 + $0xc4] ss:$16 sps:$4 sm:$0xff]  }
 0x9cb   :  { %v3949_v16 = vmax.f32 %v8284_v12, 0.0  ;;  %v3947_v17 = vpop.f32.mrb[43].mxu0  ;;  %v8820_v12 = vld [vmem:[#allocation28 + $0xc0] ss:$16 sps:$4 sm:$0xff]   ;;  %v8825_v13 = vld [vmem:[#allocation28 + $0xe4] ss:$16 sps:$4 sm:$0xff]  }
 0x9cc   :  { %v3950_v18 = vmax.f32 %v8285_v14, 0.0  ;;  %v8823_v14 = vld [vmem:[#allocation28 + $0xe0] ss:$16 sps:$4 sm:$0xff]   ;;  %v8828_v15 = vld [vmem:[#allocation28 + $0xc] ss:$16 sps:$4 sm:$0xff]  }
 0x9cd   :  { %v3951_v27 = vpack.c.bf16 %v3949_v16, %v3949_v16  ;;  %v4234_v16 = vld [vmem:[%s10699_s5] sm:$0xf]  ;;  %v8826_v17 = vld [vmem:[#allocation28 + $0x8] ss:$16 sps:$4 sm:$0xff]  }
 0x9ce   :  { %v3952_v19 = vpack.c.bf16 %v3950_v18, %v3950_v18  ;;  %v8831_v18 = vld [vmem:[#allocation28 + $0x2c] ss:$16 sps:$4 sm:$0xff]  }
 0x9d0   :  { %4120 = vmatprep.mubr.bf16.mxu1 %v3952_v19  ;;  %v8829_v19 = vld [vmem:[#allocation28 + $0x28] ss:$16 sps:$4 sm:$0xff]  }
 0x9d1   :  { %4121 = vmatmul.mubr.bf16.vlgmr.msra.gmra.mrb[28].mxu1 %v3951_v27  ;;  %v8832_v27 = vld [vmem:[#allocation28 + $0x48] ss:$16 sps:$4 sm:$0xff]  }
 0x9d2   :  { %8163 = vmatpush3.bf16.msra.mxu1 %v8794_v20  ;;  %8178 = vmatprep.mubr.msk.bf16.mxu1 %vm9935_vm0, %v9934_v28  ;;  %v8834_v20 = vld [vmem:[#allocation28 + $0x4c] ss:$16 sps:$4 sm:$0xff]  }
 0x9d3   :  { %8164 = vmatprep.subr.bf16.mxu1 %v9934_v28 }
 0x9d6   :  { %8165 = vmatpush3.bf16.msra.mxu1 %v8795_v21  ;;  %v8837_v21 = vld [vmem:[#allocation28 + $0x6c] ss:$16 sps:$4 sm:$0xff]  }
 0x9d7   :  { %8166 = vmatprep.subr.bf16.mxu1 %v9934_v28 }
 0x9da   :  { %8167 = vmatpush3.bf16.msra.mxu1 %v8796_v22  ;;  %v8835_v22 = vld [vmem:[#allocation28 + $0x68] ss:$16 sps:$4 sm:$0xff]  }
 0x9db   :  { %8168 = vmatprep.subr.bf16.mxu1 %v9934_v28 }
 0x9de   :  { %8169 = vmatpush3.bf16.msra.mxu1 %v8797_v9  ;;  %v8840_v9 = vld [vmem:[#allocation28 + $0x8c] ss:$16 sps:$4 sm:$0xff]  }
 0x9df   :  { %8170 = vmatprep.subr.bf16.mxu1 %v9934_v28 }
 0x9e2   :  { %8171 = vmatpush3.bf16.msra.mxu1 %v8798_v23  ;;  %v8838_v23 = vld [vmem:[#allocation28 + $0x88] ss:$16 sps:$4 sm:$0xff]  }
 0x9e3   :  { %8172 = vmatprep.subr.bf16.mxu1 %v9934_v28 }
 0x9e6   :  { %8173 = vmatpush3.bf16.msra.mxu1 %v8799_v24  ;;  %v8843_v24 = vld [vmem:[#allocation28 + $0xac] ss:$16 sps:$4 sm:$0xff]  }
 0x9e7   :  { %8174 = vmatprep.subr.bf16.mxu1 %v9934_v28 }
 0x9ea   :  { %8175 = vmatpush3.bf16.msra.mxu1 %v8800_v25  ;;  %v8841_v25 = vld [vmem:[#allocation28 + $0xa8] ss:$16 sps:$4 sm:$0xff]  }
 0x9eb   :  { %8176 = vmatprep.subr.bf16.mxu1 %v9934_v28 }
 0x9ee   :  { %8177 = vmatpush3.bf16.msra.mxu1 %v8801_v26  ;;  %v8846_v26 = vld [vmem:[#allocation28 + $0xcc] ss:$16 sps:$4 sm:$0xff]  }
 0x9ef   :  { %4449 = vmatprep.subr.bf16.mxu1 %v8804_v29  ;;  %v8844_v29 = vld [vmem:[#allocation28 + $0xc8] ss:$16 sps:$4 sm:$0xff]  }
 0xaa4   :  { %v7932_v49 = vpop.f32.mrb[28].mxu1 }
 0xaa5   :  { %v7933_v52 = vpop.f32.mrb[29].mxu1 }
 0xaa6   :  { %v7934_v53 = vadd.f32 %v7933_v52, %v7932_v49  ;;  %v7935_v54 = vpop.f32.mrb[30].mxu1  ;;  %v8891_v49 = vld [vmem:[#allocation31 + $0xd4] ss:$8 sps:$4 sm:$0xff]   ;;  %v8894_v52 = vld [vmem:[#allocation31 + $0xe4] ss:$8 sps:$4 sm:$0xff]  }
 0xaa7   :  { %v7936_v55 = vpop.f32.mrb[31].mxu1  ;;  %4961 = vmatprep.subr.bf16.mxu0 %v8891_v49  ;;  %v8897_v54 = vld [vmem:[#allocation31 + $0xf4] ss:$8 sps:$4 sm:$0xff]  }
 0xaa8   :  { %v4123_v56 = vadd.f32 %v7934_v53, %v7468_v51  ;;  %v8889_v51 = vld [vmem:[#allocation31 + $0xd0] ss:$8 sps:$4 sm:$0xff]   ;;  %v8892_v53 = vld [vmem:[#allocation31 + $0xe0] ss:$8 sps:$4 sm:$0xff]  }
 0xaa9   :  { %4962 = vmatpush1.bf16.msra.mxu0 %v8889_v51  ;;  %v8895_v55 = vld [vmem:[#allocation31 + $0xf0] ss:$8 sps:$4 sm:$0xff]  }
 0xaaa   :  { %v4128_v59 = vpack.c.bf16 %v4123_v56, %v4123_v56  ;;  %4963 = vmatprep.subr.bf16.mxu0 %v8894_v52  ;;  %v8900_v56 = vld [vmem:[#allocation31 + $0x104] ss:$8 sps:$4 sm:$0xff]   ;;  %v8919_v51 = vld [vmem:[#allocation31 + $0x170] ss:$8 sps:$4 sm:$0xff]  }
 0xaac   :  { %8179 = vmatmul.mubr.bf16.vlgmr.msra.gmra.mrb[32].mxu1 %v4128_v59  ;;  %v8947_v59 = vld [vmem:[%s10700_s2] sm:$0xff]  }
 0xaad   :  { %4450 = vmatpush1.bf16.msra.mxu1 %v8802_v57  ;;  %4481 = vmatprep.mubr.bf16.mxu1 %v9933_v0  ;;  %v8946_v57 = vld [vmem:[%s10700_s2 + $0x40] sm:$0xff]  }
 0xaae   :  { %4451 = vmatprep.subr.bf16.mxu1 %v8807_v60  ;;  %4964 = vmatpush1.bf16.msra.mxu0 %v8892_v53  ;;  %v8948_v60 = vld [vmem:[%s10700_s2 + $0x48] sm:$0xff]  }
 0xaaf   :  { %4965 = vmatprep.subr.bf16.mxu0 %v8897_v54  ;;  %v8924_v54 = vld [vmem:[#allocation31 + $0x184] ss:$8 sps:$4 sm:$0xff]  }
 0xab1   :  { %4452 = vmatpush1.bf16.msra.mxu1 %v8805_v61  ;;  %v8949_v61 = vld [vmem:[%s10700_s2 + $0x8] sm:$0xff]  }
 0xab2   :  { %4453 = vmatprep.subr.bf16.mxu1 %v8810_v44  ;;  %4966 = vmatpush1.bf16.msra.mxu0 %v8895_v55  ;;  %v8950_v44 = vld [vmem:[%s10700_s2 + $0x50] sm:$0xff]  }
 0xab3   :  { %4976 = vmatprep.subr.bf16.mxu0 %v8900_v56 }
 0xab5   :  { %4454 = vmatpush1.bf16.msra.mxu1 %v8808_v1  ;;  %v8951_v1 = vld [vmem:[%s10700_s2 + $0x10] sm:$0xff]  }
 0xab6   :  { %4455 = vmatprep.subr.bf16.mxu1 %v8813_v2  ;;  %v8952_v2 = vld [vmem:[%s10700_s2 + $0x58] sm:$0xff]  }
 0xab9   :  { %4456 = vmatpush1.bf16.msra.mxu1 %v8811_v63  ;;  %v8953_v63 = vld [vmem:[%s10700_s2 + $0x18] sm:$0xff]  }
 0xaba   :  { %4457 = vmatprep.subr.bf16.mxu1 %v8816_v3  ;;  %v8954_v3 = vld [vmem:[%s10700_s2 + $0x60] sm:$0xff]  }
 0xabd   :  { %4458 = vmatpush1.bf16.msra.mxu1 %v8814_v31  ;;  %v8955_v31 = vld [vmem:[%s10700_s2 + $0x20] sm:$0xff]  }
 0xabe   :  { %4459 = vmatprep.subr.bf16.mxu1 %v8819_v6  ;;  %v8956_v6 = vld [vmem:[%s10700_s2 + $0x68] sm:$0xff]  }
 0xac1   :  { %4460 = vmatpush1.bf16.msra.mxu1 %v8817_v7  ;;  %v8957_v7 = vld [vmem:[%s10700_s2 + $0x28] sm:$0xff]  }
 0xac2   :  { %4461 = vmatprep.subr.bf16.mxu1 %v8822_v8 }
 0xac5   :  { %4462 = vmatpush1.bf16.msra.mxu1 %v8820_v12 }
 0xac6   :  { %4463 = vmatprep.subr.bf16.mxu1 %v8825_v13 }
 0xac9   :  { %4464 = vmatpush1.bf16.msra.mxu1 %v8823_v14 }
 0xaca   :  { %4490 = vmatprep.subr.bf16.mxu1 %v8828_v15 }
 0xacc   :  { %4482 = vmatmul.mubr.bf16.vlgmr.msra.gmra.mrb[36].mxu1 %v4234_v16 }
 0xacd   :  { %4491 = vmatpush1.bf16.msra.mxu1 %v8826_v17  ;;  %4522 = vmatprep.mubr.bf16.mxu1 %v9933_v0 }
 0xace   :  { %4492 = vmatprep.subr.bf16.mxu1 %v8831_v18 }
 0xad1   :  { %4493 = vmatpush1.bf16.msra.mxu1 %v8829_v19 }
 0xad2   :  { %4494 = vmatprep.subr.bf16.mxu1 %v8834_v20 }
 0xad5   :  { %4495 = vmatpush1.bf16.msra.mxu1 %v8832_v27 }
 0xad6   :  { %4496 = vmatprep.subr.bf16.mxu1 %v8837_v21 }
 0xad9   :  { %4497 = vmatpush1.bf16.msra.mxu1 %v8835_v22 }
 0xada   :  { %4498 = vmatprep.subr.bf16.mxu1 %v8840_v9 }
 0xadd   :  { %4499 = vmatpush1.bf16.msra.mxu1 %v8838_v23 }
 0xade   :  { %4500 = vmatprep.subr.bf16.mxu1 %v8843_v24 }
 0xae1   :  { %4501 = vmatpush1.bf16.msra.mxu1 %v8841_v25  ;;  %v8898_v25 = vld [vmem:[#allocation31 + $0x100] ss:$8 sps:$4 sm:$0xff]  }
 0xae2   :  { %4502 = vmatprep.subr.bf16.mxu1 %v8846_v26 }
 0xae5   :  { %4503 = vmatpush1.bf16.msra.mxu1 %v8844_v29  ;;  %v8903_v29 = vld [vmem:[#allocation31 + $0x114] ss:$8 sps:$4 sm:$0xff]  }
 0xae6   :  { %4504 = vmatprep.subr.bf16.mxu1 %v8849_v5  ;;  %v8901_v5 = vld [vmem:[#allocation31 + $0x110] ss:$8 sps:$4 sm:$0xff]  }
 0xae9   :  { %4505 = vmatpush1.bf16.msra.mxu1 %v8847_v30  ;;  %v8906_v30 = vld [vmem:[#allocation31 + $0x124] ss:$8 sps:$4 sm:$0xff]  }
 0xaea   :  { %7947 = vmatprep.subr.bf16.mxu1 %v8946_v57  ;;  %v8922_v57 = vld [vmem:[#allocation31 + $0x180] ss:$8 sps:$4 sm:$0xff]  }
 0xaec   :  { %4523 = vmatmul.mubr.bf16.vlgmr.msra.gmra.mrb[40].mxu1 %v4234_v16  ;;  %v10519_v16 = vld [vmem:[#allocation30] sm:$0xf] }
 0xaed   :  { %7948 = vmatpush3.bf16.msra.mxu1 %v8947_v59  ;;  %v4272_v17 = vrot.slane %v10519_v16, %v10370_v40  ;;  %v4276_v18 = vrot.slane %v10519_v16, %v10376_v42  ;;  %v4284_v47 = vrot.slane %v10519_v16, %v10379_v43 }
 0xaee   :  { %7949 = vmatprep.subr.bf16.mxu1 %v8948_v60  ;;  %v8927_v60 = vld [vmem:[#allocation31 + $0x194] ss:$8 sps:$4 sm:$0xff]  }
 0xaf1   :  { %7950 = vmatpush3.bf16.msra.mxu1 %v8949_v61  ;;  %v8925_v61 = vld [vmem:[#allocation31 + $0x190] ss:$8 sps:$4 sm:$0xff]  }
 0xaf2   :  { %7951 = vmatprep.subr.bf16.mxu1 %v8950_v44  ;;  %v8930_v44 = vld [vmem:[#allocation31 + $0x1a4] ss:$8 sps:$4 sm:$0xff]  }
 0xaf5   :  { %7952 = vmatpush3.bf16.msra.mxu1 %v8951_v1  ;;  %v8928_v1 = vld [vmem:[#allocation31 + $0x1a0] ss:$8 sps:$4 sm:$0xff]  }
 0xaf6   :  { %7953 = vmatprep.subr.bf16.mxu1 %v8952_v2  ;;  %v8933_v2 = vld [vmem:[#allocation31 + $0x1b4] ss:$8 sps:$4 sm:$0xff]  }
 0xaf9   :  { %7954 = vmatpush3.bf16.msra.mxu1 %v8953_v63  ;;  %v8931_v63 = vld [vmem:[#allocation31 + $0x1b0] ss:$8 sps:$4 sm:$0xff]  }
 0xafa   :  { %7955 = vmatprep.subr.bf16.mxu1 %v8954_v3  ;;  %v8936_v3 = vld [vmem:[#allocation31 + $0x1c4] ss:$8 sps:$4 sm:$0xff]  }
 0xafd   :  { %7956 = vmatpush3.bf16.msra.mxu1 %v8955_v31  ;;  %v8934_v31 = vld [vmem:[#allocation31 + $0x1c0] ss:$8 sps:$4 sm:$0xff]  }
 0xafe   :  { %7957 = vmatprep.subr.bf16.mxu1 %v8956_v6  ;;  %v8939_v6 = vld [vmem:[#allocation31 + $0x1d4] ss:$8 sps:$4 sm:$0xff]  }
 0xb01   :  { %7958 = vmatpush3.bf16.msra.mxu1 %v8957_v7  ;;  %v8937_v7 = vld [vmem:[#allocation31 + $0x1d0] ss:$8 sps:$4 sm:$0xff]  }
 0xb7f   :  { %v4227_v8 = vpop.f32.mrb[32].mxu1 }
 0xb80   :  { %v10517_v12 = vadd.f32 %v4227_v8, %v10476_v58  ;;  %v8180_v13 = vpop.f32.mrb[33].mxu1  ;;  %v4280_v8 = vrot.slane %v10519_v16, %v10373_v41  ;;  %v8958_v16 = vld [vmem:[%s10700_s2 + $0x70] sm:$0xff]  }
 0xb81   :  { %v4230_v14 = vpop.f32.mrb[34].mxu1  ;;  %v8942_v13 = vld [vmem:[#allocation31 + $0x1e4] ss:$8 sps:$4 sm:$0xff]   ;;  %7959 = vmatprep.subr.bf16.mxu1 %v8958_v16 }
 0xb82   :  { %v8181_v15 = vpop.f32.mrb[35].mxu1  ;;  %v8940_v14 = vld [vmem:[#allocation31 + $0x1e0] ss:$8 sps:$4 sm:$0xff]  }
 0xb9f   :  { %v4483_v19 = vpop.f32.mrb[36].mxu1 }
 0xba0   :  { %v4484_v20 = vadd.f32 %v4483_v19, %v4272_v17  ;;  %v4485_v27 = vpop.f32.mrb[37].mxu1  ;;  %v8945_v17 = vld [vmem:[#allocation31 + $0x1f4] ss:$8 sps:$4 sm:$0xff]  }
 0xba1   :  { %v4486_v21 = vadd.f32 %v4485_v27, %v4276_v18  ;;  %v4487_v22 = vpop.f32.mrb[38].mxu1  ;;  %v8943_v18 = vld [vmem:[#allocation31 + $0x1f0] ss:$8 sps:$4 sm:$0xff]  }
 0xba2   :  { %v4531_v9 = vmax.f32 %v4484_v20, 0.0  ;;  %v4488_v23 = vpop.f32.mrb[39].mxu1  ;;  %v8959_v27 = vld [vmem:[%s10700_s2 + $0x30] sm:$0xff]   ;;  %v8961_v22 = vld [vmem:[%s10700_s2 + $0x38] sm:$0xff]  }
 0xba3   :  { %v4532_v58 = vmax.f32 %v4486_v21, 0.0  ;;  %7960 = vmatpush3.bf16.msra.mxu1 %v8959_v27  ;;  %v8960_v21 = vld [vmem:[%s10700_s2 + $0x78] sm:$0xff]  }
 0xba4   :  { %v4535_v26 = vpack.c.bf16 %v4531_v9, %v4531_v9  ;;  %7961 = vmatprep.subr.bf16.mxu1 %v8960_v21  ;;  %v4603_v9 = vld [vmem:[#allocation33] sm:$0x3]  ;;  %v5353_v27 = vld [vmem:[#allocation36 + $0x190] sm:$0xff] }
 0xba5   :  { %v4536_v24 = vpack.c.bf16 %v4532_v58, %v4532_v58  ;;  %v4608_v23 = vrot.slane %v4603_v9, %v10370_v40  ;;  %v4612_v58 = vrot.slane %v4603_v9, %v10376_v42  ;;  %v5357_v21 = vld [vmem:[#allocation36 + $0x1b0] sm:$0xff] }
 0xba6   :  { %v7666_v9 = vcombine.low %v5353_v27, %v5357_v21 }
 0xba7   :  { %4967 = vmatprep.mubr.bf16.mxu0 %v4536_v24  ;;  %7962 = vmatpush3.bf16.msra.mxu1 %v8961_v22  ;;  %v7667_v22 = vcombine.high %v5353_v27, %v5357_v21  ;;  %v5320_v27 = vld [vmem:[#allocation36 + $0x88] sm:$0xff] }
 0xba8   :  { %4968 = vmatmul.mubr.bf16.vlgmr.msra.gmra.mrb[44].mxu0 %v4535_v26  ;;  %8182 = vmatprep.subr.bf16.mxu1 %v9934_v28  ;;  %v5324_v21 = vld [vmem:[#allocation36 + $0xa8] sm:$0xff] }
 0xba9   :  { %4977 = vmatpush1.bf16.msra.mxu0 %v8898_v25 }
 0xbaa   :  { %4978 = vmatprep.subr.bf16.mxu0 %v8903_v29 }
 0xbad   :  { %4979 = vmatpush1.bf16.msra.mxu0 %v8901_v5 }
 0xbae   :  { %4980 = vmatprep.subr.bf16.mxu0 %v8906_v30 }
 0xbb1   :  { %4981 = vmatpush1.bf16.msra.mxu0 %v8904_v32 }
 0xbb2   :  { %4982 = vmatprep.subr.bf16.mxu0 %v8909_v33 }
 0xbb5   :  { %4983 = vmatpush1.bf16.msra.mxu0 %v8907_v34 }
 0xbb6   :  { %4984 = vmatprep.subr.bf16.mxu0 %v8912_v35  ;;  %v8962_v35 = vld [vmem:[#allocation45 + $0xc0] sm:$0xff]  }
 0xbb9   :  { %4985 = vmatpush1.bf16.msra.mxu0 %v8910_v36 }
 0xbba   :  { %4986 = vmatprep.subr.bf16.mxu0 %v8915_v37  ;;  %v8963_v37 = vld [vmem:[#allocation45 + $0xc8] sm:$0xff]  }
 0xbbd   :  { %4987 = vmatpush1.bf16.msra.mxu0 %v8913_v38  ;;  %v8964_v38 = vld [vmem:[#allocation45 + $0xd0] sm:$0xff]  }
 0xbbe   :  { %4988 = vmatprep.subr.bf16.mxu0 %v8918_v45  ;;  %v8965_v45 = vld [vmem:[#allocation45 + $0xd8] sm:$0xff]  }
 0xbbf   :  { %v4524_v48 = vpop.f32.mrb[40].mxu1 }
 0xbc0   :  { %v4526_v49 = vpop.f32.mrb[41].mxu1  ;;  %v4525_v15 = vadd.f32 %v4524_v48, %v4280_v8  ;;  %v8969_v48 = vld [vmem:[#allocation45 + $0xf8] sm:$0xff]  }
 0xbc1   :  { %4989 = vmatpush1.bf16.msra.mxu0 %v8916_v46  ;;  %v4527_v52 = vadd.f32 %v4526_v49, %v4284_v47  ;;  %v4528_v53 = vpop.f32.mrb[42].mxu1  ;;  %v8966_v46 = vld [vmem:[#allocation45 + $0xe0] sm:$0xff]   ;;  %v8967_v47 = vld [vmem:[#allocation45 + $0xe8] sm:$0xff]   ;;  %v10546_v49 = vld [vmem:[#allocation36] sm:$0xff] }
 0xbc2   :  { %4990 = vmatprep.subr.bf16.mxu0 %v8921_v11  ;;  %v4529_v55 = vpop.f32.mrb[43].mxu1  ;;  %v4533_v19 = vmax.f32 %v4525_v15, 0.0  ;;  %v8968_v11 = vld [vmem:[#allocation45 + $0xf0] sm:$0xff]  }
 0xbc3   :  { %v4534_v56 = vmax.f32 %v4527_v52, 0.0  ;;  %v5309_v55 = vld [vmem:[#allocation36 + $0x30] sm:$0xff] }
 0xbc4   :  { %v4537_v20 = vpack.c.bf16 %v4533_v19, %v4533_v19  ;;  %v5349_v19 = vld [vmem:[#allocation36 + $0x170] sm:$0xff] }
 0xbc5   :  { %4991 = vmatpush1.bf16.msra.mxu0 %v8919_v51  ;;  %v4538_v59 = vpack.c.bf16 %v4534_v56, %v4534_v56  ;;  %v10548_v51 = vld [vmem:[#allocation36 + $0x20] sm:$0xff] }
 0xbc6   :  { %4992 = vmatprep.subr.bf16.mxu0 %v8924_v54  ;;  %v7615_v52 = vcombine.high %v10546_v49, %v10548_v51  ;;  %v7614_v53 = vcombine.low %v10546_v49, %v10548_v51  ;;  %v5305_v54 = vld [vmem:[#allocation36 + $0x10] sm:$0xff]  ;;  %v5347_v49 = vld [vmem:[#allocation36 + $0x160] sm:$0xff] }
 0xbc7   :  { %5008 = vmatprep.mubr.bf16.mxu0 %v4538_v59  ;;  %v7619_v56 = vcombine.high %v5305_v54, %v5309_v55  ;;  %v5313_v59 = vld [vmem:[#allocation36 + $0x50] sm:$0xff] }
 0xbc9   :  { %4993 = vmatpush1.bf16.msra.mxu0 %v8922_v57  ;;  %v7618_v57 = vcombine.low %v5305_v54, %v5309_v55  ;;  %v5331_v54 = vld [vmem:[#allocation36 + $0xe0] sm:$0xff] }
 0xbca   :  { %4994 = vmatprep.subr.bf16.mxu0 %v8927_v60  ;;  %v5317_v60 = vld [vmem:[#allocation36 + $0x70] sm:$0xff] }
 0xbcd   :  { %4995 = vmatpush1.bf16.msra.mxu0 %v8925_v61  ;;  %v7627_v61 = vcombine.high %v5313_v59, %v5317_v60 }
 0xbce   :  { %4996 = vmatprep.subr.bf16.mxu0 %v8930_v44  ;;  %v7626_v44 = vcombine.low %v5313_v59, %v5317_v60  ;;  %v5339_v59 = vld [vmem:[#allocation36 + $0x120] sm:$0xff] }
 0xbd1   :  { %4997 = vmatpush1.bf16.msra.mxu0 %v8928_v1  ;;  %v5321_v1 = vld [vmem:[#allocation36 + $0x90] sm:$0xff] }
 0xbd2   :  { %4998 = vmatprep.subr.bf16.mxu0 %v8933_v2  ;;  %v5325_v2 = vld [vmem:[#allocation36 + $0xb0] sm:$0xff] }
 0xbd5   :  { %4999 = vmatpush1.bf16.msra.mxu0 %v8931_v63  ;;  %v7635_v63 = vcombine.high %v5321_v1, %v5325_v2 }
 0xbd6   :  { %5000 = vmatprep.subr.bf16.mxu0 %v8936_v3  ;;  %v7634_v3 = vcombine.low %v5321_v1, %v5325_v2  ;;  %v5351_v1 = vld [vmem:[#allocation36 + $0x180] sm:$0xff] }
 0xbd7   :  { %v5355_v2 = vld [vmem:[#allocation36 + $0x1a0] sm:$0xff] }
 0xbd9   :  { %5001 = vmatpush1.bf16.msra.mxu0 %v8934_v31  ;;  %v5329_v31 = vld [vmem:[#allocation36 + $0xd0] sm:$0xff] }
 0xbda   :  { %5002 = vmatprep.subr.bf16.mxu0 %v8939_v6  ;;  %v5333_v6 = vld [vmem:[#allocation36 + $0xf0] sm:$0xff] }
 0xbdb   :  { %v7642_v8 = vcombine.low %v5329_v31, %v5333_v6 }
 0xbdd   :  { %5003 = vmatpush1.bf16.msra.mxu0 %v8937_v7  ;;  %v7643_v7 = vcombine.high %v5329_v31, %v5333_v6  ;;  %v5359_v31 = vld [vmem:[#allocation36 + $0x1c0] sm:$0xff] }
 0xbde   :  { %5004 = vmatprep.subr.bf16.mxu0 %v8942_v13  ;;  %v5337_v13 = vld [vmem:[#allocation36 + $0x110] sm:$0xff]  ;;  %v5363_v6 = vld [vmem:[#allocation36 + $0x1e0] sm:$0xff] }
 0xbe1   :  { %5005 = vmatpush1.bf16.msra.mxu0 %v8940_v14  ;;  %v5341_v14 = vld [vmem:[#allocation36 + $0x130] sm:$0xff] }
 0xbe2   :  { %5006 = vmatprep.subr.bf16.mxu0 %v8945_v17  ;;  %v7651_v15 = vcombine.high %v5337_v13, %v5341_v14  ;;  %v7650_v17 = vcombine.low %v5337_v13, %v5341_v14  ;;  %v5304_v13 = vld [vmem:[#allocation36 + $0x8] sm:$0xff] }
 0xbe3   :  { %v5308_v14 = vld [vmem:[#allocation36 + $0x28] sm:$0xff] }
 0xbe5   :  { %5007 = vmatpush1.bf16.msra.mxu0 %v8943_v18  ;;  %v5345_v18 = vld [vmem:[#allocation36 + $0x150] sm:$0xff] }
 0xbe6   :  { %5811 = vmatprep.subr.bf16.mxu0 %v7619_v56  ;;  %v7658_v16 = vcombine.low %v5345_v18, %v5349_v19 }
 0xbe8   :  { %5009 = vmatmul.mubr.bf16.vlgmr.msra.gmra.mrb[44].mxu0 %v4537_v20  ;;  %v7659_v20 = vcombine.high %v5345_v18, %v5349_v19  ;;  %v5312_v18 = vld [vmem:[#allocation36 + $0x48] sm:$0xff] }
 0xbe9   :  { %5843 = vmatprep.mubr.bf16.mxu0 %v9933_v0  ;;  %5812 = vmatpush1.bf16.msra.mxu0 %v7618_v57  ;;  %v5335_v57 = vld [vmem:[#allocation36 + $0x100] sm:$0xff]  ;;  %v5316_v19 = vld [vmem:[#allocation36 + $0x68] sm:$0xff] }
 0xbea   :  { %5813 = vmatprep.subr.bf16.mxu0 %v7627_v61  ;;  %v7647_v61 = vcombine.high %v5335_v57, %v5339_v59  ;;  %v7646_v51 = vcombine.low %v5335_v57, %v5339_v59  ;;  %v5314_v59 = vld [vmem:[#allocation36 + $0x58] sm:$0xff] }
 0xbed   :  { %5814 = vmatpush1.bf16.msra.mxu0 %v7626_v44  ;;  %v5343_v44 = vld [vmem:[#allocation36 + $0x140] sm:$0xff] }
 0xbee   :  { %5815 = vmatprep.subr.bf16.mxu0 %v7635_v63  ;;  %v7654_v63 = vcombine.low %v5343_v44, %v5347_v49 }
 0xbf1   :  { %5816 = vmatpush1.bf16.msra.mxu0 %v7634_v3  ;;  %v7663_v3 = vcombine.high %v5351_v1, %v5355_v2 }
 0xbf2   :  { %5817 = vmatprep.subr.bf16.mxu0 %v7643_v7  ;;  %v7662_v7 = vcombine.low %v5351_v1, %v5355_v2  ;;  %v5330_v2 = vld [vmem:[#allocation36 + $0xd8] sm:$0xff] }
 0xbf5   :  { %5818 = vmatpush1.bf16.msra.mxu0 %v7642_v8  ;;  %v7671_v8 = vcombine.high %v5359_v31, %v5363_v6 }
 0xbf6   :  { %5819 = vmatprep.subr.bf16.mxu0 %v7651_v15  ;;  %v7670_v15 = vcombine.low %v5359_v31, %v5363_v6  ;;  %v5338_v6 = vld [vmem:[#allocation36 + $0x118] sm:$0xff] }
 0xbf9   :  { %5820 = vmatpush1.bf16.msra.mxu0 %v7650_v17  ;;  %v7617_v17 = vcombine.high %v5304_v13, %v5308_v14 }
 0xbfa   :  { %5821 = vmatprep.subr.bf16.mxu0 %v7659_v20  ;;  %v7616_v20 = vcombine.low %v5304_v13, %v5308_v14  ;;  %v5346_v14 = vld [vmem:[#allocation36 + $0x158] sm:$0xff] }
 0xbfd   :  { %5822 = vmatpush1.bf16.msra.mxu0 %v7658_v16  ;;  %v7625_v16 = vcombine.high %v5312_v18, %v5316_v19 }
 0xbfe   :  { %5823 = vmatprep.subr.bf16.mxu0 %v7667_v22  ;;  %v7624_v22 = vcombine.low %v5312_v18, %v5316_v19  ;;  %v5354_v18 = vld [vmem:[#allocation36 + $0x198] sm:$0xff] }
 0xbff   :  { %v5358_v19 = vld [vmem:[#allocation36 + $0x1b8] sm:$0xff] }
 0xc01   :  { %5824 = vmatpush1.bf16.msra.mxu0 %v7666_v9  ;;  %v7633_v9 = vcombine.high %v5320_v27, %v5324_v21 }
 0xcbb   :  { %v5010_v24 = vpop.f32.mrb[44].mxu0 }
 0xcbc   :  { %v8286_v25 = vadd.f32 %v5010_v24, %v4608_v23  ;;  %v5012_v26 = vpop.f32.mrb[45].mxu0  ;;  %v5361_v23 = vld [vmem:[#allocation36 + $0x1d0] sm:$0xff] }
 0xcbd   :  { %v8287_v29 = vadd.f32 %v5012_v26, %v4612_v58  ;;  %v5014_v5 = vpop.f32.mrb[46].mxu0  ;;  %v5365_v58 = vld [vmem:[#allocation36 + $0x1f0] sm:$0xff]  ;;  %v10555_v26 = vld [vmem:[%s10701_s8] sm:$0xf] }
 0xcbe   :  { %v5017_v30 = vmax.f32 %v8286_v25, 0.0  ;;  %v5015_v32 = vpop.f32.mrb[47].mxu0  ;;  %v7675_v24 = vcombine.high %v5361_v23, %v5365_v58  ;;  %v7674_v25 = vcombine.low %v5361_v23, %v5365_v58  ;;  %v7589_v5 = vld [vmem:[#allocation34] ss:$0 sm:$0xff]  ;;  %v5328_v23 = vld [vmem:[#allocation36 + $0xc8] sm:$0xff] }
 0xcbf   :  { %v5018_v33 = vmax.f32 %v8287_v29, 0.0  ;;  %v5332_v58 = vld [vmem:[#allocation36 + $0xe8] sm:$0xff] }
 0xcc0   :  { %v5019_v36 = vpack.c.bf16 %v5017_v30, %v5017_v30  ;;  %5825 = vmatprep.subr.bf16.mxu0 %v7675_v24  ;;  %v7632_v24 = vcombine.low %v5320_v27, %v5324_v21  ;;  %v5362_v27 = vld [vmem:[#allocation36 + $0x1d8] sm:$0xff] }
 0xcc1   :  { %v5020_v34 = vpack.c.bf16 %v5018_v33, %v5018_v33  ;;  %5826 = vmatpush1.bf16.msra.mxu0 %v7674_v25  ;;  %v7641_v25 = vcombine.high %v5328_v23, %v5332_v58  ;;  %v5366_v21 = vld [vmem:[#allocation36 + $0x1f8] sm:$0xff] }
 0xcc3   :  { %5188 = vmatprep.mubr.bf16.mxu1 %v5020_v34 }
 0xcc4   :  { %5189 = vmatmul.mubr.bf16.vlgmr.msra.gmra.mrb[44].mxu1 %v5019_v36  ;;  %5844 = vmatmul.mubr.bf16.vlgmr.msra.gmra.mrb[48].mxu0 %v10555_v26  ;;  %v5315_v36 = vld [vmem:[#allocation36 + $0x60] sm:$0xff] }
 0xcc5   :  { %8183 = vmatpush3.bf16.msra.mxu1 %v8962_v35  ;;  %8198 = vmatprep.mubr.msk.bf16.mxu1 %vm9935_vm0, %v9934_v28  ;;  %v5311_v35 = vld [vmem:[#allocation36 + $0x40] sm:$0xff] }
 0xcc6   :  { %8184 = vmatprep.subr.bf16.mxu1 %v9934_v28 }
 0xcc9   :  { %8185 = vmatpush3.bf16.msra.mxu1 %v8963_v37 }
 0xcca   :  { %8186 = vmatprep.subr.bf16.mxu1 %v9934_v28 }
 0xccd   :  { %8187 = vmatpush3.bf16.msra.mxu1 %v8964_v38 }
 0xcce   :  { %8188 = vmatprep.subr.bf16.mxu1 %v9934_v28 }
 0xcd1   :  { %8189 = vmatpush3.bf16.msra.mxu1 %v8965_v45  ;;  %v7623_v45 = vcombine.high %v5311_v35, %v5315_v36 }
 0xcd2   :  { %8190 = vmatprep.subr.bf16.mxu1 %v9934_v28 }
 0xcd5   :  { %8191 = vmatpush3.bf16.msra.mxu1 %v8966_v46  ;;  %v5319_v46 = vld [vmem:[#allocation36 + $0x80] sm:$0xff] }
 0xcd6   :  { %8192 = vmatprep.subr.bf16.mxu1 %v9934_v28 }
 0xcd9   :  { %8193 = vmatpush3.bf16.msra.mxu1 %v8967_v47  ;;  %v5323_v47 = vld [vmem:[#allocation36 + $0xa0] sm:$0xff] }
 0xcda   :  { %8194 = vmatprep.subr.bf16.mxu1 %v9934_v28  ;;  %v7630_v55 = vcombine.low %v5319_v46, %v5323_v47 }
 0xcdd   :  { %8195 = vmatpush3.bf16.msra.mxu1 %v8968_v11  ;;  %v7622_v11 = vcombine.low %v5311_v35, %v5315_v36 }
 0xcde   :  { %8196 = vmatprep.subr.bf16.mxu1 %v9934_v28 }
 0xce1   :  { %8197 = vmatpush3.bf16.msra.mxu1 %v8969_v48  ;;  %v7631_v48 = vcombine.high %v5319_v46, %v5323_v47  ;;  %v5360_v47 = vld [vmem:[#allocation36 + $0x1c8] sm:$0xff] }
 0xce2   :  { %5729 = vmatprep.subr.bf16.mxu1 %v7615_v52  ;;  %v5327_v52 = vld [vmem:[#allocation36 + $0xc0] sm:$0xff] }
 0xce3   :  { %v7639_v56 = vcombine.high %v5327_v52, %v5331_v54  ;;  %v7638_v60 = vcombine.low %v5327_v52, %v5331_v54  ;;  %v5306_v54 = vld [vmem:[#allocation36 + $0x18] sm:$0xff] }
 0xd97   :  { %v7963_v29 = vpop.f32.mrb[44].mxu1 }
 0xd98   :  { %v7964_v30 = vpop.f32.mrb[45].mxu1 }
 0xd99   :  { %v7965_v32 = vadd.f32 %v7964_v30, %v7963_v29  ;;  %v7966_v33 = vpop.f32.mrb[46].mxu1  ;;  %v5336_v29 = vld [vmem:[#allocation36 + $0x108] sm:$0xff]  ;;  %v7640_v30 = vcombine.low %v5328_v23, %v5332_v58 }
 0xd9a   :  { %v7967_v34 = vpop.f32.mrb[47].mxu1  ;;  %v5344_v33 = vld [vmem:[#allocation36 + $0x148] sm:$0xff] }
 0xd9b   :  { %v5191_v37 = vadd.f32 %v7965_v32, %v7589_v5  ;;  %v5340_v5 = vld [vmem:[#allocation36 + $0x128] sm:$0xff] }
 0xd9c   :  { %v7649_v32 = vcombine.high %v5336_v29, %v5340_v5  ;;  %v5348_v34 = vld [vmem:[#allocation36 + $0x168] sm:$0xff]  ;;  %v7648_v35 = vcombine.low %v5336_v29, %v5340_v5  ;;  %v8973_v29 = vld [vmem:[#allocation39 + $0x8] sm:$0xff]   ;;  %v8974_v5 = vld [vmem:[#allocation39 + $0x50] sm:$0xff]  }
 0xd9d   :  { %v5196_v38 = vpack.c.bf16 %v5191_v37, %v5191_v37  ;;  %v7657_v36 = vcombine.high %v5344_v33, %v5348_v34  ;;  %v5352_v37 = vld [vmem:[#allocation36 + $0x188] sm:$0xff] }
 0xd9e   :  { %v8970_v23 = vld [vmem:[#allocation39 + $0x40] sm:$0xff]  }
 0xd9f   :  { %8199 = vmatmul.mubr.bf16.vlgmr.msra.gmra.mrb[48].mxu1 %v5196_v38  ;;  %v5356_v38 = vld [vmem:[#allocation36 + $0x1a8] sm:$0xff]  ;;  %7978 = vmatprep.subr.bf16.mxu0 %v8970_v23 }
 0xda0   :  { %5730 = vmatpush1.bf16.msra.mxu1 %v7614_v53  ;;  %5761 = vmatprep.mubr.bf16.mxu1 %v9933_v0  ;;  %v7655_v53 = vcombine.high %v5343_v44, %v5347_v49  ;;  %v7665_v46 = vcombine.high %v5352_v37, %v5356_v38  ;;  %v5322_v49 = vld [vmem:[#allocation36 + $0x98] sm:$0xff]  ;;  %v8971_v58 = vld [vmem:[#allocation39] sm:$0xff]  }
 0xda1   :  { %5731 = vmatprep.subr.bf16.mxu1 %v7623_v45  ;;  %v7656_v45 = vcombine.low %v5344_v33, %v5348_v34  ;;  %7979 = vmatpush3.bf16.msra.mxu0 %v8971_v58  ;;  %v8977_v33 = vld [vmem:[#allocation39 + $0x18] sm:$0xff]   ;;  %v8978_v34 = vld [vmem:[#allocation39 + $0x60] sm:$0xff]  }
 0xda4   :  { %5732 = vmatpush1.bf16.msra.mxu1 %v7622_v11  ;;  %v5364_v11 = vld [vmem:[#allocation36 + $0x1e8] sm:$0xff] }
 0xda5   :  { %5733 = vmatprep.subr.bf16.mxu1 %v7631_v48  ;;  %v7664_v48 = vcombine.low %v5352_v37, %v5356_v38  ;;  %v7673_v52 = vcombine.high %v5360_v47, %v5364_v11  ;;  %v8981_v37 = vld [vmem:[#allocation39 + $0x28] sm:$0xff]   ;;  %v8982_v38 = vld [vmem:[#allocation39 + $0x70] sm:$0xff]  }
 0xda8   :  { %5734 = vmatpush1.bf16.msra.mxu1 %v7630_v55  ;;  %v5310_v55 = vld [vmem:[#allocation36 + $0x38] sm:$0xff] }
 0xda9   :  { %5735 = vmatprep.subr.bf16.mxu1 %v7639_v56  ;;  %v7672_v56 = vcombine.low %v5360_v47, %v5364_v11  ;;  %v7621_v57 = vcombine.high %v5306_v54, %v5310_v55  ;;  %v8985_v47 = vld [vmem:[#allocation39 + $0x38] sm:$0xff]   ;;  %v8987_v11 = vld [vmem:[#allocation39 + $0x80] sm:$0xff]  }
 0xdac   :  { %5736 = vmatpush1.bf16.msra.mxu1 %v7638_v60  ;;  %v5318_v60 = vld [vmem:[#allocation36 + $0x78] sm:$0xff] }
 0xdad   :  { %5737 = vmatprep.subr.bf16.mxu1 %v7647_v61  ;;  %v7620_v61 = vcombine.low %v5306_v54, %v5310_v55  ;;  %v7629_v44 = vcombine.high %v5314_v59, %v5318_v60  ;;  %v8991_v54 = vld [vmem:[#allocation39 + $0x88] sm:$0xff]   ;;  %v8994_v55 = vld [vmem:[#allocation39 + $0xd0] sm:$0xff]  }
 0xdb0   :  { %5738 = vmatpush1.bf16.msra.mxu1 %v7646_v51  ;;  %v5326_v51 = vld [vmem:[#allocation36 + $0xb8] sm:$0xff] }
 0xdb1   :  { %5739 = vmatprep.subr.bf16.mxu1 %v7655_v53  ;;  %v7628_v53 = vcombine.low %v5314_v59, %v5318_v60  ;;  %v7637_v1 = vcombine.high %v5322_v49, %v5326_v51  ;;  %v8999_v59 = vld [vmem:[#allocation39 + $0x98] sm:$0xff]   ;;  %v9002_v60 = vld [vmem:[#allocation39 + $0xe0] sm:$0xff]  }
 0xdb4   :  { %5740 = vmatpush1.bf16.msra.mxu1 %v7654_v63  ;;  %v5334_v63 = vld [vmem:[#allocation36 + $0xf8] sm:$0xff] }
 0xdb5   :  { %5741 = vmatprep.subr.bf16.mxu1 %v7663_v3  ;;  %v7636_v3 = vcombine.low %v5322_v49, %v5326_v51  ;;  %v7645_v31 = vcombine.high %v5330_v2, %v5334_v63  ;;  %v9007_v49 = vld [vmem:[#allocation39 + $0xa8] sm:$0xff]   ;;  %v9010_v51 = vld [vmem:[#allocation39 + $0xf0] sm:$0xff]  }
 0xdb8   :  { %5742 = vmatpush1.bf16.msra.mxu1 %v7662_v7  ;;  %v5342_v7 = vld [vmem:[#allocation36 + $0x138] sm:$0xff] }
 0xdb9   :  { %5743 = vmatprep.subr.bf16.mxu1 %v7671_v8  ;;  %v7644_v8 = vcombine.low %v5330_v2, %v5334_v63  ;;  %v7653_v13 = vcombine.high %v5338_v6, %v5342_v7  ;;  %v9014_v63 = vld [vmem:[#allocation39 + $0xf8] sm:$0xff]  }
 0xdbc   :  { %5744 = vmatpush1.bf16.msra.mxu1 %v7670_v15  ;;  %v5350_v15 = vld [vmem:[#allocation36 + $0x178] sm:$0xff] }
 0xdbd   :  { %5770 = vmatprep.subr.bf16.mxu1 %v7617_v17  ;;  %v7652_v17 = vcombine.low %v5338_v6, %v5342_v7  ;;  %v9018_v7 = vld [vmem:[#allocation39 + $0x1c0] sm:$0xff]  }
 0xdbf   :  { %5762 = vmatmul.mubr.bf16.vlgmr.msra.gmra.mrb[52].mxu1 %v10555_v26 }
 0xdc0   :  { %5771 = vmatpush1.bf16.msra.mxu1 %v7616_v20  ;;  %5802 = vmatprep.mubr.bf16.mxu1 %v9933_v0  ;;  %v7660_v20 = vcombine.low %v5346_v14, %v5350_v15 }
 0xdc1   :  { %5772 = vmatprep.subr.bf16.mxu1 %v7625_v16  ;;  %v7669_v16 = vcombine.high %v5354_v18, %v5358_v19 }
 0xdc4   :  { %5773 = vmatpush1.bf16.msra.mxu1 %v7624_v22  ;;  %v7668_v22 = vcombine.low %v5354_v18, %v5358_v19 }
 0xdc5   :  { %5774 = vmatprep.subr.bf16.mxu1 %v7633_v9  ;;  %v7677_v9 = vcombine.high %v5362_v27, %v5366_v21 }
 0xdc8   :  { %5775 = vmatpush1.bf16.msra.mxu1 %v7632_v24  ;;  %v8972_v24 = vld [vmem:[#allocation39 + $0x48] sm:$0xff]  }
 0xdc9   :  { %5776 = vmatprep.subr.bf16.mxu1 %v7641_v25  ;;  %v7676_v25 = vcombine.low %v5362_v27, %v5366_v21  ;;  %7980 = vmatprep.subr.bf16.mxu0 %v8972_v24 }
 0xdca   :  { %7981 = vmatpush3.bf16.msra.mxu0 %v8973_v29 }
 0xdcb   :  { %7982 = vmatprep.subr.bf16.mxu0 %v8974_v5 }
 0xdcc   :  { %5777 = vmatpush1.bf16.msra.mxu1 %v7640_v30  ;;  %v8975_v30 = vld [vmem:[#allocation39 + $0x10] sm:$0xff]  }
 0xdcd   :  { %5778 = vmatprep.subr.bf16.mxu1 %v7649_v32  ;;  %v8976_v32 = vld [vmem:[#allocation39 + $0x58] sm:$0xff]  }
 0xdce   :  { %7983 = vmatpush3.bf16.msra.mxu0 %v8975_v30  ;;  %v8989_v30 = vld [vmem:[#allocation39 + $0x100] sm:$0xff]  }
 0xdcf   :  { %7984 = vmatprep.subr.bf16.mxu0 %v8976_v32  ;;  %v8992_v32 = vld [vmem:[#allocation39 + $0x148] sm:$0xff]  }
 0xdd0   :  { %5779 = vmatpush1.bf16.msra.mxu1 %v7648_v35  ;;  %v8979_v35 = vld [vmem:[#allocation39 + $0x20] sm:$0xff]  }
 0xdd1   :  { %5780 = vmatprep.subr.bf16.mxu1 %v7657_v36  ;;  %v8980_v36 = vld [vmem:[#allocation39 + $0x68] sm:$0xff]  }
 0xdd2   :  { %7985 = vmatpush3.bf16.msra.mxu0 %v8977_v33  ;;  %v8997_v33 = vld [vmem:[#allocation39 + $0x110] sm:$0xff]  }
 0xdd3   :  { %7986 = vmatprep.subr.bf16.mxu0 %v8978_v34  ;;  %v9000_v34 = vld [vmem:[#allocation39 + $0x158] sm:$0xff]  }
 0xdd4   :  { %5781 = vmatpush1.bf16.msra.mxu1 %v7656_v45  ;;  %v8983_v45 = vld [vmem:[#allocation39 + $0x30] sm:$0xff]  }
 0xdd5   :  { %5782 = vmatprep.subr.bf16.mxu1 %v7665_v46  ;;  %v8984_v46 = vld [vmem:[#allocation39 + $0x78] sm:$0xff]  }
 0xdd6   :  { %7987 = vmatpush3.bf16.msra.mxu0 %v8979_v35  ;;  %v9001_v35 = vld [vmem:[#allocation39 + $0x118] sm:$0xff]  }
 0xdd7   :  { %7988 = vmatprep.subr.bf16.mxu0 %v8980_v36  ;;  %v9004_v36 = vld [vmem:[#allocation39 + $0x160] sm:$0xff]  }
 0xdd8   :  { %5783 = vmatpush1.bf16.msra.mxu1 %v7664_v48  ;;  %v8988_v48 = vld [vmem:[#allocation39 + $0x140] sm:$0xff]  }
 0xdd9   :  { %5784 = vmatprep.subr.bf16.mxu1 %v7673_v52  ;;  %v8990_v52 = vld [vmem:[#allocation39 + $0xc8] sm:$0xff]  }
 0xdda   :  { %7989 = vmatpush3.bf16.msra.mxu0 %v8981_v37  ;;  %v9005_v37 = vld [vmem:[#allocation39 + $0x120] sm:$0xff]  }
 0xddb   :  { %7990 = vmatprep.subr.bf16.mxu0 %v8982_v38  ;;  %v9008_v38 = vld [vmem:[#allocation39 + $0x168] sm:$0xff]  }
 0xddc   :  { %5785 = vmatpush1.bf16.msra.mxu1 %v7672_v56  ;;  %v8995_v56 = vld [vmem:[#allocation39 + $0x90] sm:$0xff]  }
 0xddd   :  { %5852 = vmatprep.subr.bf16.mxu1 %v7621_v57  ;;  %v8998_v57 = vld [vmem:[#allocation39 + $0xd8] sm:$0xff]  }
 0xdde   :  { %7991 = vmatpush3.bf16.msra.mxu0 %v8983_v45 }
 0xddf   :  { %5803 = vmatmul.mubr.bf16.vlgmr.msra.gmra.mrb[56].mxu1 %v10555_v26  ;;  %7992 = vmatprep.subr.bf16.mxu0 %v8984_v46  ;;  %v9009_v46 = vld [vmem:[#allocation39 + $0x128] sm:$0xff]  }
 0xde0   :  { %5853 = vmatpush1.bf16.msra.mxu1 %v7620_v61  ;;  %5884 = vmatprep.mubr.bf16.mxu1 %v9933_v0  ;;  %v7661_v0 = vcombine.high %v5346_v14, %v5350_v15  ;;  %v9003_v61 = vld [vmem:[#allocation39 + $0xa0] sm:$0xff]  }
 0xde1   :  { %5854 = vmatprep.subr.bf16.mxu1 %v7629_v44  ;;  %v9006_v44 = vld [vmem:[#allocation39 + $0xe8] sm:$0xff]  }
 0xde2   :  { %7993 = vmatpush3.bf16.msra.mxu0 %v8985_v47  ;;  %v9012_v47 = vld [vmem:[#allocation39 + $0x170] sm:$0xff]  }
 0xde3   :  { %8022 = vmatprep.subr.bf16.mxu0 %v8988_v48 }
 0xde4   :  { %5855 = vmatpush1.bf16.msra.mxu1 %v7628_v53  ;;  %v9011_v53 = vld [vmem:[#allocation39 + $0xb0] sm:$0xff]  }
 0xde5   :  { %5856 = vmatprep.subr.bf16.mxu1 %v7637_v1  ;;  %v5845_v1 = vpop.f32.mrb[48].mxu0 }
 0xde6   :  { %v5847_v2 = vpop.f32.mrb[49].mxu0 }
 0xde8   :  { %5857 = vmatpush1.bf16.msra.mxu1 %v7636_v3  ;;  %v9015_v3 = vld [vmem:[#allocation39 + $0xb8] sm:$0xff]  }
 0xde9   :  { %5858 = vmatprep.subr.bf16.mxu1 %v7645_v31  ;;  %v5849_v31 = vpop.f32.mrb[50].mxu0 }
 0xdea   :  { %v5850_v6 = vpop.f32.mrb[51].mxu0  ;;  %v9023_v31 = vld [vmem:[#allocation39 + $0x190] sm:$0xff]  }
 0xdeb   :  { %v9024_v6 = vld [vmem:[#allocation39 + $0x1d8] sm:$0xff]  }
 0xdec   :  { %5859 = vmatpush1.bf16.msra.mxu1 %v7644_v8 }
 0xded   :  { %5860 = vmatprep.subr.bf16.mxu1 %v7653_v13 }
 0xdf0   :  { %5861 = vmatpush1.bf16.msra.mxu1 %v7652_v17 }
 0xdf1   :  { %5862 = vmatprep.subr.bf16.mxu1 %v7661_v0  ;;  %v10570_v0 = vld [vmem:[#allocation37] sm:$0xff] }
 0xdf2   :  { %v5392_v18 = vrot.slane %v10570_v0, %v684_v62  ;;  %v5372_v19 = vrot.slane %v10570_v0, %v10370_v40  ;;  %v8993_v40 = vld [vmem:[#allocation39 + $0x108] sm:$0xff]   ;;  %v5388_v45 = vrot.slane %v10570_v0, %v680_v50  ;;  %v5384_v48 = vrot.slane %v10570_v0, %v10379_v43  ;;  %v9019_v43 = vld [vmem:[#allocation39 + $0x180] sm:$0xff]  }
 0xdf4   :  { %5863 = vmatpush1.bf16.msra.mxu1 %v7660_v20  ;;  %v5376_v20 = vrot.slane %v10570_v0, %v10376_v42  ;;  %v8996_v42 = vld [vmem:[#allocation39 + $0x150] sm:$0xff]  }
 0xdf5   :  { %5864 = vmatprep.subr.bf16.mxu1 %v7669_v16  ;;  %v5848_v16 = vadd.f32 %v5847_v2, %v5392_v18  ;;  %v9020_v2 = vld [vmem:[#allocation39 + $0x1c8] sm:$0xff]   ;;  %v9030_v18 = vld [vmem:[#allocation39 + $0x1f0] sm:$0xff]  }
 0xdf7   :  { %v5898_v23 = vmax.f32 %v5848_v16, 0.0  ;;  %v9031_v16 = vld [vmem:[#allocation39 + $0x1b0] sm:$0xff]  }
 0xdf8   :  { %5865 = vmatpush1.bf16.msra.mxu1 %v7668_v22 }
 0xdf9   :  { %5866 = vmatprep.subr.bf16.mxu1 %v7677_v9  ;;  %v5906_v62 = vpack.c.bf16 %v5898_v23, %v5898_v23 }
 0xdfc   :  { %5867 = vmatpush1.bf16.msra.mxu1 %v7676_v25 }
 0xdff   :  { %5885 = vmatmul.mubr.bf16.vlgmr.msra.gmra.mrb[60].mxu1 %v10555_v26  ;;  %v8986_v26 = vld [vmem:[#allocation39 + $0xc0] sm:$0xff]  }
 0xe00   :  { %8000 = vmatprep.subr.bf16.mxu1 %v8986_v26  ;;  %v5380_v26 = vrot.slane %v10570_v0, %v10373_v41 }
 0xe01   :  { %8001 = vmatpush3.bf16.msra.mxu1 %v8987_v11  ;;  %v5846_v11 = vadd.f32 %v5845_v1, %v5388_v45  ;;  %v9048_v45 = vld [vmem:[#allocation45 + $0x130] sm:$0xff]  }
 0xe02   :  { %8002 = vmatprep.subr.bf16.mxu1 %v8990_v52  ;;  %v9013_v52 = vld [vmem:[#allocation39 + $0x130] sm:$0xff]  }
 0xe05   :  { %8003 = vmatpush3.bf16.msra.mxu1 %v8991_v54  ;;  %v9016_v54 = vld [vmem:[#allocation39 + $0x178] sm:$0xff]  }
 0xe06   :  { %8004 = vmatprep.subr.bf16.mxu1 %v8994_v55 }
 0xe09   :  { %8005 = vmatpush3.bf16.msra.mxu1 %v8995_v56 }
 0xe0a   :  { %8006 = vmatprep.subr.bf16.mxu1 %v8998_v57 }
 0xe0d   :  { %8007 = vmatpush3.bf16.msra.mxu1 %v8999_v59  ;;  %v5897_v59 = vmax.f32 %v5846_v11, 0.0 }
 0xe0e   :  { %8008 = vmatprep.subr.bf16.mxu1 %v9002_v60 }
 0xe11   :  { %8009 = vmatpush3.bf16.msra.mxu1 %v9003_v61  ;;  %v9017_v61 = vld [vmem:[#allocation39 + $0x138] sm:$0xff]  }
 0xe12   :  { %8010 = vmatprep.subr.bf16.mxu1 %v9006_v44 }
 0xe15   :  { %8011 = vmatpush3.bf16.msra.mxu1 %v9007_v49 }
 0xe16   :  { %8012 = vmatprep.subr.bf16.mxu1 %v9010_v51 }
 0xe19   :  { %8013 = vmatpush3.bf16.msra.mxu1 %v9011_v53  ;;  %v5905_v53 = vpack.c.bf16 %v5897_v59, %v5897_v59 }
 0xe1a   :  { %8014 = vmatprep.subr.bf16.mxu1 %v9014_v63  ;;  %v9021_v63 = vld [vmem:[#allocation39 + $0x188] sm:$0xff]  }
 0xe1d   :  { %8015 = vmatpush3.bf16.msra.mxu1 %v9015_v3  ;;  %v9022_v3 = vld [vmem:[#allocation39 + $0x1d0] sm:$0xff]  }
 0xe1e   :  { %8044 = vmatprep.subr.bf16.mxu1 %v9018_v7  ;;  %v9025_v7 = vld [vmem:[#allocation39 + $0x198] sm:$0xff]  }
 0xe72   :  { %v5295_v8 = vpop.f32.mrb[48].mxu1 }
 0xe73   :  { %v10568_v13 = vadd.f32 %v5295_v8, %v10517_v12  ;;  %v8200_v14 = vpop.f32.mrb[49].mxu1  ;;  %v9026_v8 = vld [vmem:[#allocation39 + $0x1e0] sm:$0xff]  }
 0xe74   :  { %v5298_v15 = vpop.f32.mrb[50].mxu1  ;;  %v9027_v14 = vld [vmem:[#allocation39 + $0x1a0] sm:$0xff]  }
 0xe75   :  { %v8201_v17 = vpop.f32.mrb[51].mxu1  ;;  %v9028_v15 = vld [vmem:[#allocation39 + $0x1e8] sm:$0xff]  }
 0xe76   :  { %v9029_v17 = vld [vmem:[#allocation39 + $0x1a8] sm:$0xff]  }
 0xe92   :  { %v5763_v27 = vpop.f32.mrb[52].mxu1 }
 0xe93   :  { %v5764_v21 = vadd.f32 %v5763_v27, %v5372_v19  ;;  %v5765_v12 = vpop.f32.mrb[53].mxu1  ;;  %v5396_v19 = vrot.slane %v10570_v0, %v688_v10  ;;  %v9032_v27 = vld [vmem:[#allocation39 + $0x1f8] sm:$0xff]  }
 0xe94   :  { %v5766_v22 = vadd.f32 %v5765_v12, %v5376_v20  ;;  %v5767_v9 = vpop.f32.mrb[54].mxu1  ;;  %v5400_v20 = vrot.slane %v10570_v0, %v692_v4  ;;  %v9035_v4 = vld [vmem:[#allocation42 + $0x8] sm:$0xff]   ;;  %v9036_v0 = vld [vmem:[#allocation42 + $0x10] sm:$0xff]  }
 0xe95   :  { %v5893_v58 = vmax.f32 %v5764_v21, 0.0  ;;  %v5768_v24 = vpop.f32.mrb[55].mxu1 }
 0xe96   :  { %v5894_v25 = vmax.f32 %v5766_v22, 0.0 }
 0xe97   :  { %v5901_v29 = vpack.c.bf16 %v5893_v58, %v5893_v58  ;;  %v9033_v58 = vld [vmem:[#allocation39 + $0x1b8] sm:$0xff]  }
 0xe98   :  { %v5902_v5 = vpack.c.bf16 %v5894_v25, %v5894_v25 }
 0xe9a   :  { %6460 = vmatprep.mubr.bf16.mxu0 %v5902_v5 }
 0xe9b   :  { %6461 = vmatmul.mubr.bf16.vlgmr.msra.gmra.mrb[52].mxu0 %v5901_v29 }
 0xe9c   :  { %8023 = vmatpush3.bf16.msra.mxu0 %v8989_v30  ;;  %6540 = vmatprep.mubr.bf16.mxu0 %v5906_v62  ;;  %v9037_v30 = vld [vmem:[#allocation42 + $0x18] sm:$0xff]   ;;  %v9038_v62 = vld [vmem:[#allocation42 + $0x20] sm:$0xff]  }
 0xe9d   :  { %8024 = vmatprep.subr.bf16.mxu0 %v8992_v32  ;;  %v9039_v32 = vld [vmem:[#allocation42 + $0x28] sm:$0xff]  }
 0xea0   :  { %8025 = vmatpush3.bf16.msra.mxu0 %v8993_v40  ;;  %v9040_v40 = vld [vmem:[#allocation42 + $0x30] sm:$0xff]  }
 0xea1   :  { %8026 = vmatprep.subr.bf16.mxu0 %v8996_v42  ;;  %v9041_v42 = vld [vmem:[#allocation42 + $0x38] sm:$0xff]  }
 0xea4   :  { %8027 = vmatpush3.bf16.msra.mxu0 %v8997_v33  ;;  %v9042_v33 = vld [vmem:[#allocation45 + $0x100] sm:$0xff]  }
 0xea5   :  { %8028 = vmatprep.subr.bf16.mxu0 %v9000_v34  ;;  %v9043_v34 = vld [vmem:[#allocation45 + $0x108] sm:$0xff]  }
 0xea8   :  { %8029 = vmatpush3.bf16.msra.mxu0 %v9001_v35  ;;  %v9044_v35 = vld [vmem:[#allocation45 + $0x110] sm:$0xff]  }
 0xea9   :  { %8030 = vmatprep.subr.bf16.mxu0 %v9004_v36  ;;  %v9045_v36 = vld [vmem:[#allocation45 + $0x118] sm:$0xff]  }
 0xeac   :  { %8031 = vmatpush3.bf16.msra.mxu0 %v9005_v37  ;;  %v9046_v37 = vld [vmem:[#allocation45 + $0x120] sm:$0xff]  }
 0xead   :  { %8032 = vmatprep.subr.bf16.mxu0 %v9008_v38  ;;  %v9047_v38 = vld [vmem:[#allocation45 + $0x128] sm:$0xff]  }
 0xeb0   :  { %8033 = vmatpush3.bf16.msra.mxu0 %v9009_v46 }
 0xeb1   :  { %8034 = vmatprep.subr.bf16.mxu0 %v9012_v47 }
 0xeb2   :  { %v5804_v55 = vpop.f32.mrb[56].mxu1 }
 0xeb3   :  { %v5805_v56 = vadd.f32 %v5804_v55, %v5380_v26  ;;  %v5806_v57 = vpop.f32.mrb[57].mxu1 }
 0xeb4   :  { %v5807_v50 = vadd.f32 %v5806_v57, %v5384_v48  ;;  %v5808_v60 = vpop.f32.mrb[58].mxu1  ;;  %8035 = vmatpush3.bf16.msra.mxu0 %v9013_v52  ;;  %v7678_v52 = vld [vmem:[#allocation40] ss:$0 sm:$0xff] }
 0xeb5   :  { %v5895_v44 = vmax.f32 %v5805_v56, 0.0  ;;  %v5809_v49 = vpop.f32.mrb[59].mxu1  ;;  %8036 = vmatprep.subr.bf16.mxu0 %v9016_v54 }
 0xeb6   :  { %v5896_v41 = vmax.f32 %v5807_v50, 0.0 }
 0xeb7   :  { %v5903_v51 = vpack.c.bf16 %v5895_v44, %v5895_v44 }
 0xeb8   :  { %v5904_v1 = vpack.c.bf16 %v5896_v41, %v5896_v41  ;;  %8037 = vmatpush3.bf16.msra.mxu0 %v9017_v61 }
 0xeb9   :  { %8202 = vmatprep.subr.bf16.mxu0 %v9934_v28 }
 0xeba   :  { %6500 = vmatprep.mubr.bf16.mxu1 %v5904_v1 }
 0xebb   :  { %6501 = vmatmul.mubr.bf16.vlgmr.msra.gmra.mrb[64].mxu1 %v5903_v51  ;;  %6541 = vmatmul.mubr.bf16.vlgmr.msra.gmra.mrb[56].mxu0 %v5905_v53 }
 0xebc   :  { %8045 = vmatpush3.bf16.msra.mxu1 %v9019_v43  ;;  %8218 = vmatprep.mubr.msk.bf16.mxu0 %vm9935_vm0, %v9934_v28 }
 0xebd   :  { %8046 = vmatprep.subr.bf16.mxu1 %v9020_v2  ;;  %8203 = vmatpush3.bf16.msra.mxu0 %v9034_v39  ;;  %v9062_v39 = vld [vmem:[#allocation51 + $0x20] sm:$0xff]  }
 0xebe   :  { %8204 = vmatprep.subr.bf16.mxu0 %v9934_v28 }
 0xec0   :  { %8047 = vmatpush3.bf16.msra.mxu1 %v9021_v63 }
 0xec1   :  { %8048 = vmatprep.subr.bf16.mxu1 %v9022_v3  ;;  %8205 = vmatpush3.bf16.msra.mxu0 %v9035_v4  ;;  %v9063_v4 = vld [vmem:[#allocation51 + $0x28] sm:$0xff]  }
 0xec2   :  { %8206 = vmatprep.subr.bf16.mxu0 %v9934_v28 }
 0xec4   :  { %8049 = vmatpush3.bf16.msra.mxu1 %v9023_v31 }
 0xec5   :  { %8050 = vmatprep.subr.bf16.mxu1 %v9024_v6  ;;  %8207 = vmatpush3.bf16.msra.mxu0 %v9036_v0 }
 0xec6   :  { %8208 = vmatprep.subr.bf16.mxu0 %v9934_v28 }
 0xec8   :  { %8051 = vmatpush3.bf16.msra.mxu1 %v9025_v7 }
 0xec9   :  { %8052 = vmatprep.subr.bf16.mxu1 %v9026_v8  ;;  %8209 = vmatpush3.bf16.msra.mxu0 %v9037_v30  ;;  %v9049_v8 = vld [vmem:[#allocation45 + $0x138] sm:$0xff]   ;;  %v7760_v30 = vld [vmem:[#allocation46] ss:$0 sm:$0xff] }
 0xeca   :  { %8210 = vmatprep.subr.bf16.mxu0 %v9934_v28 }
 0xecc   :  { %8053 = vmatpush3.bf16.msra.mxu1 %v9027_v14  ;;  %v9050_v14 = vld [vmem:[#allocation48] sm:$0xff]  }
 0xecd   :  { %8054 = vmatprep.subr.bf16.mxu1 %v9028_v15  ;;  %8211 = vmatpush3.bf16.msra.mxu0 %v9038_v62  ;;  %v9051_v15 = vld [vmem:[#allocation48 + $0x8] sm:$0xff]  }
 0xece   :  { %8212 = vmatprep.subr.bf16.mxu0 %v9934_v28 }
 0xed0   :  { %8055 = vmatpush3.bf16.msra.mxu1 %v9029_v17  ;;  %v9052_v17 = vld [vmem:[#allocation48 + $0x10] sm:$0xff]  }
 0xed1   :  { %8056 = vmatprep.subr.bf16.mxu1 %v9030_v18  ;;  %8213 = vmatpush3.bf16.msra.mxu0 %v9039_v32  ;;  %v9053_v18 = vld [vmem:[#allocation48 + $0x18] sm:$0xff]  }
 0xed2   :  { %v5886_v21 = vpop.f32.mrb[60].mxu1  ;;  %8214 = vmatprep.subr.bf16.mxu0 %v9934_v28 }
 0xed3   :  { %v5887_v12 = vadd.f32 %v5886_v21, %v5396_v19  ;;  %v5888_v22 = vpop.f32.mrb[61].mxu1  ;;  %v9054_v19 = vld [vmem:[#allocation48 + $0x20] sm:$0xff]  }
 0xed4   :  { %v5889_v9 = vadd.f32 %v5888_v22, %v5400_v20  ;;  %v5890_v23 = vpop.f32.mrb[62].mxu1  ;;  %8057 = vmatpush3.bf16.msra.mxu1 %v9031_v16  ;;  %v9055_v20 = vld [vmem:[#allocation48 + $0x28] sm:$0xff]   ;;  %v7743_v16 = vld [vmem:[#allocation43] ss:$0 sm:$0xff] }
 0xed5   :  { %v5899_v24 = vmax.f32 %v5887_v12, 0.0  ;;  %v5891_v25 = vpop.f32.mrb[63].mxu1  ;;  %8058 = vmatprep.subr.bf16.mxu1 %v9032_v27  ;;  %8215 = vmatpush3.bf16.msra.mxu0 %v9040_v40 }
 0xed6   :  { %v5900_v29 = vmax.f32 %v5889_v9, 0.0  ;;  %8216 = vmatprep.subr.bf16.mxu0 %v9934_v28  ;;  %v9058_v25 = vld [vmem:[#allocation51] sm:$0xff]  }
 0xed7   :  { %v5907_v5 = vpack.c.bf16 %v5899_v24, %v5899_v24  ;;  %v9057_v24 = vld [vmem:[#allocation48 + $0x38] sm:$0xff]  }
 0xed8   :  { %v5908_v10 = vpack.c.bf16 %v5900_v29, %v5900_v29  ;;  %8059 = vmatpush3.bf16.msra.mxu1 %v9033_v58  ;;  %v9056_v58 = vld [vmem:[#allocation48 + $0x30] sm:$0xff]  }
 0xed9   :  { %8222 = vmatprep.subr.bf16.mxu1 %v9934_v28  ;;  %8217 = vmatpush3.bf16.msra.mxu0 %v9041_v42  ;;  %v9059_v29 = vld [vmem:[#allocation51 + $0x8] sm:$0xff]  }
 0xeda   :  { %6580 = vmatprep.mubr.bf16.mxu1 %v5908_v10  ;;  %8242 = vmatprep.subr.bf16.mxu0 %v9934_v28  ;;  %v9060_v10 = vld [vmem:[#allocation51 + $0x10] sm:$0xff]  }
 0xedb   :  { %6581 = vmatmul.mubr.bf16.vlgmr.msra.gmra.mrb[68].mxu1 %v5907_v5  ;;  %v9061_v5 = vld [vmem:[#allocation51 + $0x18] sm:$0xff]  }
 0xedc   :  { %8238 = vmatprep.mubr.msk.bf16.mxu1 %vm9935_vm0, %v9934_v28  ;;  %8223 = vmatpush3.bf16.msra.mxu1 %v9042_v33 }
 0xedd   :  { %8224 = vmatprep.subr.bf16.mxu1 %v9934_v28 }
 0xee0   :  { %8225 = vmatpush3.bf16.msra.mxu1 %v9043_v34 }
 0xee1   :  { %8226 = vmatprep.subr.bf16.mxu1 %v9934_v28 }
 0xee4   :  { %8227 = vmatpush3.bf16.msra.mxu1 %v9044_v35 }
 0xee5   :  { %8228 = vmatprep.subr.bf16.mxu1 %v9934_v28 }
 0xee8   :  { %8229 = vmatpush3.bf16.msra.mxu1 %v9045_v36  ;;  %v9064_v36 = vld [vmem:[#allocation51 + $0x30] sm:$0xff]  }
 0xee9   :  { %8230 = vmatprep.subr.bf16.mxu1 %v9934_v28 }
 0xeec   :  { %8231 = vmatpush3.bf16.msra.mxu1 %v9046_v37  ;;  %v9065_v37 = vld [vmem:[#allocation51 + $0x38] sm:$0xff]  }
 0xeed   :  { %8232 = vmatprep.subr.bf16.mxu1 %v9934_v28 }
 0xef0   :  { %8233 = vmatpush3.bf16.msra.mxu1 %v9047_v38  ;;  %v7761_v38 = vld [vmem:[#allocation49] ss:$0 sm:$0xff] }
 0xef1   :  { %8234 = vmatprep.subr.bf16.mxu1 %v9934_v28 }
 0xef4   :  { %8235 = vmatpush3.bf16.msra.mxu1 %v9048_v45 }
 0xef5   :  { %8236 = vmatprep.subr.bf16.mxu1 %v9934_v28 }
 0xef8   :  { %8237 = vmatpush3.bf16.msra.mxu1 %v9049_v8 }
 0xef9   :  { %8262 = vmatprep.subr.bf16.mxu1 %v9934_v28 }
 0xf6e   :  { %v7994_v46 = vpop.f32.mrb[52].mxu0 }
 0xf6f   :  { %v7995_v47 = vpop.f32.mrb[53].mxu0 }
 0xf70   :  { %v7996_v26 = vadd.f32 %v7995_v47, %v7994_v46  ;;  %v7997_v11 = vpop.f32.mrb[54].mxu0 }
 0xf71   :  { %v7998_v48 = vpop.f32.mrb[55].mxu0 }
 0xf72   :  { %v6463_v59 = vadd.f32 %v7996_v26, %v7678_v52  ;;  %v7770_v52 = vld [vmem:[#allocation52] ss:$0 sm:$0xff] }
 0xf8e   :  { %v8016_v54 = vpop.f32.mrb[64].mxu1  ;;  %v8038_v55 = vpop.f32.mrb[56].mxu0 }
 0xf8f   :  { %v8017_v56 = vpop.f32.mrb[65].mxu1  ;;  %v8039_v57 = vpop.f32.mrb[57].mxu0 }
 0xf90   :  { %v8018_v50 = vadd.f32 %v8017_v56, %v8016_v54  ;;  %v8019_v60 = vpop.f32.mrb[66].mxu1  ;;  %v8040_v61 = vadd.f32 %v8039_v57, %v8038_v55  ;;  %v8041_v44 = vpop.f32.mrb[58].mxu0 }
 0xf91   :  { %v8020_v49 = vpop.f32.mrb[67].mxu1  ;;  %v8042_v41 = vpop.f32.mrb[59].mxu0 }
 0xf92   :  { %v6503_v51 = vadd.f32 %v8018_v50, %v6463_v59 }
 0xf94   :  { %v6543_v53 = vadd.f32 %v8040_v61, %v6503_v51 }
 0xfae   :  { %v8060_v1 = vpop.f32.mrb[68].mxu1 }
 0xfaf   :  { %v8061_v43 = vpop.f32.mrb[69].mxu1 }
 0xfb0   :  { %v8062_v2 = vadd.f32 %v8061_v43, %v8060_v1  ;;  %v8063_v63 = vpop.f32.mrb[70].mxu1 }
 0xfb1   :  { %v8064_v3 = vpop.f32.mrb[71].mxu1 }
 0xfb2   :  { %v6583_v31 = vadd.f32 %v8062_v2, %v6543_v53 }
 0xfb4   :  { %v6588_v6 = vmax.f32 %v6583_v31, 0.0 }
 0xfb6   :  { %v6589_v7 = vpack.c.bf16 %v6588_v6, %v6588_v6 }
 0xfb8   :  { %8219 = vmatmul.mubr.bf16.vlgmr.msra.gmra.mrb[60].mxu0 %v6589_v7 }
 0xfb9   :  { %8258 = vmatprep.mubr.msk.bf16.mxu0 %vm9935_vm0, %v9934_v28  ;;  %8243 = vmatpush3.bf16.msra.mxu0 %v9050_v14 }
 0xfba   :  { %8244 = vmatprep.subr.bf16.mxu0 %v9934_v28 }
 0xfbd   :  { %8245 = vmatpush3.bf16.msra.mxu0 %v9051_v15 }
 0xfbe   :  { %8246 = vmatprep.subr.bf16.mxu0 %v9934_v28 }
 0xfc1   :  { %8247 = vmatpush3.bf16.msra.mxu0 %v9052_v17 }
 0xfc2   :  { %8248 = vmatprep.subr.bf16.mxu0 %v9934_v28 }
 0xfc5   :  { %8249 = vmatpush3.bf16.msra.mxu0 %v9053_v18 }
 0xfc6   :  { %8250 = vmatprep.subr.bf16.mxu0 %v9934_v28 }
 0xfc9   :  { %8251 = vmatpush3.bf16.msra.mxu0 %v9054_v19 }
 0xfca   :  { %8252 = vmatprep.subr.bf16.mxu0 %v9934_v28 }
 0xfcd   :  { %8253 = vmatpush3.bf16.msra.mxu0 %v9055_v20 }
 0xfce   :  { %8254 = vmatprep.subr.bf16.mxu0 %v9934_v28 }
 0xfd1   :  { %8255 = vmatpush3.bf16.msra.mxu0 %v9056_v58 }
 0xfd2   :  { %8256 = vmatprep.subr.bf16.mxu0 %v9934_v28 }
 0xfd5   :  { %8257 = vmatpush3.bf16.msra.mxu0 %v9057_v24 }
0x108b   :  { %v6695_v27 = vpop.f32.mrb[60].mxu0 }
0x108c   :  { %v6696_v21 = vadd.f32 %v7743_v16, %v6695_v27  ;;  %v8220_v12 = vpop.f32.mrb[61].mxu0 }
0x108d   :  { %v6698_v22 = vpop.f32.mrb[62].mxu0 }
0x108e   :  { %v6701_v9 = vpack.c.bf16 %v6696_v21, %v6696_v21  ;;  %v8221_v23 = vpop.f32.mrb[63].mxu0 }
0x1090   :  { %8239 = vmatmul.mubr.bf16.vlgmr.msra.gmra.mrb[72].mxu1 %v6701_v9 }
0x1091   :  { %8278 = vmatprep.mubr.msk.bf16.mxu1 %vm9935_vm0, %v9934_v28  ;;  %8263 = vmatpush3.bf16.msra.mxu1 %v9058_v25 }
0x1092   :  { %8264 = vmatprep.subr.bf16.mxu1 %v9934_v28 }
0x1095   :  { %8265 = vmatpush3.bf16.msra.mxu1 %v9059_v29 }
0x1096   :  { %8266 = vmatprep.subr.bf16.mxu1 %v9934_v28 }
0x1099   :  { %8267 = vmatpush3.bf16.msra.mxu1 %v9060_v10 }
0x109a   :  { %8268 = vmatprep.subr.bf16.mxu1 %v9934_v28 }
0x109d   :  { %8269 = vmatpush3.bf16.msra.mxu1 %v9061_v5 }
0x109e   :  { %8270 = vmatprep.subr.bf16.mxu1 %v9934_v28 }
0x10a1   :  { %8271 = vmatpush3.bf16.msra.mxu1 %v9062_v39 }
0x10a2   :  { %8272 = vmatprep.subr.bf16.mxu1 %v9934_v28 }
0x10a5   :  { %8273 = vmatpush3.bf16.msra.mxu1 %v9063_v4 }
0x10a6   :  { %8274 = vmatprep.subr.bf16.mxu1 %v9934_v28 }
0x10a9   :  { %8275 = vmatpush3.bf16.msra.mxu1 %v9064_v36 }
0x10aa   :  { %8276 = vmatprep.subr.bf16.mxu1 %v9934_v28 }
0x10ad   :  { %8277 = vmatpush3.bf16.msra.mxu1 %v9065_v37 }
0x1163   :  { %v6800_v0 = vpop.f32.mrb[72].mxu1 }
0x1164   :  { %v6806_v62 = vadd.f32 %v6800_v0, %v10568_v13  ;;  %v8240_v32 = vpop.f32.mrb[73].mxu1 }
0x1165   :  { %v6803_v40 = vpop.f32.mrb[74].mxu1 }
0x1166   :  { %v6814_v42 = vadd.f32 %v7760_v30, %v6806_v62  ;;  %v8241_v33 = vpop.f32.mrb[75].mxu1 }
0x1168   :  { %v6815_v34 = vmax.f32 %v6814_v42, 0.0 }
0x116a   :  { %v6816_v35 = vpack.c.bf16 %v6815_v34, %v6815_v34 }
0x116c   :  { %8259 = vmatmul.mubr.bf16.vlgmr.msra.gmra.mrb[64].mxu0 %v6816_v35 }
0x123f   :  { %v6922_v45 = vpop.f32.mrb[64].mxu0 }
0x1240   :  { %v6923_v46 = vadd.f32 %v7761_v38, %v6922_v45  ;;  %v8260_v47 = vpop.f32.mrb[65].mxu0 }
0x1241   :  { %v6925_v26 = vpop.f32.mrb[66].mxu0 }
0x1242   :  { %v6928_v13 = vmax.f32 %v6923_v46, 0.0  ;;  %v8261_v11 = vpop.f32.mrb[67].mxu0 }
0x1244   :  { %v6929_v48 = vpack.c.bf16 %v6928_v13, %v6928_v13 }
0x1246   :  { %8279 = vmatmul.mubr.bf16.vlgmr.msra.gmra.mrb[76].mxu1 %v6929_v48 }
0x1319   :  { %v7035_v54 = vpop.f32.mrb[76].mxu1 }
0x131a   :  { %v7036_v55 = vadd.f32 %v7770_v52, %v7035_v54  ;;  %v8280_v56 = vpop.f32.mrb[77].mxu1 }
0x131b   :  { %v7038_v57 = vpop.f32.mrb[78].mxu1 }
0x131c   :  { %7041 = vst [vmem:[%s10149_s12] sm:$0xff] %v7036_v55  ;;  %v8281_v59 = vpop.f32.mrb[79].mxu1 }
0x131d   :  { %7046 = vsyncpa [#allocation3], 1 }
0x131e   :  { %7047 = vsyncpa [#allocation5], 1 }
0x131f   :  { %7048 = vsyncpa [#allocation8], 1 }
0x1320   :  { %7049 = vsyncpa [#allocation11], 1 }
0x1321   :  { %7050 = vsyncpa [#allocation14], 1 }
0x1322   :  { %7051 = vsyncpa [#allocation17], 1 }
0x1323   :  { %7052 = vsyncpa [#allocation20], 1 }
0x1324   :  { %7053 = vsyncpa [#allocation23], 1 }
0x1325   :  { %7054 = vsyncpa [#allocation26], 1 }
0x1326   :  { %7055 = vsyncpa [#allocation29], 1 }
0x1327   :  { %7056 = vsyncpa [#allocation32], 1 }
0x1328   :  { %7057 = vsyncpa [#allocation35], 1 }
0x1329   :  { %7058 = vsyncpa [#allocation38], 1 }
0x132a   :  { %7059 = vsyncpa [#allocation41], 1 }
0x132b   :  { %7060 = vsyncpa [#allocation44], 1 }
0x132c   :  { %7061 = vsyncpa [#allocation47], 1 }
0x132d   :  { %7062 = vsyncpa [#allocation50], 1 }
0x132e   :  { %7063 = vsyncpa [#allocation53], 1 }

</bundles_post_ra>
